<compile_context>
chip_gen: v5e
topology: v5e:2x2
jax: 0.10.0
libtpu: 0.0.40
codegen_flags: <defaults>
</compile_context>

<pallas_src>
import functools
import math

import jax
import jax.numpy as jnp
from jax.experimental import pallas as pl
from jax.experimental.pallas import tpu as pltpu

_VMEM_LIMIT = 32 * 1024 * 1024  # explicit budget; far above need, safe on v5e/v6e/v7x


def _round_up(x, m):
    return ((x + m - 1) // m) * m


# ---------------------------------------------------------------------------
# Pallas kernels
# ---------------------------------------------------------------------------
def _pointconv_kernel(msg_ref, w_ref, t_ref, out_ref, *, k):
    # msg_ref : (K, TM, Cin+1) bf16 neighbor-major; last lane is a constant 1
    #           so the (BN-scaled) bias is folded into the matmul.
    # w_ref   : (Cin+1, 128)   bf16 [W*s ; b*s], Cout zero-padded to 128 lanes.
    # t_ref   : (1, 128)       f32  BN shift, applied AFTER the max (deferred).
    # out_ref : (TM, 128)      bf16 max-aggregated node features (lane dense).
    tm = out_ref.shape[0]
    cp = w_ref.shape[1]
    w = w_ref[...]
    # Running max over neighbor chunks.  ReLU is implicit: accumulator starts
    # at 0 and max(0, h_1, ..., h_K) == max_k relu(h_k).  Padded query rows are
    # all-zero (incl. the bias lane) -> contribute 0 and are sliced off later.
    acc = jnp.zeros((tm, cp), jnp.float32)
    for kk in range(k):  # K is static; fully unrolled (tiny per-chunk matmuls)
        acc = jnp.maximum(
            acc, jnp.dot(msg_ref[kk], w, preferred_element_type=jnp.float32))
    out_ref[...] = (acc + t_ref[...]).astype(out_ref.dtype)


def pointconv_mlp_maxagg(msg, w, t, m, k, cout, tm_desired=128):
    # msg: (K, m, cin+1) bf16 neighbor-major; w: (cin+1, 128) bf16; t: (1, 128) f32
    cinp = msg.shape[-1]
    cp = w.shape[1]
    tm = min(tm_desired, _round_up(m, 16))  # multiple of 16 (bf16 sublane pack)
    m_pad = _round_up(m, tm)
    if m_pad != m:
        msg = jnp.pad(msg, ((0, 0), (0, m_pad - m), (0, 0)))
    out = pl.pallas_call(
        functools.partial(_pointconv_kernel, k=k),
        out_shape=jax.ShapeDtypeStruct((m_pad, cp), jnp.bfloat16),
        grid_spec=pltpu.PrefetchScalarGridSpec(
            num_scalar_prefetch=0,
            grid=(m_pad // tm,),
            in_specs=[
                pl.BlockSpec((k, tm, cinp), lambda i: (0, i, 0)),
                pl.BlockSpec((cinp, cp), lambda i: (0, 0)),
                pl.BlockSpec((1, cp), lambda i: (0, 0)),
            ],
            out_specs=pl.BlockSpec((tm, cp), lambda i: (i, 0)),
        ),
        compiler_params=pltpu.CompilerParams(
            dimension_semantics=("parallel",),
            vmem_limit_bytes=_VMEM_LIMIT),
    )(msg, w, t)
    return out[:m, :cout]


def _global_head_kernel(x_ref, w1_ref, t1_ref, wc_ref, bc_ref, out_ref, gmax_ref,
                        *, ncls):
    # Grid = (graph, row_tile).  Running max per graph kept in VMEM scratch.
    # x_ref : (TN, Cin+1) bf16 rows of [x || pos || 1]  (zero rows = padding)
    # w1_ref: (Cin+1, 128) bf16 [W*s ; b*s]; t1_ref: (1,128) f32 BN shift
    # wc_ref: (128, 128) f32 classifier (lanes >= ncls zero); bc_ref: (1,128) f32
    # out_ref: (8, 128) f32 per-graph block; row 0 / first ncls lanes are real.
    j = pl.program_id(1)

    @pl.when(j == 0)
    def _():
        gmax_ref[...] = jnp.zeros_like(gmax_ref)  # 0-floor == ReLU

    h = jnp.dot(x_ref[...], w1_ref[...], preferred_element_type=jnp.float32)
    gmax_ref[...] = jnp.maximum(gmax_ref[...], jnp.max(h, axis=0, keepdims=True))

    @pl.when(j == pl.num_programs(1) - 1)
    def _():
        g = gmax_ref[...] + t1_ref[...]                       # deferred BN shift
        logits = jnp.dot(g, wc_ref[...], preferred_element_type=jnp.float32) + bc_ref[...]
        logits = jnp.maximum(logits, 0.0)                     # F.relu(classifier(x))
        lane = jax.lax.broadcasted_iota(jnp.int32, logits.shape, 1)
        logits = jnp.where(lane < ncls, logits, -1e30)        # mask padded lanes
        mx = jnp.max(logits, axis=-1, keepdims=True)
        lse = jnp.log(jnp.sum(jnp.exp(logits - mx), axis=-1, keepdims=True)) + mx
        out_ref[...] = jnp.broadcast_to(logits - lse, out_ref.shape)


def global_head(x2, pos2, B, n_per, w1, t1, wc, bc, ncls=10, tn_desired=256):
    # x2: (B*n_per, 64) bf16, pos2: (B*n_per, 3) f32, rows grouped per graph.
    rows = x2.shape[0]
    x3 = jnp.concatenate(
        [x2.astype(jnp.bfloat16), pos2.astype(jnp.bfloat16),
         jnp.ones((rows, 1), jnp.bfloat16)], axis=-1)         # bias lane appended
    cin = x3.shape[-1]
    cp = w1.shape[1]
    ncls_p = wc.shape[1]
    tn = min(tn_desired, _round_up(n_per, 16))
    n_per_pad = _round_up(n_per, tn)
    x3b = x3.reshape(B, n_per, cin)
    if n_per_pad != n_per:
        x3b = jnp.pad(x3b, ((0, 0), (0, n_per_pad - n_per), (0, 0)))
    x3f = x3b.reshape(B * n_per_pad, cin)
    n_tiles = n_per_pad // tn
    out = pl.pallas_call(
        functools.partial(_global_head_kernel, ncls=ncls),
        out_shape=jax.ShapeDtypeStruct((B * 8, ncls_p), jnp.float32),
        grid_spec=pltpu.PrefetchScalarGridSpec(
            num_scalar_prefetch=0,
            grid=(B, n_tiles),
            in_specs=[
                pl.BlockSpec((tn, cin), lambda g, j: (g * n_tiles + j, 0)),
                pl.BlockSpec((cin, cp), lambda g, j: (0, 0)),
                pl.BlockSpec((1, cp), lambda g, j: (0, 0)),
                pl.BlockSpec((cp, ncls_p), lambda g, j: (0, 0)),
                pl.BlockSpec((1, ncls_p), lambda g, j: (0, 0)),
            ],
            out_specs=pl.BlockSpec((8, ncls_p), lambda g, j: (g, 0)),
            scratch_shapes=[pltpu.VMEM((1, cp), jnp.float32)],
        ),
        compiler_params=pltpu.CompilerParams(
            dimension_semantics=("parallel", "arbitrary"),
            vmem_limit_bytes=_VMEM_LIMIT),
    )(x3f, w1, t1, wc, bc)
    return out.reshape(B, 8, ncls_p)[:, 0, :ncls]


# ---------------------------------------------------------------------------
# Plain-JAX glue: farthest point sampling, radius graph, gathers
# ---------------------------------------------------------------------------
def fps_per_graph(pos_g, n_sample):
    # Deterministic farthest point sampling starting at index 0.
    # TODO(synk): PyG fps picks a random start point; outputs won't match
    # sample-for-sample, only the algorithmic structure.
    n = pos_g.shape[0]

    def body(i, state):
        idxs, mind = state
        last = idxs[i - 1]
        d = jnp.sum((pos_g - pos_g[last]) ** 2, axis=-1)
        mind = jnp.minimum(mind, d)
        idxs = idxs.at[i].set(jnp.argmax(mind).astype(jnp.int32))
        return idxs, mind

    idxs0 = jnp.zeros((n_sample,), jnp.int32)
    mind0 = jnp.full((n,), jnp.inf, jnp.float32)
    idxs, _ = jax.lax.fori_loop(1, n_sample, body, (idxs0, mind0))
    return idxs


def radius_per_graph(pos_src, pos_q, q_self_idx, r, k):
    # Up to k in-radius sources per query, sort- and scatter-free: rank valid
    # sources with a cumsum and select with a one-hot matmul.  Unfilled slots
    # get the query's OWN index (a guaranteed in-radius self-edge), so no
    # validity mask is needed downstream (duplicates never change a max).
    n = pos_src.shape[0]
    d2 = jnp.sum((pos_q[:, None, :] - pos_src[None, :, :]) ** 2, axis=-1)  # (q, n)
    within = d2 <= r * r
    rank = jnp.cumsum(within.astype(jnp.int32), axis=-1) - 1
    slot = jnp.where(within & (rank < k), rank, k)                         # in [0, k]
    onehot = (slot[:, :, None] == jnp.arange(k, dtype=jnp.int32)).astype(jnp.float32)
    nbr = jnp.einsum('qnk,n->qk', onehot,
                     jnp.arange(n, dtype=jnp.float32)).astype(jnp.int32)   # (q, k)
    n_valid = jnp.minimum(jnp.sum(within.astype(jnp.int32), axis=-1), k)
    filled = jnp.arange(k, dtype=jnp.int32)[None, :] < n_valid[:, None]
    return jnp.where(filled, nbr, q_self_idx[:, None])


def sa_module(x, pos, B, n_per, ratio, r, K, params):
    # x: (B*n_per, Cx) bf16 or None; pos: (B*n_per, 3) grouped per graph.
    n_samp = int(math.ceil(ratio * n_per))
    pos_b = pos.reshape(B, n_per, 3)
    idx_local = jax.vmap(lambda p: fps_per_graph(p, n_samp))(pos_b)        # (B, n_samp)
    idx = (idx_local + (jnp.arange(B, dtype=jnp.int32) * n_per)[:, None]).reshape(-1)
    pos_q = pos[idx]                                                       # (B*n_samp, 3)

    nbr_l = jax.vmap(lambda ps, pq, qi: radius_per_graph(ps, pq, qi, r, K))(
        pos_b, pos_q.reshape(B, n_samp, 3), idx_local)                     # (B, n_samp, K)
    nbr = (nbr_l + (jnp.arange(B, dtype=jnp.int32) * n_per)[:, None, None]
           ).reshape(B * n_samp, K)

    m = B * n_samp
    nbr_t = nbr.T                                                          # (K, m) neighbor-major
    rel = (pos[nbr_t] - pos_q[None, :, :]).astype(jnp.bfloat16)            # (K, m, 3)
    ones = jnp.ones((K, m, 1), jnp.bfloat16)                               # bias lane
    if x is None:
        msg = jnp.concatenate([rel, ones], axis=-1)
    else:
        msg = jnp.concatenate([x[nbr_t], rel, ones], axis=-1)
    # TODO(synk): at production sizes the neighbor gather could move in-kernel
    # (scalar-prefetched nbr indices + manual DMA) to avoid K-duplicated HBM traffic.

    w, t, cout = params
    x_out = pointconv_mlp_maxagg(msg, w, t, m, K, cout)
    return x_out, pos_q, n_samp


# ---------------------------------------------------------------------------
# Parameter init / packing (deterministic, PyTorch-style uniform fan-in init)
# ---------------------------------------------------------------------------
def init_linear(key, fan_in, fan_out):
    k1, k2 = jax.random.split(key)
    bound = 1.0 / math.sqrt(fan_in)
    w = jax.random.uniform(k1, (fan_in, fan_out), minval=-bound, maxval=bound,
                           dtype=jnp.float32)
    b = jax.random.uniform(k2, (fan_out,), minval=-bound, maxval=bound,
                           dtype=jnp.float32)
    return w, b


def bn_eval_params(c):
    # TODO(synk): training-mode BatchNorm1d (batch statistics over messages) is
    # not replicated; eval-mode running stats are used.
    gamma = jnp.ones((c,), jnp.float32)
    beta = jnp.zeros((c,), jnp.float32)
    rm = jnp.zeros((c,), jnp.float32)
    rv = jnp.ones((c,), jnp.float32)
    return gamma, beta, rm, rv


def pack_mlp_params(w, b, gamma, beta, rm, rv, eps=1e-5, cp=128):
    # MLP block is Lin -> ReLU -> BN(eval): y = relu(x@W + b) * s + t with
    # s = gamma/sqrt(rv+eps) > 0, t = beta - rm*s.  Fold s into the linear and
    # append the folded bias as the last W row (inputs carry a constant-1 lane):
    #   y = relu([x,1] @ [W*s ; b*s]) + t,  t applied after the max.
    # Cout is zero-padded to cp=128 so kernel stores are lane-dense.
    s = gamma / jnp.sqrt(rv + eps)
    t = beta - rm * s
    wf = jnp.concatenate([w * s[None, :], (b * s)[None, :]], axis=0)   # (cin+1, cout)
    cout = w.shape[1]
    w_p = jnp.zeros((w.shape[0] + 1, cp), jnp.float32).at[:, :cout].set(wf)
    w_p = w_p.astype(jnp.bfloat16)
    t_p = jnp.zeros((1, cp), jnp.float32).at[0, :cout].set(t)
    return w_p, t_p


def pack_classifier(wc, bc, cp=128):
    ncls = wc.shape[1]
    wc_p = jnp.zeros((wc.shape[0], cp), jnp.float32).at[:, :ncls].set(wc)
    bc_p = jnp.zeros((1, cp), jnp.float32).at[0, :ncls].set(bc)
    return wc_p, bc_p


# ---------------------------------------------------------------------------
@functools.partial(jax.jit, static_argnums=(2, 3, 4))
def forward(pos, params, B, N0, K):
    (w1, t1), (w2, t2), (w3, t3), (wc, bc) = params
    # SAModule(0.5, 0.2, MLP([3, 32]))
    x1, pos1, n1 = sa_module(None, pos, B, N0, 0.5, 0.2, K, (w1, t1, 32))
    # SAModule(0.25, 0.4, MLP([32 + 3, 64]))
    x2, pos2, n2 = sa_module(x1, pos1, B, n1, 0.25, 0.4, K, (w2, t2, 64))
    # GlobalSAModule(MLP([64 + 3, 128])) + Lin(128, 10) + ReLU + log_softmax
    return global_head(x2, pos2, B, n2, w3, t3, wc, bc, ncls=10)


if __name__ == "__main__":
    B, N0, K = 2, 64, 32

    key = jax.random.PRNGKey(0)
    k_pos, k1, k2, k3, kc = jax.random.split(key, 5)

    # data.x = None (purely geometric features), data.pos, data.batch (contiguous)
    pos = jax.random.uniform(k_pos, (B * N0, 3), minval=-1.0, maxval=1.0,
                             dtype=jnp.float32)

    w1, b1 = init_linear(k1, 3, 32)
    w2, b2 = init_linear(k2, 32 + 3, 64)
    w3, b3 = init_linear(k3, 64 + 3, 128)
    wc, bc = init_linear(kc, 128, 10)

    p1 = pack_mlp_params(w1, b1, *bn_eval_params(32))
    p2 = pack_mlp_params(w2, b2, *bn_eval_params(64))
    p3 = pack_mlp_params(w3, b3, *bn_eval_params(128))
    params = (p1, p2, p3, pack_classifier(wc, bc))

    out = forward(pos, params, B, N0, K)
    out = jax.block_until_ready(out)
    assert out.shape == (B, 10)
    assert bool(jnp.all(jnp.isfinite(out)))
    print("KERNEL_OK")
</pallas_src>

<mosaic_0001>
module attributes {stable_mosaic.version = 11 : i64} {
  func.func @_pointconv_kernel(%arg0: i32, %arg1: memref<32x64x4xbf16, #tpu.memory_space<vmem>>, %arg2: memref<4x128xbf16, #tpu.memory_space<vmem>>, %arg3: memref<1x128xf32, #tpu.memory_space<vmem>>, %arg4: memref<64x128xbf16, #tpu.memory_space<vmem>>) attributes {dimension_semantics = [#tpu.dimension_semantics<parallel>], iteration_bounds = array<i64: 1>, scalar_prefetch = 0 : i64, scratch_operands = 0 : i64, tpu.core_type = #tpu.core_type<tc>, window_params = [{transform_indices = @transform_0, window_bounds = array<i64: 32, 64, 4>}, {pipeline_mode = #tpu.pipeline_mode<synchronous>, transform_indices = @transform_1, window_bounds = array<i64: 4, 128>}, {pipeline_mode = #tpu.pipeline_mode<synchronous>, transform_indices = @transform_2, window_bounds = array<i64: 1, 128>}, {transform_indices = @transform_3, window_bounds = array<i64: 64, 128>}]} {
    %c0 = arith.constant 0 : index
    %c0_0 = arith.constant 0 : index
    %0 = vector.load %arg2[%c0, %c0_0] : memref<4x128xbf16, #tpu.memory_space<vmem>>, vector<4x128xbf16>
    %cst = arith.constant 0.000000e+00 : f32
    %1 = vector.broadcast %cst : f32 to vector<64x128xf32>
    %c0_1 = arith.constant 0 : index
    %c0_2 = arith.constant 0 : index
    %c0_3 = arith.constant 0 : index
    %2 = vector.load %arg1[%c0_1, %c0_2, %c0_3] : memref<32x64x4xbf16, #tpu.memory_space<vmem>>, vector<1x64x4xbf16>
    %3 = vector.shape_cast %2 : vector<1x64x4xbf16> to vector<64x4xbf16>
    %cst_4 = arith.constant dense<0.000000e+00> : vector<64x128xf32>
    %4 = tpu.matmul %3, %0, %cst_4 {dimension_numbers = #tpu.dot_dimension_numbers<[1], [0], [0], [1], [0, 0, 1, 1], [], []>} : vector<64x4xbf16>, vector<4x128xbf16>, vector<64x128xf32> -> vector<64x128xf32>
    %5 = arith.maximumf %1, %4 : vector<64x128xf32>
    %c1 = arith.constant 1 : index
    %c0_5 = arith.constant 0 : index
    %c0_6 = arith.constant 0 : index
    %6 = vector.load %arg1[%c1, %c0_5, %c0_6] : memref<32x64x4xbf16, #tpu.memory_space<vmem>>, vector<1x64x4xbf16>
    %7 = vector.shape_cast %6 : vector<1x64x4xbf16> to vector<64x4xbf16>
    %cst_7 = arith.constant dense<0.000000e+00> : vector<64x128xf32>
    %8 = tpu.matmul %7, %0, %cst_7 {dimension_numbers = #tpu.dot_dimension_numbers<[1], [0], [0], [1], [0, 0, 1, 1], [], []>} : vector<64x4xbf16>, vector<4x128xbf16>, vector<64x128xf32> -> vector<64x128xf32>
    %9 = arith.maximumf %5, %8 : vector<64x128xf32>
    %c2 = arith.constant 2 : index
    %c0_8 = arith.constant 0 : index
    %c0_9 = arith.constant 0 : index
    %10 = vector.load %arg1[%c2, %c0_8, %c0_9] : memref<32x64x4xbf16, #tpu.memory_space<vmem>>, vector<1x64x4xbf16>
    %11 = vector.shape_cast %10 : vector<1x64x4xbf16> to vector<64x4xbf16>
    %cst_10 = arith.constant dense<0.000000e+00> : vector<64x128xf32>
    %12 = tpu.matmul %11, %0, %cst_10 {dimension_numbers = #tpu.dot_dimension_numbers<[1], [0], [0], [1], [0, 0, 1, 1], [], []>} : vector<64x4xbf16>, vector<4x128xbf16>, vector<64x128xf32> -> vector<64x128xf32>
    %13 = arith.maximumf %9, %12 : vector<64x128xf32>
    %c3 = arith.constant 3 : index
    %c0_11 = arith.constant 0 : index
    %c0_12 = arith.constant 0 : index
    %14 = vector.load %arg1[%c3, %c0_11, %c0_12] : memref<32x64x4xbf16, #tpu.memory_space<vmem>>, vector<1x64x4xbf16>
    %15 = vector.shape_cast %14 : vector<1x64x4xbf16> to vector<64x4xbf16>
    %cst_13 = arith.constant dense<0.000000e+00> : vector<64x128xf32>
    %16 = tpu.matmul %15, %0, %cst_13 {dimension_numbers = #tpu.dot_dimension_numbers<[1], [0], [0], [1], [0, 0, 1, 1], [], []>} : vector<64x4xbf16>, vector<4x128xbf16>, vector<64x128xf32> -> vector<64x128xf32>
    %17 = arith.maximumf %13, %16 : vector<64x128xf32>
    %c4 = arith.constant 4 : index
    %c0_14 = arith.constant 0 : index
    %c0_15 = arith.constant 0 : index
    %18 = vector.load %arg1[%c4, %c0_14, %c0_15] : memref<32x64x4xbf16, #tpu.memory_space<vmem>>, vector<1x64x4xbf16>
    %19 = vector.shape_cast %18 : vector<1x64x4xbf16> to vector<64x4xbf16>
    %cst_16 = arith.constant dense<0.000000e+00> : vector<64x128xf32>
    %20 = tpu.matmul %19, %0, %cst_16 {dimension_numbers = #tpu.dot_dimension_numbers<[1], [0], [0], [1], [0, 0, 1, 1], [], []>} : vector<64x4xbf16>, vector<4x128xbf16>, vector<64x128xf32> -> vector<64x128xf32>
    %21 = arith.maximumf %17, %20 : vector<64x128xf32>
    %c5 = arith.constant 5 : index
    %c0_17 = arith.constant 0 : index
    %c0_18 = arith.constant 0 : index
    %22 = vector.load %arg1[%c5, %c0_17, %c0_18] : memref<32x64x4xbf16, #tpu.memory_space<vmem>>, vector<1x64x4xbf16>
    %23 = vector.shape_cast %22 : vector<1x64x4xbf16> to vector<64x4xbf16>
    %cst_19 = arith.constant dense<0.000000e+00> : vector<64x128xf32>
    %24 = tpu.matmul %23, %0, %cst_19 {dimension_numbers = #tpu.dot_dimension_numbers<[1], [0], [0], [1], [0, 0, 1, 1], [], []>} : vector<64x4xbf16>, vector<4x128xbf16>, vector<64x128xf32> -> vector<64x128xf32>
    %25 = arith.maximumf %21, %24 : vector<64x128xf32>
    %c6 = arith.constant 6 : index
    %c0_20 = arith.constant 0 : index
    %c0_21 = arith.constant 0 : index
    %26 = vector.load %arg1[%c6, %c0_20, %c0_21] : memref<32x64x4xbf16, #tpu.memory_space<vmem>>, vector<1x64x4xbf16>
    %27 = vector.shape_cast %26 : vector<1x64x4xbf16> to vector<64x4xbf16>
    %cst_22 = arith.constant dense<0.000000e+00> : vector<64x128xf32>
    %28 = tpu.matmul %27, %0, %cst_22 {dimension_numbers = #tpu.dot_dimension_numbers<[1], [0], [0], [1], [0, 0, 1, 1], [], []>} : vector<64x4xbf16>, vector<4x128xbf16>, vector<64x128xf32> -> vector<64x128xf32>
    %29 = arith.maximumf %25, %28 : vector<64x128xf32>
    %c7 = arith.constant 7 : index
    %c0_23 = arith.constant 0 : index
    %c0_24 = arith.constant 0 : index
    %30 = vector.load %arg1[%c7, %c0_23, %c0_24] : memref<32x64x4xbf16, #tpu.memory_space<vmem>>, vector<1x64x4xbf16>
    %31 = vector.shape_cast %30 : vector<1x64x4xbf16> to vector<64x4xbf16>
    %cst_25 = arith.constant dense<0.000000e+00> : vector<64x128xf32>
    %32 = tpu.matmul %31, %0, %cst_25 {dimension_numbers = #tpu.dot_dimension_numbers<[1], [0], [0], [1], [0, 0, 1, 1], [], []>} : vector<64x4xbf16>, vector<4x128xbf16>, vector<64x128xf32> -> vector<64x128xf32>
    %33 = arith.maximumf %29, %32 : vector<64x128xf32>
    %c8 = arith.constant 8 : index
    %c0_26 = arith.constant 0 : index
    %c0_27 = arith.constant 0 : index
    %34 = vector.load %arg1[%c8, %c0_26, %c0_27] : memref<32x64x4xbf16, #tpu.memory_space<vmem>>, vector<1x64x4xbf16>
    %35 = vector.shape_cast %34 : vector<1x64x4xbf16> to vector<64x4xbf16>
    %cst_28 = arith.constant dense<0.000000e+00> : vector<64x128xf32>
    %36 = tpu.matmul %35, %0, %cst_28 {dimension_numbers = #tpu.dot_dimension_numbers<[1], [0], [0], [1], [0, 0, 1, 1], [], []>} : vector<64x4xbf16>, vector<4x128xbf16>, vector<64x128xf32> -> vector<64x128xf32>
    %37 = arith.maximumf %33, %36 : vector<64x128xf32>
    %c9 = arith.constant 9 : index
    %c0_29 = arith.constant 0 : index
    %c0_30 = arith.constant 0 : index
    %38 = vector.load %arg1[%c9, %c0_29, %c0_30] : memref<32x64x4xbf16, #tpu.memory_space<vmem>>, vector<1x64x4xbf16>
    %39 = vector.shape_cast %38 : vector<1x64x4xbf16> to vector<64x4xbf16>
    %cst_31 = arith.constant dense<0.000000e+00> : vector<64x128xf32>
    %40 = tpu.matmul %39, %0, %cst_31 {dimension_numbers = #tpu.dot_dimension_numbers<[1], [0], [0], [1], [0, 0, 1, 1], [], []>} : vector<64x4xbf16>, vector<4x128xbf16>, vector<64x128xf32> -> vector<64x128xf32>
    %41 = arith.maximumf %37, %40 : vector<64x128xf32>
    %c10 = arith.constant 10 : index
    %c0_32 = arith.constant 0 : index
    %c0_33 = arith.constant 0 : index
    %42 = vector.load %arg1[%c10, %c0_32, %c0_33] : memref<32x64x4xbf16, #tpu.memory_space<vmem>>, vector<1x64x4xbf16>
    %43 = vector.shape_cast %42 : vector<1x64x4xbf16> to vector<64x4xbf16>
    %cst_34 = arith.constant dense<0.000000e+00> : vector<64x128xf32>
    %44 = tpu.matmul %43, %0, %cst_34 {dimension_numbers = #tpu.dot_dimension_numbers<[1], [0], [0], [1], [0, 0, 1, 1], [], []>} : vector<64x4xbf16>, vector<4x128xbf16>, vector<64x128xf32> -> vector<64x128xf32>
    %45 = arith.maximumf %41, %44 : vector<64x128xf32>
    %c11 = arith.constant 11 : index
    %c0_35 = arith.constant 0 : index
    %c0_36 = arith.constant 0 : index
    %46 = vector.load %arg1[%c11, %c0_35, %c0_36] : memref<32x64x4xbf16, #tpu.memory_space<vmem>>, vector<1x64x4xbf16>
    %47 = vector.shape_cast %46 : vector<1x64x4xbf16> to vector<64x4xbf16>
    %cst_37 = arith.constant dense<0.000000e+00> : vector<64x128xf32>
    %48 = tpu.matmul %47, %0, %cst_37 {dimension_numbers = #tpu.dot_dimension_numbers<[1], [0], [0], [1], [0, 0, 1, 1], [], []>} : vector<64x4xbf16>, vector<4x128xbf16>, vector<64x128xf32> -> vector<64x128xf32>
    %49 = arith.maximumf %45, %48 : vector<64x128xf32>
    %c12 = arith.constant 12 : index
    %c0_38 = arith.constant 0 : index
    %c0_39 = arith.constant 0 : index
    %50 = vector.load %arg1[%c12, %c0_38, %c0_39] : memref<32x64x4xbf16, #tpu.memory_space<vmem>>, vector<1x64x4xbf16>
    %51 = vector.shape_cast %50 : vector<1x64x4xbf16> to vector<64x4xbf16>
    %cst_40 = arith.constant dense<0.000000e+00> : vector<64x128xf32>
    %52 = tpu.matmul %51, %0, %cst_40 {dimension_numbers = #tpu.dot_dimension_numbers<[1], [0], [0], [1], [0, 0, 1, 1], [], []>} : vector<64x4xbf16>, vector<4x128xbf16>, vector<64x128xf32> -> vector<64x128xf32>
    %53 = arith.maximumf %49, %52 : vector<64x128xf32>
    %c13 = arith.constant 13 : index
    %c0_41 = arith.constant 0 : index
    %c0_42 = arith.constant 0 : index
    %54 = vector.load %arg1[%c13, %c0_41, %c0_42] : memref<32x64x4xbf16, #tpu.memory_space<vmem>>, vector<1x64x4xbf16>
    %55 = vector.shape_cast %54 : vector<1x64x4xbf16> to vector<64x4xbf16>
    %cst_43 = arith.constant dense<0.000000e+00> : vector<64x128xf32>
    %56 = tpu.matmul %55, %0, %cst_43 {dimension_numbers = #tpu.dot_dimension_numbers<[1], [0], [0], [1], [0, 0, 1, 1], [], []>} : vector<64x4xbf16>, vector<4x128xbf16>, vector<64x128xf32> -> vector<64x128xf32>
    %57 = arith.maximumf %53, %56 : vector<64x128xf32>
    %c14 = arith.constant 14 : index
    %c0_44 = arith.constant 0 : index
    %c0_45 = arith.constant 0 : index
    %58 = vector.load %arg1[%c14, %c0_44, %c0_45] : memref<32x64x4xbf16, #tpu.memory_space<vmem>>, vector<1x64x4xbf16>
    %59 = vector.shape_cast %58 : vector<1x64x4xbf16> to vector<64x4xbf16>
    %cst_46 = arith.constant dense<0.000000e+00> : vector<64x128xf32>
    %60 = tpu.matmul %59, %0, %cst_46 {dimension_numbers = #tpu.dot_dimension_numbers<[1], [0], [0], [1], [0, 0, 1, 1], [], []>} : vector<64x4xbf16>, vector<4x128xbf16>, vector<64x128xf32> -> vector<64x128xf32>
    %61 = arith.maximumf %57, %60 : vector<64x128xf32>
    %c15 = arith.constant 15 : index
    %c0_47 = arith.constant 0 : index
    %c0_48 = arith.constant 0 : index
    %62 = vector.load %arg1[%c15, %c0_47, %c0_48] : memref<32x64x4xbf16, #tpu.memory_space<vmem>>, vector<1x64x4xbf16>
    %63 = vector.shape_cast %62 : vector<1x64x4xbf16> to vector<64x4xbf16>
    %cst_49 = arith.constant dense<0.000000e+00> : vector<64x128xf32>
    %64 = tpu.matmul %63, %0, %cst_49 {dimension_numbers = #tpu.dot_dimension_numbers<[1], [0], [0], [1], [0, 0, 1, 1], [], []>} : vector<64x4xbf16>, vector<4x128xbf16>, vector<64x128xf32> -> vector<64x128xf32>
    %65 = arith.maximumf %61, %64 : vector<64x128xf32>
    %c16 = arith.constant 16 : index
    %c0_50 = arith.constant 0 : index
    %c0_51 = arith.constant 0 : index
    %66 = vector.load %arg1[%c16, %c0_50, %c0_51] : memref<32x64x4xbf16, #tpu.memory_space<vmem>>, vector<1x64x4xbf16>
    %67 = vector.shape_cast %66 : vector<1x64x4xbf16> to vector<64x4xbf16>
    %cst_52 = arith.constant dense<0.000000e+00> : vector<64x128xf32>
    %68 = tpu.matmul %67, %0, %cst_52 {dimension_numbers = #tpu.dot_dimension_numbers<[1], [0], [0], [1], [0, 0, 1, 1], [], []>} : vector<64x4xbf16>, vector<4x128xbf16>, vector<64x128xf32> -> vector<64x128xf32>
    %69 = arith.maximumf %65, %68 : vector<64x128xf32>
    %c17 = arith.constant 17 : index
    %c0_53 = arith.constant 0 : index
    %c0_54 = arith.constant 0 : index
    %70 = vector.load %arg1[%c17, %c0_53, %c0_54] : memref<32x64x4xbf16, #tpu.memory_space<vmem>>, vector<1x64x4xbf16>
    %71 = vector.shape_cast %70 : vector<1x64x4xbf16> to vector<64x4xbf16>
    %cst_55 = arith.constant dense<0.000000e+00> : vector<64x128xf32>
    %72 = tpu.matmul %71, %0, %cst_55 {dimension_numbers = #tpu.dot_dimension_numbers<[1], [0], [0], [1], [0, 0, 1, 1], [], []>} : vector<64x4xbf16>, vector<4x128xbf16>, vector<64x128xf32> -> vector<64x128xf32>
    %73 = arith.maximumf %69, %72 : vector<64x128xf32>
    %c18 = arith.constant 18 : index
    %c0_56 = arith.constant 0 : index
    %c0_57 = arith.constant 0 : index
    %74 = vector.load %arg1[%c18, %c0_56, %c0_57] : memref<32x64x4xbf16, #tpu.memory_space<vmem>>, vector<1x64x4xbf16>
    %75 = vector.shape_cast %74 : vector<1x64x4xbf16> to vector<64x4xbf16>
    %cst_58 = arith.constant dense<0.000000e+00> : vector<64x128xf32>
    %76 = tpu.matmul %75, %0, %cst_58 {dimension_numbers = #tpu.dot_dimension_numbers<[1], [0], [0], [1], [0, 0, 1, 1], [], []>} : vector<64x4xbf16>, vector<4x128xbf16>, vector<64x128xf32> -> vector<64x128xf32>
    %77 = arith.maximumf %73, %76 : vector<64x128xf32>
    %c19 = arith.constant 19 : index
    %c0_59 = arith.constant 0 : index
    %c0_60 = arith.constant 0 : index
    %78 = vector.load %arg1[%c19, %c0_59, %c0_60] : memref<32x64x4xbf16, #tpu.memory_space<vmem>>, vector<1x64x4xbf16>
    %79 = vector.shape_cast %78 : vector<1x64x4xbf16> to vector<64x4xbf16>
    %cst_61 = arith.constant dense<0.000000e+00> : vector<64x128xf32>
    %80 = tpu.matmul %79, %0, %cst_61 {dimension_numbers = #tpu.dot_dimension_numbers<[1], [0], [0], [1], [0, 0, 1, 1], [], []>} : vector<64x4xbf16>, vector<4x128xbf16>, vector<64x128xf32> -> vector<64x128xf32>
    %81 = arith.maximumf %77, %80 : vector<64x128xf32>
    %c20 = arith.constant 20 : index
    %c0_62 = arith.constant 0 : index
    %c0_63 = arith.constant 0 : index
    %82 = vector.load %arg1[%c20, %c0_62, %c0_63] : memref<32x64x4xbf16, #tpu.memory_space<vmem>>, vector<1x64x4xbf16>
    %83 = vector.shape_cast %82 : vector<1x64x4xbf16> to vector<64x4xbf16>
    %cst_64 = arith.constant dense<0.000000e+00> : vector<64x128xf32>
    %84 = tpu.matmul %83, %0, %cst_64 {dimension_numbers = #tpu.dot_dimension_numbers<[1], [0], [0], [1], [0, 0, 1, 1], [], []>} : vector<64x4xbf16>, vector<4x128xbf16>, vector<64x128xf32> -> vector<64x128xf32>
    %85 = arith.maximumf %81, %84 : vector<64x128xf32>
    %c21 = arith.constant 21 : index
    %c0_65 = arith.constant 0 : index
    %c0_66 = arith.constant 0 : index
    %86 = vector.load %arg1[%c21, %c0_65, %c0_66] : memref<32x64x4xbf16, #tpu.memory_space<vmem>>, vector<1x64x4xbf16>
    %87 = vector.shape_cast %86 : vector<1x64x4xbf16> to vector<64x4xbf16>
    %cst_67 = arith.constant dense<0.000000e+00> : vector<64x128xf32>
    %88 = tpu.matmul %87, %0, %cst_67 {dimension_numbers = #tpu.dot_dimension_numbers<[1], [0], [0], [1], [0, 0, 1, 1], [], []>} : vector<64x4xbf16>, vector<4x128xbf16>, vector<64x128xf32> -> vector<64x128xf32>
    %89 = arith.maximumf %85, %88 : vector<64x128xf32>
    %c22 = arith.constant 22 : index
    %c0_68 = arith.constant 0 : index
    %c0_69 = arith.constant 0 : index
    %90 = vector.load %arg1[%c22, %c0_68, %c0_69] : memref<32x64x4xbf16, #tpu.memory_space<vmem>>, vector<1x64x4xbf16>
    %91 = vector.shape_cast %90 : vector<1x64x4xbf16> to vector<64x4xbf16>
    %cst_70 = arith.constant dense<0.000000e+00> : vector<64x128xf32>
    %92 = tpu.matmul %91, %0, %cst_70 {dimension_numbers = #tpu.dot_dimension_numbers<[1], [0], [0], [1], [0, 0, 1, 1], [], []>} : vector<64x4xbf16>, vector<4x128xbf16>, vector<64x128xf32> -> vector<64x128xf32>
    %93 = arith.maximumf %89, %92 : vector<64x128xf32>
    %c23 = arith.constant 23 : index
    %c0_71 = arith.constant 0 : index
    %c0_72 = arith.constant 0 : index
    %94 = vector.load %arg1[%c23, %c0_71, %c0_72] : memref<32x64x4xbf16, #tpu.memory_space<vmem>>, vector<1x64x4xbf16>
    %95 = vector.shape_cast %94 : vector<1x64x4xbf16> to vector<64x4xbf16>
    %cst_73 = arith.constant dense<0.000000e+00> : vector<64x128xf32>
    %96 = tpu.matmul %95, %0, %cst_73 {dimension_numbers = #tpu.dot_dimension_numbers<[1], [0], [0], [1], [0, 0, 1, 1], [], []>} : vector<64x4xbf16>, vector<4x128xbf16>, vector<64x128xf32> -> vector<64x128xf32>
    %97 = arith.maximumf %93, %96 : vector<64x128xf32>
    %c24 = arith.constant 24 : index
    %c0_74 = arith.constant 0 : index
    %c0_75 = arith.constant 0 : index
    %98 = vector.load %arg1[%c24, %c0_74, %c0_75] : memref<32x64x4xbf16, #tpu.memory_space<vmem>>, vector<1x64x4xbf16>
    %99 = vector.shape_cast %98 : vector<1x64x4xbf16> to vector<64x4xbf16>
    %cst_76 = arith.constant dense<0.000000e+00> : vector<64x128xf32>
    %100 = tpu.matmul %99, %0, %cst_76 {dimension_numbers = #tpu.dot_dimension_numbers<[1], [0], [0], [1], [0, 0, 1, 1], [], []>} : vector<64x4xbf16>, vector<4x128xbf16>, vector<64x128xf32> -> vector<64x128xf32>
    %101 = arith.maximumf %97, %100 : vector<64x128xf32>
    %c25 = arith.constant 25 : index
    %c0_77 = arith.constant 0 : index
    %c0_78 = arith.constant 0 : index
    %102 = vector.load %arg1[%c25, %c0_77, %c0_78] : memref<32x64x4xbf16, #tpu.memory_space<vmem>>, vector<1x64x4xbf16>
    %103 = vector.shape_cast %102 : vector<1x64x4xbf16> to vector<64x4xbf16>
    %cst_79 = arith.constant dense<0.000000e+00> : vector<64x128xf32>
    %104 = tpu.matmul %103, %0, %cst_79 {dimension_numbers = #tpu.dot_dimension_numbers<[1], [0], [0], [1], [0, 0, 1, 1], [], []>} : vector<64x4xbf16>, vector<4x128xbf16>, vector<64x128xf32> -> vector<64x128xf32>
    %105 = arith.maximumf %101, %104 : vector<64x128xf32>
    %c26 = arith.constant 26 : index
    %c0_80 = arith.constant 0 : index
    %c0_81 = arith.constant 0 : index
    %106 = vector.load %arg1[%c26, %c0_80, %c0_81] : memref<32x64x4xbf16, #tpu.memory_space<vmem>>, vector<1x64x4xbf16>
    %107 = vector.shape_cast %106 : vector<1x64x4xbf16> to vector<64x4xbf16>
    %cst_82 = arith.constant dense<0.000000e+00> : vector<64x128xf32>
    %108 = tpu.matmul %107, %0, %cst_82 {dimension_numbers = #tpu.dot_dimension_numbers<[1], [0], [0], [1], [0, 0, 1, 1], [], []>} : vector<64x4xbf16>, vector<4x128xbf16>, vector<64x128xf32> -> vector<64x128xf32>
    %109 = arith.maximumf %105, %108 : vector<64x128xf32>
    %c27 = arith.constant 27 : index
    %c0_83 = arith.constant 0 : index
    %c0_84 = arith.constant 0 : index
    %110 = vector.load %arg1[%c27, %c0_83, %c0_84] : memref<32x64x4xbf16, #tpu.memory_space<vmem>>, vector<1x64x4xbf16>
    %111 = vector.shape_cast %110 : vector<1x64x4xbf16> to vector<64x4xbf16>
    %cst_85 = arith.constant dense<0.000000e+00> : vector<64x128xf32>
    %112 = tpu.matmul %111, %0, %cst_85 {dimension_numbers = #tpu.dot_dimension_numbers<[1], [0], [0], [1], [0, 0, 1, 1], [], []>} : vector<64x4xbf16>, vector<4x128xbf16>, vector<64x128xf32> -> vector<64x128xf32>
    %113 = arith.maximumf %109, %112 : vector<64x128xf32>
    %c28 = arith.constant 28 : index
    %c0_86 = arith.constant 0 : index
    %c0_87 = arith.constant 0 : index
    %114 = vector.load %arg1[%c28, %c0_86, %c0_87] : memref<32x64x4xbf16, #tpu.memory_space<vmem>>, vector<1x64x4xbf16>
    %115 = vector.shape_cast %114 : vector<1x64x4xbf16> to vector<64x4xbf16>
    %cst_88 = arith.constant dense<0.000000e+00> : vector<64x128xf32>
    %116 = tpu.matmul %115, %0, %cst_88 {dimension_numbers = #tpu.dot_dimension_numbers<[1], [0], [0], [1], [0, 0, 1, 1], [], []>} : vector<64x4xbf16>, vector<4x128xbf16>, vector<64x128xf32> -> vector<64x128xf32>
    %117 = arith.maximumf %113, %116 : vector<64x128xf32>
    %c29 = arith.constant 29 : index
    %c0_89 = arith.constant 0 : index
    %c0_90 = arith.constant 0 : index
    %118 = vector.load %arg1[%c29, %c0_89, %c0_90] : memref<32x64x4xbf16, #tpu.memory_space<vmem>>, vector<1x64x4xbf16>
    %119 = vector.shape_cast %118 : vector<1x64x4xbf16> to vector<64x4xbf16>
    %cst_91 = arith.constant dense<0.000000e+00> : vector<64x128xf32>
    %120 = tpu.matmul %119, %0, %cst_91 {dimension_numbers = #tpu.dot_dimension_numbers<[1], [0], [0], [1], [0, 0, 1, 1], [], []>} : vector<64x4xbf16>, vector<4x128xbf16>, vector<64x128xf32> -> vector<64x128xf32>
    %121 = arith.maximumf %117, %120 : vector<64x128xf32>
    %c30 = arith.constant 30 : index
    %c0_92 = arith.constant 0 : index
    %c0_93 = arith.constant 0 : index
    %122 = vector.load %arg1[%c30, %c0_92, %c0_93] : memref<32x64x4xbf16, #tpu.memory_space<vmem>>, vector<1x64x4xbf16>
    %123 = vector.shape_cast %122 : vector<1x64x4xbf16> to vector<64x4xbf16>
    %cst_94 = arith.constant dense<0.000000e+00> : vector<64x128xf32>
    %124 = tpu.matmul %123, %0, %cst_94 {dimension_numbers = #tpu.dot_dimension_numbers<[1], [0], [0], [1], [0, 0, 1, 1], [], []>} : vector<64x4xbf16>, vector<4x128xbf16>, vector<64x128xf32> -> vector<64x128xf32>
    %125 = arith.maximumf %121, %124 : vector<64x128xf32>
    %c31 = arith.constant 31 : index
    %c0_95 = arith.constant 0 : index
    %c0_96 = arith.constant 0 : index
    %126 = vector.load %arg1[%c31, %c0_95, %c0_96] : memref<32x64x4xbf16, #tpu.memory_space<vmem>>, vector<1x64x4xbf16>
    %127 = vector.shape_cast %126 : vector<1x64x4xbf16> to vector<64x4xbf16>
    %cst_97 = arith.constant dense<0.000000e+00> : vector<64x128xf32>
    %128 = tpu.matmul %127, %0, %cst_97 {dimension_numbers = #tpu.dot_dimension_numbers<[1], [0], [0], [1], [0, 0, 1, 1], [], []>} : vector<64x4xbf16>, vector<4x128xbf16>, vector<64x128xf32> -> vector<64x128xf32>
    %129 = arith.maximumf %125, %128 : vector<64x128xf32>
    %c0_98 = arith.constant 0 : index
    %c0_99 = arith.constant 0 : index
    %130 = vector.load %arg3[%c0_98, %c0_99] : memref<1x128xf32, #tpu.memory_space<vmem>>, vector<1x128xf32>
    %131 = vector.broadcast %130 : vector<1x128xf32> to vector<64x128xf32>
    %132 = arith.addf %129, %131 : vector<64x128xf32>
    %133 = arith.truncf %132 : vector<64x128xf32> to vector<64x128xbf16>
    %c0_100 = arith.constant 0 : index
    %c0_101 = arith.constant 0 : index
    %134 = vector.load %arg4[%c0_100, %c0_101] : memref<64x128xbf16, #tpu.memory_space<vmem>>, vector<64x128xbf16>
    tpu.vector_store %arg4[%c0_100, %c0_101], %133 {strides = array<i32>} : memref<64x128xbf16, #tpu.memory_space<vmem>>, vector<64x128xbf16>,
    return
  }
  func.func @transform_0(%arg0: i32) -> (i32, i32, i32) {
    %c0_i32 = arith.constant 0 : i32
    %c0_i32_0 = arith.constant 0 : i32
    %c0_i32_1 = arith.constant 0 : i32
    return %c0_i32, %arg0, %c0_i32_0 : i32, i32, i32
  }
  func.func @transform_1(%arg0: i32) -> (i32, i32) {
    %c0_i32 = arith.constant 0 : i32
    %c0_i32_0 = arith.constant 0 : i32
    %c0_i32_1 = arith.constant 0 : i32
    return %c0_i32, %c0_i32_0 : i32, i32
  }
  func.func @transform_2(%arg0: i32) -> (i32, i32) {
    %c0_i32 = arith.constant 0 : i32
    %c0_i32_0 = arith.constant 0 : i32
    %c0_i32_1 = arith.constant 0 : i32
    return %c0_i32, %c0_i32_0 : i32, i32
  }
  func.func @transform_3(%arg0: i32) -> (i32, i32) {
    %c0_i32 = arith.constant 0 : i32
    %c0_i32_0 = arith.constant 0 : i32
    return %arg0, %c0_i32 : i32, i32
  }
}

module attributes {stable_mosaic.version = 11 : i64} {
  func.func @_pointconv_kernel(%arg0: i32, %arg1: memref<32x16x36xbf16, #tpu.memory_space<vmem>>, %arg2: memref<36x128xbf16, #tpu.memory_space<vmem>>, %arg3: memref<1x128xf32, #tpu.memory_space<vmem>>, %arg4: memref<16x128xbf16, #tpu.memory_space<vmem>>) attributes {dimension_semantics = [#tpu.dimension_semantics<parallel>], iteration_bounds = array<i64: 1>, scalar_prefetch = 0 : i64, scratch_operands = 0 : i64, tpu.core_type = #tpu.core_type<tc>, window_params = [{transform_indices = @transform_0, window_bounds = array<i64: 32, 16, 36>}, {pipeline_mode = #tpu.pipeline_mode<synchronous>, transform_indices = @transform_1, window_bounds = array<i64: 36, 128>}, {pipeline_mode = #tpu.pipeline_mode<synchronous>, transform_indices = @transform_2, window_bounds = array<i64: 1, 128>}, {transform_indices = @transform_3, window_bounds = array<i64: 16, 128>}]} {
    %c0 = arith.constant 0 : index
    %c0_0 = arith.constant 0 : index
    %0 = vector.load %arg2[%c0, %c0_0] : memref<36x128xbf16, #tpu.memory_space<vmem>>, vector<36x128xbf16>
    %cst = arith.constant 0.000000e+00 : f32
    %1 = vector.broadcast %cst : f32 to vector<16x128xf32>
    %c0_1 = arith.constant 0 : index
    %c0_2 = arith.constant 0 : index
    %c0_3 = arith.constant 0 : index
    %2 = vector.load %arg1[%c0_1, %c0_2, %c0_3] : memref<32x16x36xbf16, #tpu.memory_space<vmem>>, vector<1x16x36xbf16>
    %3 = vector.shape_cast %2 : vector<1x16x36xbf16> to vector<16x36xbf16>
    %cst_4 = arith.constant dense<0.000000e+00> : vector<16x128xf32>
    %4 = tpu.matmul %3, %0, %cst_4 {dimension_numbers = #tpu.dot_dimension_numbers<[1], [0], [0], [1], [0, 0, 1, 1], [], []>} : vector<16x36xbf16>, vector<36x128xbf16>, vector<16x128xf32> -> vector<16x128xf32>
    %5 = arith.maximumf %1, %4 : vector<16x128xf32>
    %c1 = arith.constant 1 : index
    %c0_5 = arith.constant 0 : index
    %c0_6 = arith.constant 0 : index
    %6 = vector.load %arg1[%c1, %c0_5, %c0_6] : memref<32x16x36xbf16, #tpu.memory_space<vmem>>, vector<1x16x36xbf16>
    %7 = vector.shape_cast %6 : vector<1x16x36xbf16> to vector<16x36xbf16>
    %cst_7 = arith.constant dense<0.000000e+00> : vector<16x128xf32>
    %8 = tpu.matmul %7, %0, %cst_7 {dimension_numbers = #tpu.dot_dimension_numbers<[1], [0], [0], [1], [0, 0, 1, 1], [], []>} : vector<16x36xbf16>, vector<36x128xbf16>, vector<16x128xf32> -> vector<16x128xf32>
    %9 = arith.maximumf %5, %8 : vector<16x128xf32>
    %c2 = arith.constant 2 : index
    %c0_8 = arith.constant 0 : index
    %c0_9 = arith.constant 0 : index
    %10 = vector.load %arg1[%c2, %c0_8, %c0_9] : memref<32x16x36xbf16, #tpu.memory_space<vmem>>, vector<1x16x36xbf16>
    %11 = vector.shape_cast %10 : vector<1x16x36xbf16> to vector<16x36xbf16>
    %cst_10 = arith.constant dense<0.000000e+00> : vector<16x128xf32>
    %12 = tpu.matmul %11, %0, %cst_10 {dimension_numbers = #tpu.dot_dimension_numbers<[1], [0], [0], [1], [0, 0, 1, 1], [], []>} : vector<16x36xbf16>, vector<36x128xbf16>, vector<16x128xf32> -> vector<16x128xf32>
    %13 = arith.maximumf %9, %12 : vector<16x128xf32>
    %c3 = arith.constant 3 : index
    %c0_11 = arith.constant 0 : index
    %c0_12 = arith.constant 0 : index
    %14 = vector.load %arg1[%c3, %c0_11, %c0_12] : memref<32x16x36xbf16, #tpu.memory_space<vmem>>, vector<1x16x36xbf16>
    %15 = vector.shape_cast %14 : vector<1x16x36xbf16> to vector<16x36xbf16>
    %cst_13 = arith.constant dense<0.000000e+00> : vector<16x128xf32>
    %16 = tpu.matmul %15, %0, %cst_13 {dimension_numbers = #tpu.dot_dimension_numbers<[1], [0], [0], [1], [0, 0, 1, 1], [], []>} : vector<16x36xbf16>, vector<36x128xbf16>, vector<16x128xf32> -> vector<16x128xf32>
    %17 = arith.maximumf %13, %16 : vector<16x128xf32>
    %c4 = arith.constant 4 : index
    %c0_14 = arith.constant 0 : index
    %c0_15 = arith.constant 0 : index
    %18 = vector.load %arg1[%c4, %c0_14, %c0_15] : memref<32x16x36xbf16, #tpu.memory_space<vmem>>, vector<1x16x36xbf16>
    %19 = vector.shape_cast %18 : vector<1x16x36xbf16> to vector<16x36xbf16>
    %cst_16 = arith.constant dense<0.000000e+00> : vector<16x128xf32>
    %20 = tpu.matmul %19, %0, %cst_16 {dimension_numbers = #tpu.dot_dimension_numbers<[1], [0], [0], [1], [0, 0, 1, 1], [], []>} : vector<16x36xbf16>, vector<36x128xbf16>, vector<16x128xf32> -> vector<16x128xf32>
    %21 = arith.maximumf %17, %20 : vector<16x128xf32>
    %c5 = arith.constant 5 : index
    %c0_17 = arith.constant 0 : index
    %c0_18 = arith.constant 0 : index
    %22 = vector.load %arg1[%c5, %c0_17, %c0_18] : memref<32x16x36xbf16, #tpu.memory_space<vmem>>, vector<1x16x36xbf16>
    %23 = vector.shape_cast %22 : vector<1x16x36xbf16> to vector<16x36xbf16>
    %cst_19 = arith.constant dense<0.000000e+00> : vector<16x128xf32>
    %24 = tpu.matmul %23, %0, %cst_19 {dimension_numbers = #tpu.dot_dimension_numbers<[1], [0], [0], [1], [0, 0, 1, 1], [], []>} : vector<16x36xbf16>, vector<36x128xbf16>, vector<16x128xf32> -> vector<16x128xf32>
    %25 = arith.maximumf %21, %24 : vector<16x128xf32>
    %c6 = arith.constant 6 : index
    %c0_20 = arith.constant 0 : index
    %c0_21 = arith.constant 0 : index
    %26 = vector.load %arg1[%c6, %c0_20, %c0_21] : memref<32x16x36xbf16, #tpu.memory_space<vmem>>, vector<1x16x36xbf16>
    %27 = vector.shape_cast %26 : vector<1x16x36xbf16> to vector<16x36xbf16>
    %cst_22 = arith.constant dense<0.000000e+00> : vector<16x128xf32>
    %28 = tpu.matmul %27, %0, %cst_22 {dimension_numbers = #tpu.dot_dimension_numbers<[1], [0], [0], [1], [0, 0, 1, 1], [], []>} : vector<16x36xbf16>, vector<36x128xbf16>, vector<16x128xf32> -> vector<16x128xf32>
    %29 = arith.maximumf %25, %28 : vector<16x128xf32>
    %c7 = arith.constant 7 : index
    %c0_23 = arith.constant 0 : index
    %c0_24 = arith.constant 0 : index
    %30 = vector.load %arg1[%c7, %c0_23, %c0_24] : memref<32x16x36xbf16, #tpu.memory_space<vmem>>, vector<1x16x36xbf16>
    %31 = vector.shape_cast %30 : vector<1x16x36xbf16> to vector<16x36xbf16>
    %cst_25 = arith.constant dense<0.000000e+00> : vector<16x128xf32>
    %32 = tpu.matmul %31, %0, %cst_25 {dimension_numbers = #tpu.dot_dimension_numbers<[1], [0], [0], [1], [0, 0, 1, 1], [], []>} : vector<16x36xbf16>, vector<36x128xbf16>, vector<16x128xf32> -> vector<16x128xf32>
    %33 = arith.maximumf %29, %32 : vector<16x128xf32>
    %c8 = arith.constant 8 : index
    %c0_26 = arith.constant 0 : index
    %c0_27 = arith.constant 0 : index
    %34 = vector.load %arg1[%c8, %c0_26, %c0_27] : memref<32x16x36xbf16, #tpu.memory_space<vmem>>, vector<1x16x36xbf16>
    %35 = vector.shape_cast %34 : vector<1x16x36xbf16> to vector<16x36xbf16>
    %cst_28 = arith.constant dense<0.000000e+00> : vector<16x128xf32>
    %36 = tpu.matmul %35, %0, %cst_28 {dimension_numbers = #tpu.dot_dimension_numbers<[1], [0], [0], [1], [0, 0, 1, 1], [], []>} : vector<16x36xbf16>, vector<36x128xbf16>, vector<16x128xf32> -> vector<16x128xf32>
    %37 = arith.maximumf %33, %36 : vector<16x128xf32>
    %c9 = arith.constant 9 : index
    %c0_29 = arith.constant 0 : index
    %c0_30 = arith.constant 0 : index
    %38 = vector.load %arg1[%c9, %c0_29, %c0_30] : memref<32x16x36xbf16, #tpu.memory_space<vmem>>, vector<1x16x36xbf16>
    %39 = vector.shape_cast %38 : vector<1x16x36xbf16> to vector<16x36xbf16>
    %cst_31 = arith.constant dense<0.000000e+00> : vector<16x128xf32>
    %40 = tpu.matmul %39, %0, %cst_31 {dimension_numbers = #tpu.dot_dimension_numbers<[1], [0], [0], [1], [0, 0, 1, 1], [], []>} : vector<16x36xbf16>, vector<36x128xbf16>, vector<16x128xf32> -> vector<16x128xf32>
    %41 = arith.maximumf %37, %40 : vector<16x128xf32>
    %c10 = arith.constant 10 : index
    %c0_32 = arith.constant 0 : index
    %c0_33 = arith.constant 0 : index
    %42 = vector.load %arg1[%c10, %c0_32, %c0_33] : memref<32x16x36xbf16, #tpu.memory_space<vmem>>, vector<1x16x36xbf16>
    %43 = vector.shape_cast %42 : vector<1x16x36xbf16> to vector<16x36xbf16>
    %cst_34 = arith.constant dense<0.000000e+00> : vector<16x128xf32>
    %44 = tpu.matmul %43, %0, %cst_34 {dimension_numbers = #tpu.dot_dimension_numbers<[1], [0], [0], [1], [0, 0, 1, 1], [], []>} : vector<16x36xbf16>, vector<36x128xbf16>, vector<16x128xf32> -> vector<16x128xf32>
    %45 = arith.maximumf %41, %44 : vector<16x128xf32>
    %c11 = arith.constant 11 : index
    %c0_35 = arith.constant 0 : index
    %c0_36 = arith.constant 0 : index
    %46 = vector.load %arg1[%c11, %c0_35, %c0_36] : memref<32x16x36xbf16, #tpu.memory_space<vmem>>, vector<1x16x36xbf16>
    %47 = vector.shape_cast %46 : vector<1x16x36xbf16> to vector<16x36xbf16>
    %cst_37 = arith.constant dense<0.000000e+00> : vector<16x128xf32>
    %48 = tpu.matmul %47, %0, %cst_37 {dimension_numbers = #tpu.dot_dimension_numbers<[1], [0], [0], [1], [0, 0, 1, 1], [], []>} : vector<16x36xbf16>, vector<36x128xbf16>, vector<16x128xf32> -> vector<16x128xf32>
    %49 = arith.maximumf %45, %48 : vector<16x128xf32>
    %c12 = arith.constant 12 : index
    %c0_38 = arith.constant 0 : index
    %c0_39 = arith.constant 0 : index
    %50 = vector.load %arg1[%c12, %c0_38, %c0_39] : memref<32x16x36xbf16, #tpu.memory_space<vmem>>, vector<1x16x36xbf16>
    %51 = vector.shape_cast %50 : vector<1x16x36xbf16> to vector<16x36xbf16>
    %cst_40 = arith.constant dense<0.000000e+00> : vector<16x128xf32>
    %52 = tpu.matmul %51, %0, %cst_40 {dimension_numbers = #tpu.dot_dimension_numbers<[1], [0], [0], [1], [0, 0, 1, 1], [], []>} : vector<16x36xbf16>, vector<36x128xbf16>, vector<16x128xf32> -> vector<16x128xf32>
    %53 = arith.maximumf %49, %52 : vector<16x128xf32>
    %c13 = arith.constant 13 : index
    %c0_41 = arith.constant 0 : index
    %c0_42 = arith.constant 0 : index
    %54 = vector.load %arg1[%c13, %c0_41, %c0_42] : memref<32x16x36xbf16, #tpu.memory_space<vmem>>, vector<1x16x36xbf16>
    %55 = vector.shape_cast %54 : vector<1x16x36xbf16> to vector<16x36xbf16>
    %cst_43 = arith.constant dense<0.000000e+00> : vector<16x128xf32>
    %56 = tpu.matmul %55, %0, %cst_43 {dimension_numbers = #tpu.dot_dimension_numbers<[1], [0], [0], [1], [0, 0, 1, 1], [], []>} : vector<16x36xbf16>, vector<36x128xbf16>, vector<16x128xf32> -> vector<16x128xf32>
    %57 = arith.maximumf %53, %56 : vector<16x128xf32>
    %c14 = arith.constant 14 : index
    %c0_44 = arith.constant 0 : index
    %c0_45 = arith.constant 0 : index
    %58 = vector.load %arg1[%c14, %c0_44, %c0_45] : memref<32x16x36xbf16, #tpu.memory_space<vmem>>, vector<1x16x36xbf16>
    %59 = vector.shape_cast %58 : vector<1x16x36xbf16> to vector<16x36xbf16>
    %cst_46 = arith.constant dense<0.000000e+00> : vector<16x128xf32>
    %60 = tpu.matmul %59, %0, %cst_46 {dimension_numbers = #tpu.dot_dimension_numbers<[1], [0], [0], [1], [0, 0, 1, 1], [], []>} : vector<16x36xbf16>, vector<36x128xbf16>, vector<16x128xf32> -> vector<16x128xf32>
    %61 = arith.maximumf %57, %60 : vector<16x128xf32>
    %c15 = arith.constant 15 : index
    %c0_47 = arith.constant 0 : index
    %c0_48 = arith.constant 0 : index
    %62 = vector.load %arg1[%c15, %c0_47, %c0_48] : memref<32x16x36xbf16, #tpu.memory_space<vmem>>, vector<1x16x36xbf16>
    %63 = vector.shape_cast %62 : vector<1x16x36xbf16> to vector<16x36xbf16>
    %cst_49 = arith.constant dense<0.000000e+00> : vector<16x128xf32>
    %64 = tpu.matmul %63, %0, %cst_49 {dimension_numbers = #tpu.dot_dimension_numbers<[1], [0], [0], [1], [0, 0, 1, 1], [], []>} : vector<16x36xbf16>, vector<36x128xbf16>, vector<16x128xf32> -> vector<16x128xf32>
    %65 = arith.maximumf %61, %64 : vector<16x128xf32>
    %c16 = arith.constant 16 : index
    %c0_50 = arith.constant 0 : index
    %c0_51 = arith.constant 0 : index
    %66 = vector.load %arg1[%c16, %c0_50, %c0_51] : memref<32x16x36xbf16, #tpu.memory_space<vmem>>, vector<1x16x36xbf16>
    %67 = vector.shape_cast %66 : vector<1x16x36xbf16> to vector<16x36xbf16>
    %cst_52 = arith.constant dense<0.000000e+00> : vector<16x128xf32>
    %68 = tpu.matmul %67, %0, %cst_52 {dimension_numbers = #tpu.dot_dimension_numbers<[1], [0], [0], [1], [0, 0, 1, 1], [], []>} : vector<16x36xbf16>, vector<36x128xbf16>, vector<16x128xf32> -> vector<16x128xf32>
    %69 = arith.maximumf %65, %68 : vector<16x128xf32>
    %c17 = arith.constant 17 : index
    %c0_53 = arith.constant 0 : index
    %c0_54 = arith.constant 0 : index
    %70 = vector.load %arg1[%c17, %c0_53, %c0_54] : memref<32x16x36xbf16, #tpu.memory_space<vmem>>, vector<1x16x36xbf16>
    %71 = vector.shape_cast %70 : vector<1x16x36xbf16> to vector<16x36xbf16>
    %cst_55 = arith.constant dense<0.000000e+00> : vector<16x128xf32>
    %72 = tpu.matmul %71, %0, %cst_55 {dimension_numbers = #tpu.dot_dimension_numbers<[1], [0], [0], [1], [0, 0, 1, 1], [], []>} : vector<16x36xbf16>, vector<36x128xbf16>, vector<16x128xf32> -> vector<16x128xf32>
    %73 = arith.maximumf %69, %72 : vector<16x128xf32>
    %c18 = arith.constant 18 : index
    %c0_56 = arith.constant 0 : index
    %c0_57 = arith.constant 0 : index
    %74 = vector.load %arg1[%c18, %c0_56, %c0_57] : memref<32x16x36xbf16, #tpu.memory_space<vmem>>, vector<1x16x36xbf16>
    %75 = vector.shape_cast %74 : vector<1x16x36xbf16> to vector<16x36xbf16>
    %cst_58 = arith.constant dense<0.000000e+00> : vector<16x128xf32>
    %76 = tpu.matmul %75, %0, %cst_58 {dimension_numbers = #tpu.dot_dimension_numbers<[1], [0], [0], [1], [0, 0, 1, 1], [], []>} : vector<16x36xbf16>, vector<36x128xbf16>, vector<16x128xf32> -> vector<16x128xf32>
    %77 = arith.maximumf %73, %76 : vector<16x128xf32>
    %c19 = arith.constant 19 : index
    %c0_59 = arith.constant 0 : index
    %c0_60 = arith.constant 0 : index
    %78 = vector.load %arg1[%c19, %c0_59, %c0_60] : memref<32x16x36xbf16, #tpu.memory_space<vmem>>, vector<1x16x36xbf16>
    %79 = vector.shape_cast %78 : vector<1x16x36xbf16> to vector<16x36xbf16>
    %cst_61 = arith.constant dense<0.000000e+00> : vector<16x128xf32>
    %80 = tpu.matmul %79, %0, %cst_61 {dimension_numbers = #tpu.dot_dimension_numbers<[1], [0], [0], [1], [0, 0, 1, 1], [], []>} : vector<16x36xbf16>, vector<36x128xbf16>, vector<16x128xf32> -> vector<16x128xf32>
    %81 = arith.maximumf %77, %80 : vector<16x128xf32>
    %c20 = arith.constant 20 : index
    %c0_62 = arith.constant 0 : index
    %c0_63 = arith.constant 0 : index
    %82 = vector.load %arg1[%c20, %c0_62, %c0_63] : memref<32x16x36xbf16, #tpu.memory_space<vmem>>, vector<1x16x36xbf16>
    %83 = vector.shape_cast %82 : vector<1x16x36xbf16> to vector<16x36xbf16>
    %cst_64 = arith.constant dense<0.000000e+00> : vector<16x128xf32>
    %84 = tpu.matmul %83, %0, %cst_64 {dimension_numbers = #tpu.dot_dimension_numbers<[1], [0], [0], [1], [0, 0, 1, 1], [], []>} : vector<16x36xbf16>, vector<36x128xbf16>, vector<16x128xf32> -> vector<16x128xf32>
    %85 = arith.maximumf %81, %84 : vector<16x128xf32>
    %c21 = arith.constant 21 : index
    %c0_65 = arith.constant 0 : index
    %c0_66 = arith.constant 0 : index
    %86 = vector.load %arg1[%c21, %c0_65, %c0_66] : memref<32x16x36xbf16, #tpu.memory_space<vmem>>, vector<1x16x36xbf16>
    %87 = vector.shape_cast %86 : vector<1x16x36xbf16> to vector<16x36xbf16>
    %cst_67 = arith.constant dense<0.000000e+00> : vector<16x128xf32>
    %88 = tpu.matmul %87, %0, %cst_67 {dimension_numbers = #tpu.dot_dimension_numbers<[1], [0], [0], [1], [0, 0, 1, 1], [], []>} : vector<16x36xbf16>, vector<36x128xbf16>, vector<16x128xf32> -> vector<16x128xf32>
    %89 = arith.maximumf %85, %88 : vector<16x128xf32>
    %c22 = arith.constant 22 : index
    %c0_68 = arith.constant 0 : index
    %c0_69 = arith.constant 0 : index
    %90 = vector.load %arg1[%c22, %c0_68, %c0_69] : memref<32x16x36xbf16, #tpu.memory_space<vmem>>, vector<1x16x36xbf16>
    %91 = vector.shape_cast %90 : vector<1x16x36xbf16> to vector<16x36xbf16>
    %cst_70 = arith.constant dense<0.000000e+00> : vector<16x128xf32>
    %92 = tpu.matmul %91, %0, %cst_70 {dimension_numbers = #tpu.dot_dimension_numbers<[1], [0], [0], [1], [0, 0, 1, 1], [], []>} : vector<16x36xbf16>, vector<36x128xbf16>, vector<16x128xf32> -> vector<16x128xf32>
    %93 = arith.maximumf %89, %92 : vector<16x128xf32>
    %c23 = arith.constant 23 : index
    %c0_71 = arith.constant 0 : index
    %c0_72 = arith.constant 0 : index
    %94 = vector.load %arg1[%c23, %c0_71, %c0_72] : memref<32x16x36xbf16, #tpu.memory_space<vmem>>, vector<1x16x36xbf16>
    %95 = vector.shape_cast %94 : vector<1x16x36xbf16> to vector<16x36xbf16>
    %cst_73 = arith.constant dense<0.000000e+00> : vector<16x128xf32>
    %96 = tpu.matmul %95, %0, %cst_73 {dimension_numbers = #tpu.dot_dimension_numbers<[1], [0], [0], [1], [0, 0, 1, 1], [], []>} : vector<16x36xbf16>, vector<36x128xbf16>, vector<16x128xf32> -> vector<16x128xf32>
    %97 = arith.maximumf %93, %96 : vector<16x128xf32>
    %c24 = arith.constant 24 : index
    %c0_74 = arith.constant 0 : index
    %c0_75 = arith.constant 0 : index
    %98 = vector.load %arg1[%c24, %c0_74, %c0_75] : memref<32x16x36xbf16, #tpu.memory_space<vmem>>, vector<1x16x36xbf16>
    %99 = vector.shape_cast %98 : vector<1x16x36xbf16> to vector<16x36xbf16>
    %cst_76 = arith.constant dense<0.000000e+00> : vector<16x128xf32>
    %100 = tpu.matmul %99, %0, %cst_76 {dimension_numbers = #tpu.dot_dimension_numbers<[1], [0], [0], [1], [0, 0, 1, 1], [], []>} : vector<16x36xbf16>, vector<36x128xbf16>, vector<16x128xf32> -> vector<16x128xf32>
    %101 = arith.maximumf %97, %100 : vector<16x128xf32>
    %c25 = arith.constant 25 : index
    %c0_77 = arith.constant 0 : index
    %c0_78 = arith.constant 0 : index
    %102 = vector.load %arg1[%c25, %c0_77, %c0_78] : memref<32x16x36xbf16, #tpu.memory_space<vmem>>, vector<1x16x36xbf16>
    %103 = vector.shape_cast %102 : vector<1x16x36xbf16> to vector<16x36xbf16>
    %cst_79 = arith.constant dense<0.000000e+00> : vector<16x128xf32>
    %104 = tpu.matmul %103, %0, %cst_79 {dimension_numbers = #tpu.dot_dimension_numbers<[1], [0], [0], [1], [0, 0, 1, 1], [], []>} : vector<16x36xbf16>, vector<36x128xbf16>, vector<16x128xf32> -> vector<16x128xf32>
    %105 = arith.maximumf %101, %104 : vector<16x128xf32>
    %c26 = arith.constant 26 : index
    %c0_80 = arith.constant 0 : index
    %c0_81 = arith.constant 0 : index
    %106 = vector.load %arg1[%c26, %c0_80, %c0_81] : memref<32x16x36xbf16, #tpu.memory_space<vmem>>, vector<1x16x36xbf16>
    %107 = vector.shape_cast %106 : vector<1x16x36xbf16> to vector<16x36xbf16>
    %cst_82 = arith.constant dense<0.000000e+00> : vector<16x128xf32>
    %108 = tpu.matmul %107, %0, %cst_82 {dimension_numbers = #tpu.dot_dimension_numbers<[1], [0], [0], [1], [0, 0, 1, 1], [], []>} : vector<16x36xbf16>, vector<36x128xbf16>, vector<16x128xf32> -> vector<16x128xf32>
    %109 = arith.maximumf %105, %108 : vector<16x128xf32>
    %c27 = arith.constant 27 : index
    %c0_83 = arith.constant 0 : index
    %c0_84 = arith.constant 0 : index
    %110 = vector.load %arg1[%c27, %c0_83, %c0_84] : memref<32x16x36xbf16, #tpu.memory_space<vmem>>, vector<1x16x36xbf16>
    %111 = vector.shape_cast %110 : vector<1x16x36xbf16> to vector<16x36xbf16>
    %cst_85 = arith.constant dense<0.000000e+00> : vector<16x128xf32>
    %112 = tpu.matmul %111, %0, %cst_85 {dimension_numbers = #tpu.dot_dimension_numbers<[1], [0], [0], [1], [0, 0, 1, 1], [], []>} : vector<16x36xbf16>, vector<36x128xbf16>, vector<16x128xf32> -> vector<16x128xf32>
    %113 = arith.maximumf %109, %112 : vector<16x128xf32>
    %c28 = arith.constant 28 : index
    %c0_86 = arith.constant 0 : index
    %c0_87 = arith.constant 0 : index
    %114 = vector.load %arg1[%c28, %c0_86, %c0_87] : memref<32x16x36xbf16, #tpu.memory_space<vmem>>, vector<1x16x36xbf16>
    %115 = vector.shape_cast %114 : vector<1x16x36xbf16> to vector<16x36xbf16>
    %cst_88 = arith.constant dense<0.000000e+00> : vector<16x128xf32>
    %116 = tpu.matmul %115, %0, %cst_88 {dimension_numbers = #tpu.dot_dimension_numbers<[1], [0], [0], [1], [0, 0, 1, 1], [], []>} : vector<16x36xbf16>, vector<36x128xbf16>, vector<16x128xf32> -> vector<16x128xf32>
    %117 = arith.maximumf %113, %116 : vector<16x128xf32>
    %c29 = arith.constant 29 : index
    %c0_89 = arith.constant 0 : index
    %c0_90 = arith.constant 0 : index
    %118 = vector.load %arg1[%c29, %c0_89, %c0_90] : memref<32x16x36xbf16, #tpu.memory_space<vmem>>, vector<1x16x36xbf16>
    %119 = vector.shape_cast %118 : vector<1x16x36xbf16> to vector<16x36xbf16>
    %cst_91 = arith.constant dense<0.000000e+00> : vector<16x128xf32>
    %120 = tpu.matmul %119, %0, %cst_91 {dimension_numbers = #tpu.dot_dimension_numbers<[1], [0], [0], [1], [0, 0, 1, 1], [], []>} : vector<16x36xbf16>, vector<36x128xbf16>, vector<16x128xf32> -> vector<16x128xf32>
    %121 = arith.maximumf %117, %120 : vector<16x128xf32>
    %c30 = arith.constant 30 : index
    %c0_92 = arith.constant 0 : index
    %c0_93 = arith.constant 0 : index
    %122 = vector.load %arg1[%c30, %c0_92, %c0_93] : memref<32x16x36xbf16, #tpu.memory_space<vmem>>, vector<1x16x36xbf16>
    %123 = vector.shape_cast %122 : vector<1x16x36xbf16> to vector<16x36xbf16>
    %cst_94 = arith.constant dense<0.000000e+00> : vector<16x128xf32>
    %124 = tpu.matmul %123, %0, %cst_94 {dimension_numbers = #tpu.dot_dimension_numbers<[1], [0], [0], [1], [0, 0, 1, 1], [], []>} : vector<16x36xbf16>, vector<36x128xbf16>, vector<16x128xf32> -> vector<16x128xf32>
    %125 = arith.maximumf %121, %124 : vector<16x128xf32>
    %c31 = arith.constant 31 : index
    %c0_95 = arith.constant 0 : index
    %c0_96 = arith.constant 0 : index
    %126 = vector.load %arg1[%c31, %c0_95, %c0_96] : memref<32x16x36xbf16, #tpu.memory_space<vmem>>, vector<1x16x36xbf16>
    %127 = vector.shape_cast %126 : vector<1x16x36xbf16> to vector<16x36xbf16>
    %cst_97 = arith.constant dense<0.000000e+00> : vector<16x128xf32>
    %128 = tpu.matmul %127, %0, %cst_97 {dimension_numbers = #tpu.dot_dimension_numbers<[1], [0], [0], [1], [0, 0, 1, 1], [], []>} : vector<16x36xbf16>, vector<36x128xbf16>, vector<16x128xf32> -> vector<16x128xf32>
    %129 = arith.maximumf %125, %128 : vector<16x128xf32>
    %c0_98 = arith.constant 0 : index
    %c0_99 = arith.constant 0 : index
    %130 = vector.load %arg3[%c0_98, %c0_99] : memref<1x128xf32, #tpu.memory_space<vmem>>, vector<1x128xf32>
    %131 = vector.broadcast %130 : vector<1x128xf32> to vector<16x128xf32>
    %132 = arith.addf %129, %131 : vector<16x128xf32>
    %133 = arith.truncf %132 : vector<16x128xf32> to vector<16x128xbf16>
    %c0_100 = arith.constant 0 : index
    %c0_101 = arith.constant 0 : index
    %134 = vector.load %arg4[%c0_100, %c0_101] : memref<16x128xbf16, #tpu.memory_space<vmem>>, vector<16x128xbf16>
    tpu.vector_store %arg4[%c0_100, %c0_101], %133 {strides = array<i32>} : memref<16x128xbf16, #tpu.memory_space<vmem>>, vector<16x128xbf16>,
    return
  }
  func.func @transform_0(%arg0: i32) -> (i32, i32, i32) {
    %c0_i32 = arith.constant 0 : i32
    %c0_i32_0 = arith.constant 0 : i32
    %c0_i32_1 = arith.constant 0 : i32
    return %c0_i32, %arg0, %c0_i32_0 : i32, i32, i32
  }
  func.func @transform_1(%arg0: i32) -> (i32, i32) {
    %c0_i32 = arith.constant 0 : i32
    %c0_i32_0 = arith.constant 0 : i32
    %c0_i32_1 = arith.constant 0 : i32
    return %c0_i32, %c0_i32_0 : i32, i32
  }
  func.func @transform_2(%arg0: i32) -> (i32, i32) {
    %c0_i32 = arith.constant 0 : i32
    %c0_i32_0 = arith.constant 0 : i32
    %c0_i32_1 = arith.constant 0 : i32
    return %c0_i32, %c0_i32_0 : i32, i32
  }
  func.func @transform_3(%arg0: i32) -> (i32, i32) {
    %c0_i32 = arith.constant 0 : i32
    %c0_i32_0 = arith.constant 0 : i32
    return %arg0, %c0_i32 : i32, i32
  }
}

module attributes {stable_mosaic.version = 11 : i64} {
  func.func @_global_head_kernel(%arg0: i32, %arg1: i32, %arg2: memref<16x68xbf16, #tpu.memory_space<vmem>>, %arg3: memref<68x128xbf16, #tpu.memory_space<vmem>>, %arg4: memref<1x128xf32, #tpu.memory_space<vmem>>, %arg5: memref<128x128xf32, #tpu.memory_space<vmem>>, %arg6: memref<1x128xf32, #tpu.memory_space<vmem>>, %arg7: memref<8x128xf32, #tpu.memory_space<vmem>>, %arg8: memref<1x128xf32, #tpu.memory_space<vmem>>) attributes {dimension_semantics = [#tpu.dimension_semantics<parallel>, #tpu.dimension_semantics<arbitrary>], iteration_bounds = array<i64: 2, 1>, scalar_prefetch = 0 : i64, scratch_operands = 1 : i64, tpu.core_type = #tpu.core_type<tc>, window_params = [{transform_indices = @transform_0, window_bounds = array<i64: 16, 68>}, {pipeline_mode = #tpu.pipeline_mode<synchronous>, transform_indices = @transform_1, window_bounds = array<i64: 68, 128>}, {pipeline_mode = #tpu.pipeline_mode<synchronous>, transform_indices = @transform_2, window_bounds = array<i64: 1, 128>}, {pipeline_mode = #tpu.pipeline_mode<synchronous>, transform_indices = @transform_3, window_bounds = array<i64: 128, 128>}, {pipeline_mode = #tpu.pipeline_mode<synchronous>, transform_indices = @transform_4, window_bounds = array<i64: 1, 128>}, {transform_indices = @transform_5, window_bounds = array<i64: 8, 128>}]} {
    %c0_i32 = arith.constant 0 : i32
    %0 = arith.cmpi eq, %arg1, %c0_i32 : i32
    %1 = arith.extui %0 : i1 to i32
    %c0_i32_0 = arith.constant 0 : i32
    %2 = arith.cmpi ne, %1, %c0_i32_0 : i32
    scf.if %2 {
      %cst_11 = arith.constant 0.000000e+00 : f32
      %14 = vector.broadcast %cst_11 : f32 to vector<1x128xf32>
      %c0_12 = arith.constant 0 : index
      %c0_13 = arith.constant 0 : index
      %15 = vector.load %arg8[%c0_12, %c0_13] : memref<1x128xf32, #tpu.memory_space<vmem>>, vector<1x128xf32>
      tpu.vector_store %arg8[%c0_12, %c0_13], %14 {strides = array<i32>} : memref<1x128xf32, #tpu.memory_space<vmem>>, vector<1x128xf32>,
    } else {
    }
    %c0 = arith.constant 0 : index
    %c0_1 = arith.constant 0 : index
    %3 = vector.load %arg2[%c0, %c0_1] : memref<16x68xbf16, #tpu.memory_space<vmem>>, vector<16x68xbf16>
    %c0_2 = arith.constant 0 : index
    %c0_3 = arith.constant 0 : index
    %4 = vector.load %arg3[%c0_2, %c0_3] : memref<68x128xbf16, #tpu.memory_space<vmem>>, vector<68x128xbf16>
    %cst = arith.constant dense<0.000000e+00> : vector<16x128xf32>
    %5 = tpu.matmul %3, %4, %cst {dimension_numbers = #tpu.dot_dimension_numbers<[1], [0], [0], [1], [0, 0, 1, 1], [], []>} : vector<16x68xbf16>, vector<68x128xbf16>, vector<16x128xf32> -> vector<16x128xf32>
    %c0_4 = arith.constant 0 : index
    %c0_5 = arith.constant 0 : index
    %6 = vector.load %arg8[%c0_4, %c0_5] : memref<1x128xf32, #tpu.memory_space<vmem>>, vector<1x128xf32>
    %cst_6 = arith.constant dense<0xFF800000> : vector<128xf32>
    %7 = vector.multi_reduction <maximumf>, %5, %cst_6 [0] : vector<16x128xf32> to vector<128xf32>
    %8 = vector.shape_cast %7 : vector<128xf32> to vector<1x128xf32>
    %9 = arith.maximumf %6, %8 : vector<1x128xf32>
    %c0_7 = arith.constant 0 : index
    %c0_8 = arith.constant 0 : index
    %10 = vector.load %arg8[%c0_7, %c0_8] : memref<1x128xf32, #tpu.memory_space<vmem>>, vector<1x128xf32>
    tpu.vector_store %arg8[%c0_7, %c0_8], %9 {strides = array<i32>} : memref<1x128xf32, #tpu.memory_space<vmem>>, vector<1x128xf32>,
    %c0_i32_9 = arith.constant 0 : i32
    %11 = arith.cmpi eq, %arg1, %c0_i32_9 : i32
    %12 = arith.extui %11 : i1 to i32
    %c0_i32_10 = arith.constant 0 : i32
    %13 = arith.cmpi ne, %12, %c0_i32_10 : i32
    scf.if %13 {
      %c0_11 = arith.constant 0 : index
      %c0_12 = arith.constant 0 : index
      %14 = vector.load %arg8[%c0_11, %c0_12] : memref<1x128xf32, #tpu.memory_space<vmem>>, vector<1x128xf32>
      %c0_13 = arith.constant 0 : index
      %c0_14 = arith.constant 0 : index
      %15 = vector.load %arg4[%c0_13, %c0_14] : memref<1x128xf32, #tpu.memory_space<vmem>>, vector<1x128xf32>
      %16 = arith.addf %14, %15 : vector<1x128xf32>
      %c0_15 = arith.constant 0 : index
      %c0_16 = arith.constant 0 : index
      %17 = vector.load %arg5[%c0_15, %c0_16] : memref<128x128xf32, #tpu.memory_space<vmem>>, vector<128x128xf32>
      %cst_17 = arith.constant dense<0.000000e+00> : vector<1x128xf32>
      %18 = tpu.matmul %16, %17, %cst_17 {dimension_numbers = #tpu.dot_dimension_numbers<[1], [0], [0], [1], [0, 0, 1, 1], [], []>} : vector<1x128xf32>, vector<128x128xf32>, vector<1x128xf32> -> vector<1x128xf32>
      %c0_18 = arith.constant 0 : index
      %c0_19 = arith.constant 0 : index
      %19 = vector.load %arg6[%c0_18, %c0_19] : memref<1x128xf32, #tpu.memory_space<vmem>>, vector<1x128xf32>
      %20 = arith.addf %18, %19 : vector<1x128xf32>
      %cst_20 = arith.constant 0.000000e+00 : f32
      %21 = vector.broadcast %cst_20 : f32 to vector<1x128xf32>
      %22 = arith.maximumf %20, %21 : vector<1x128xf32>
      %23 = tpu.iota {dimensions = array<i32: 1>} : vector<1x128xi32>
      %c10_i32 = arith.constant 10 : i32
      %24 = vector.broadcast %c10_i32 : i32 to vector<1x128xi32>
      %25 = arith.cmpi slt, %23, %24 : vector<1x128xi32>
      %cst_21 = arith.constant -1.000000e+30 : f32
      %26 = vector.broadcast %cst_21 : f32 to vector<1x128xf32>
      %27 = arith.select %25, %22, %26 : vector<1x128xi1>, vector<1x128xf32>
      %cst_22 = arith.constant dense<0xFF800000> : vector<1xf32>
      %28 = vector.multi_reduction <maximumf>, %27, %cst_22 [1] : vector<1x128xf32> to vector<1xf32>
      %29 = vector.shape_cast %28 : vector<1xf32> to vector<1x1xf32>
      %30 = vector.broadcast %29 : vector<1x1xf32> to vector<1x128xf32>
      %31 = arith.subf %27, %30 : vector<1x128xf32>
      %32 = math.exp %31 : vector<1x128xf32>
      %cst_23 = arith.constant dense<0.000000e+00> : vector<1xf32>
      %33 = vector.multi_reduction <add>, %32, %cst_23 [1] : vector<1x128xf32> to vector<1xf32>
      %34 = vector.shape_cast %33 : vector<1xf32> to vector<1x1xf32>
      %35 = math.log %34 : vector<1x1xf32>
      %36 = arith.addf %35, %29 : vector<1x1xf32>
      %37 = vector.broadcast %36 : vector<1x1xf32> to vector<1x128xf32>
      %38 = arith.subf %27, %37 : vector<1x128xf32>
      %39 = vector.shape_cast %38 : vector<1x128xf32> to vector<1x128xf32>
      %40 = vector.broadcast %39 : vector<1x128xf32> to vector<8x128xf32>
      %c0_24 = arith.constant 0 : index
      %c0_25 = arith.constant 0 : index
      %41 = vector.load %arg7[%c0_24, %c0_25] : memref<8x128xf32, #tpu.memory_space<vmem>>, vector<8x128xf32>
      tpu.vector_store %arg7[%c0_24, %c0_25], %40 {strides = array<i32>} : memref<8x128xf32, #tpu.memory_space<vmem>>, vector<8x128xf32>,
    } else {
    }
    return
  }
  func.func @transform_0(%arg0: i32, %arg1: i32) -> (i32, i32) {
    %c1_i32 = arith.constant 1 : i32
    %0 = arith.muli %arg0, %c1_i32 : i32
    %1 = arith.addi %0, %arg1 : i32
    %c0_i32 = arith.constant 0 : i32
    %c0_i32_0 = arith.constant 0 : i32
    return %1, %c0_i32 : i32, i32
  }
  func.func @transform_1(%arg0: i32, %arg1: i32) -> (i32, i32) {
    %c0_i32 = arith.constant 0 : i32
    %c0_i32_0 = arith.constant 0 : i32
    %c0_i32_1 = arith.constant 0 : i32
    return %c0_i32, %c0_i32_0 : i32, i32
  }
  func.func @transform_2(%arg0: i32, %arg1: i32) -> (i32, i32) {
    %c0_i32 = arith.constant 0 : i32
    %c0_i32_0 = arith.constant 0 : i32
    %c0_i32_1 = arith.constant 0 : i32
    return %c0_i32, %c0_i32_0 : i32, i32
  }
  func.func @transform_3(%arg0: i32, %arg1: i32) -> (i32, i32) {
    %c0_i32 = arith.constant 0 : i32
    %c0_i32_0 = arith.constant 0 : i32
    %c0_i32_1 = arith.constant 0 : i32
    return %c0_i32, %c0_i32_0 : i32, i32
  }
  func.func @transform_4(%arg0: i32, %arg1: i32) -> (i32, i32) {
    %c0_i32 = arith.constant 0 : i32
    %c0_i32_0 = arith.constant 0 : i32
    %c0_i32_1 = arith.constant 0 : i32
    return %c0_i32, %c0_i32_0 : i32, i32
  }
  func.func @transform_5(%arg0: i32, %arg1: i32) -> (i32, i32) {
    %c0_i32 = arith.constant 0 : i32
    %c0_i32_0 = arith.constant 0 : i32
    return %arg0, %c0_i32 : i32, i32
  }
}

</mosaic_0001>

<bundles_post_ra>
// kernel: custom-call.4
= control target key start
LH: loop header
LB: loop body
LE: loop exit
PB: predicated region body
PF: predicated region fallthrough
CT: control target
= control target key end

     0   :  { %s6_s0 = inlined_call_operand.vmem [shape: f32[2,64], index: 0, kind: output, shape index: {}]  }

// kernel: custom-call.5
= control target key start
LH: loop header
LB: loop body
LE: loop exit
PB: predicated region body
PF: predicated region fallthrough
CT: control target
= control target key end

     0   :  { %s6_s0 = inlined_call_operand.vmem [shape: f32[2,32], index: 0, kind: output, shape index: {}]  }

// kernel: forward.5
= control target key start
LH: loop header
LB: loop body
LE: loop exit
PB: predicated region body
PF: predicated region fallthrough
CT: control target
= control target key end

     0   :  { %s570_s18 = smov 0   ;;  %s572_s19 = smov 0   ;;  %s677_s0 = inlined_call_operand.vmem [shape: bf16[32,68], index: 0, kind: input, shape index: {}]   ;;  %s678_s1 = inlined_call_operand.vmem [shape: bf16[68,128], index: 1, kind: input, shape index: {}]   ;;  %s679_s2 = inlined_call_operand.vmem [shape: f32[1,128], index: 2, kind: input, shape index: {}]   ;;  %s680_s3 = inlined_call_operand.vmem [shape: f32[128,128], index: 3, kind: input, shape index: {}]   ;;  %s681_s4 = inlined_call_operand.vmem [shape: f32[1,128], index: 4, kind: input, shape index: {}]   ;;  %s682_s5 = inlined_call_operand.vmem [shape: f32[16,128], index: 5, kind: output, shape index: {}]  }
   0x1   :  { %s574_s20 = smov 0  }
   0x2 LB: > { %s27_s21 = sadd.s32 1, %s533_s19  ;;  %p454_p0 = scmp.ge.s32.totalorder %s537_s20, 1  ;;  %s537_s20 = sphi %s574_s20, %s15_s20   ;;  %s533_s19 = sphi %s572_s19, %s684_s19   ;;  %s529_s18 = sphi %s570_s18, %s683_s18  }
   0x3   : > { %p29_p1 = scmp.ge.s32.totalorder %s27_s21, 2  ;;  %p204_p2 = scmp.lt.s32.totalorder %s537_s20, 3 }
   0x5   : > { %s686_s21 = smov (%p29_p1, %s27_s21), 0  ;;  %p205_p3 = pnand %p454_p0, %p204_p2 }
   0x6   : > { %s455_s24 = sshll.u32 (!%p205_p3), %s529_s18, 1  ;;  %p240_p5 = scmp.lt.s32.totalorder (!%p205_p3), %s529_s18, 1 }
   0x7   : > { %208 = sbr.rel (%p205_p3) target bundleno = 589 (0x24d), region = 40  ;;  %p234_p4 = scmp.lt.s32.totalorder (!%p205_p3), %s455_s24, 3 }
   0xc   : > { %v260_v0 = vld [vmem:[%s678_s1 + $0x20] sm:$0x3]  ;;  %vm297_vm0 = vcmask 1041408   ;;  %v485_v4 = vld [vmem:[%s678_s1 + $0x18] sm:$0xff]  ;;  %v484_v5 = vld [vmem:[%s678_s1 + $0x10] sm:$0xff]  ;;  %s688_s24 = smov (!%p234_p4, %s455_s24), 3  ;;  %v369_v40 = vlaneseq }
   0xd   : > { %v283_v1 = vunpack.c.l.b16 %v260_v0  ;;  %v483_v6 = vld [vmem:[%s678_s1 + $0x8] sm:$0xff]  ;;  %s456_s6 = sshll.u32 %s688_s24, 2  ;;  %v482_v7 = vld [vmem:[%s678_s1] sm:$0xff]  ;;  %vm293_vm1 = vcmask 556032   ;;  %v346_v9 = vld [vmem:[%s680_s3 + $0x78] sm:$0xff]  ;;  %v539_v11 = vmov 0.0  }
   0xe   : > { %s237_s11 = scalar_lea.vmem %s677_s0, %s456_s6  ;;  %v345_v10 = vld [vmem:[%s680_s3 + $0x70] sm:$0xff]  ;;  %348 = vmatpush.msra.mxu1 %v346_v9  ;;  %249 = vst [vmem:[#allocation2] sm:$0x1] %v539_v11  ;;  %v344_v12 = vld [vmem:[%s680_s3 + $0x68] sm:$0xff]  ;;  %v343_v13 = vld [vmem:[%s680_s3 + $0x60] sm:$0xff]  ;;  %v370_v42 = vand.u32 127, %v369_v40 }
   0xf   : > { %v288_v2 = vpack.c.b16 %v283_v1, %v283_v1  ;;  %v481_v8 = vld [vmem:[%s237_s11] sm:$0xff]  ;;  %v342_v14 = vld [vmem:[%s680_s3 + $0x58] sm:$0xff]  ;;  %v341_v15 = vld [vmem:[%s680_s3 + $0x50] sm:$0xff]  ;;  %vm373_vm3 = vcmask 1040384   ;;  %s690_s18 = smov (!%p240_p5, %s529_s18), 1 }
  0x10   : > { %349 = vmatpush.msra.mxu1 %v345_v10  ;;  %v340_v16 = vld [vmem:[%s680_s3 + $0x48] sm:$0xff]  ;;  %v339_v17 = vld [vmem:[%s680_s3 + $0x40] sm:$0xff]  ;;  %v338_v18 = vld [vmem:[%s680_s3 + $0x38] sm:$0xff]  ;;  %vm371_vm2 = vcmp.lt.s32.totalorder %v370_v42, 10  ;;  %s457_s6 = sshll.u32 %s690_s18, 3 }
  0x11   : > { %v299_v3 = vsel %vm297_vm0, %v288_v2, 0  ;;  %v337_v19 = vld [vmem:[%s680_s3 + $0x30] sm:$0xff]  ;;  %v336_v20 = vld [vmem:[%s680_s3 + $0x28] sm:$0xff]  ;;  %v335_v21 = vld [vmem:[%s680_s3 + $0x20] sm:$0xff]  ;;  %s243_s9 = scalar_lea.vmem %s682_s5, %s457_s6 }
  0x12   : > { %304 = vmatpush.bf16.msra.mxu0 %v299_v3  ;;  %350 = vmatpush.msra.mxu1 %v344_v12  ;;  %v334_v22 = vld [vmem:[%s680_s3 + $0x18] sm:$0xff]  ;;  %v333_v23 = vld [vmem:[%s680_s3 + $0x10] sm:$0xff]  ;;  %v332_v24 = vld [vmem:[%s680_s3 + $0x8] sm:$0xff] }
  0x13   : > { %v331_v25 = vld [vmem:[%s680_s3] sm:$0xff] }
  0x14   : > { %351 = vmatpush.msra.mxu1 %v343_v13  ;;  %v329_v37 = vld [vmem:[%s679_s2] sm:$0x1] }
  0x15   : > { %v315_v34 = vld [vmem:[#allocation2] sm:$0x1] }
  0x16   : > { %305 = vmatpush.bf16.msra.mxu0 %v485_v4  ;;  %352 = vmatpush.msra.mxu1 %v342_v14  ;;  %v347_v41 = vld [vmem:[%s681_s4] sm:$0x1] }
  0x18   : > { %353 = vmatpush.msra.mxu1 %v341_v15 }
  0x1a   : > { %306 = vmatpush.bf16.msra.mxu0 %v484_v5  ;;  %354 = vmatpush.msra.mxu1 %v340_v16 }
  0x1c   : > { %355 = vmatpush.msra.mxu1 %v339_v17 }
  0x1e   : > { %307 = vmatpush.bf16.msra.mxu0 %v483_v6  ;;  %356 = vmatpush.msra.mxu1 %v338_v18 }
  0x20   : > { %357 = vmatpush.msra.mxu1 %v337_v19 }
  0x22   : > { %308 = vmatpush.bf16.msra.mxu0 %v482_v7  ;;  %358 = vmatpush.msra.mxu1 %v336_v20 }
  0x24   : > { %359 = vmatpush.msra.mxu1 %v335_v21 }
  0x25   : > { %478 = vmatmul.msk.bf16.vlgmr.msra.gmra.mxu0 %vm293_vm1, %v481_v8 }
  0x26   : > { %360 = vmatpush.msra.mxu1 %v334_v22 }
  0x28   : > { %361 = vmatpush.msra.mxu1 %v333_v23 }
  0x2a   : > { %362 = vmatpush.msra.mxu1 %v332_v24 }
  0x2c   : > { %363 = vmatpush.msra.mxu1 %v331_v25 }
  0xa2   : > { %v310_v26 = vpop.f32.mrf.mxu0 }
  0xaa   : > { %v312_v27 = vpop.f32.mrf.mxu0 }
  0xab   : > { %v316_v28 = vmax.f32 %v310_v26, %v312_v27 }
  0xad   : > { %v317_v29 = vrot.slane %v316_v28, 4 }
  0xaf   : > { %v318_v30 = vmax.f32 %v316_v28, %v317_v29 }
  0xb1   : > { %v319_v31 = vrot.slane %v318_v30, 2 }
  0xb3   : > { %v320_v32 = vmax.f32 %v318_v30, %v319_v31 }
  0xb5   : > { %v321_v33 = vrot.slane %v320_v32, 1 }
  0xb7   : > { %v322_v35 = vmax.f32 %v320_v32, %v321_v33 }
  0xb9   : > { %v323_v36 = vmax.f32 %v315_v34, %v322_v35 }
  0xbb   : > { %324 = vst [vmem:[#allocation2] sm:$0x1] %v323_v36 }
  0xc2   : > { %v328_v38 = vld [vmem:[#allocation2] sm:$0x1] }
  0xc3   : > { %v330_v39 = vadd.f32 %v329_v37, %v328_v38 }
  0xc5   : > { %364 = vmatmul.f32.vlgmr.msra.gmra.mxu1 %v330_v39 }
 0x142   : > { %v365_v43 = vpop.f32.mrf.mxu1 }
 0x143   : > { %v366_v44 = vadd.f32 %v365_v43, %v347_v41 }
 0x145   : > { %v368_v45 = vmax.f32 %v366_v44, 0.0 }
 0x147   : > { %v372_v46 = vsel %vm371_vm2, %v368_v45, -1e+30 }
 0x148   : > { %v374_v47 = vsel %vm373_vm3, %v372_v46, -inf }
 0x149   : > { %375 = vmax.xlane.f32.xlu0 %v374_v47 }
 0x1bc   : > { %v376_v48 = vpop.xlane.xlu0 %375 }
 0x1bd   : > { %v377_v49 = vsub.f32 %v372_v46, %v376_v48 }
 0x1bf   : > { %v378_v50 = vmul.f32 1.442695, %v377_v49 }
 0x1c1   : > { %511 = vpow2.f32 %v378_v50 }
 0x1c7   : > { %v512_v51 = vpop.eup %511 }
 0x1c8   : > { %v380_v52 = vsel %vm373_vm3, %v512_v51, 0.0 }
 0x1c9   : > { %381 = vadd.xlane.f32.xlu0 %v380_v52 }
 0x23c   : > { %v382_v53 = vpop.xlane.xlu0 %381 }
 0x23d   : > { %513 = vlog2.f32 %v382_v53 }
 0x243   : > { %v514_v54 = vpop.eup %513 }
 0x244   : > { %v384_v55 = vmul.f32 0.6931472, %v514_v54 }
 0x246   : > { %v385_v56 = vadd.f32 %v384_v55, %v376_v48 }
 0x248   : > { %v386_v57 = vsub.f32 %v372_v46, %v385_v56 }
 0x24a   : > { %v387_v58 = vperm.slane %v386_v57, 0 }
 0x24c   : > { %388 = vst [vmem:[%s243_s9] sm:$0xff] %v387_v58 }
 0x24d PF: > { %s15_s20 = sadd.s32 1, %s537_s20   ;;  %s683_s18 = smov %s533_s19 }
 0x24e   : > { %p12_p6 = scmp.ge.s32.totalorder %s15_s20, 4   ;;  %s684_s19 = smov %s686_s21 }
 0x250   :  { %14 = sbr.rel (!%p12_p6) target bundleno = 2 (0x2), region = 78 }

// kernel: forward.4
= control target key start
LH: loop header
LB: loop body
LE: loop exit
PB: predicated region body
PF: predicated region fallthrough
CT: control target
= control target key end

     0   :  { %vm46_vm0 = vcmask 1041408   ;;  %vm42_vm1 = vcmask 293888   ;;  %s1452_s1 = inlined_call_operand.vmem [shape: bf16[36,128], index: 1, kind: input, shape index: {}]   ;;  %s1453_s0 = inlined_call_operand.vmem [shape: bf16[32,16,36], index: 0, kind: input, shape index: {}]   ;;  %s1454_s2 = inlined_call_operand.vmem [shape: f32[1,128], index: 2, kind: input, shape index: {}]   ;;  %s1455_s3 = inlined_call_operand.vmem [shape: bf16[16,128], index: 3, kind: output, shape index: {}]  }
   0x1   :  { %v19_v0 = vld [vmem:[%s1452_s1 + $0x10] sm:$0x3]  ;;  %v1215_v4 = vld [vmem:[%s1452_s1 + $0x8] sm:$0xff]  ;;  %v1224_v5 = vld [vmem:[%s1452_s1] sm:$0xff] }
   0x2   :  { %v36_v1 = vunpack.c.l.b16 %v19_v0  ;;  %v1149_v6 = vld [vmem:[%s1453_s0] sm:$0xff]  ;;  %v1150_v7 = vld [vmem:[%s1453_s0 + $0x8] sm:$0xff]  ;;  %v1151_v8 = vld [vmem:[%s1453_s0 + $0x10] sm:$0xff] }
   0x3   :  { %v1152_v9 = vld [vmem:[%s1453_s0 + $0x18] sm:$0xff]  ;;  %v1153_v10 = vld [vmem:[%s1453_s0 + $0x20] sm:$0xff]  ;;  %v1154_v11 = vld [vmem:[%s1453_s0 + $0x28] sm:$0xff] }
   0x4   :  { %v39_v2 = vpack.c.b16 %v36_v1, %v36_v1  ;;  %v1155_v12 = vld [vmem:[%s1453_s0 + $0x30] sm:$0xff]  ;;  %v1156_v13 = vld [vmem:[%s1453_s0 + $0x38] sm:$0xff]  ;;  %v1157_v14 = vld [vmem:[%s1453_s0 + $0x40] sm:$0xff] }
   0x5   :  { %v1158_v15 = vld [vmem:[%s1453_s0 + $0x48] sm:$0xff]  ;;  %v1159_v16 = vld [vmem:[%s1453_s0 + $0x50] sm:$0xff]  ;;  %v1160_v17 = vld [vmem:[%s1453_s0 + $0x58] sm:$0xff] }
   0x6   :  { %v1210_v3 = vsel %vm46_vm0, %v39_v2, 0  ;;  %v1161_v18 = vld [vmem:[%s1453_s0 + $0x60] sm:$0xff]  ;;  %v1162_v19 = vld [vmem:[%s1453_s0 + $0x68] sm:$0xff]  ;;  %v1163_v20 = vld [vmem:[%s1453_s0 + $0x70] sm:$0xff] }
   0x7   :  { %55 = vmatpush.bf16.msra.mxu0 %v1210_v3  ;;  %82 = vmatpush.bf16.msra.mxu1 %v1210_v3  ;;  %v1164_v21 = vld [vmem:[%s1453_s0 + $0x78] sm:$0xff]  ;;  %v1165_v22 = vld [vmem:[%s1453_s0 + $0x80] sm:$0xff]  ;;  %v1166_v23 = vld [vmem:[%s1453_s0 + $0x88] sm:$0xff] }
   0x8   :  { %109 = vmatpush.bf16.msra.mxu2 %v1210_v3  ;;  %136 = vmatpush.bf16.msra.mxu3 %v1210_v3  ;;  %v1167_v24 = vld [vmem:[%s1453_s0 + $0x90] sm:$0xff]  ;;  %v1168_v25 = vld [vmem:[%s1453_s0 + $0x98] sm:$0xff]  ;;  %v1169_v26 = vld [vmem:[%s1453_s0 + $0xa0] sm:$0xff] }
   0x9   :  { %v1170_v27 = vld [vmem:[%s1453_s0 + $0xa8] sm:$0xff]  ;;  %v1171_v28 = vld [vmem:[%s1453_s0 + $0xb0] sm:$0xff]  ;;  %v1172_v29 = vld [vmem:[%s1453_s0 + $0xb8] sm:$0xff] }
   0xa   :  { %v1173_v30 = vld [vmem:[%s1453_s0 + $0xc0] sm:$0xff]  ;;  %v1174_v31 = vld [vmem:[%s1453_s0 + $0xc8] sm:$0xff]  ;;  %v1175_v32 = vld [vmem:[%s1453_s0 + $0xd0] sm:$0xff] }
   0xb   :  { %56 = vmatpush.bf16.msra.mxu0 %v1215_v4  ;;  %83 = vmatpush.bf16.msra.mxu1 %v1215_v4  ;;  %v1176_v33 = vld [vmem:[%s1453_s0 + $0xd8] sm:$0xff]  ;;  %v1177_v34 = vld [vmem:[%s1453_s0 + $0xe0] sm:$0xff]  ;;  %v1178_v35 = vld [vmem:[%s1453_s0 + $0xe8] sm:$0xff] }
   0xc   :  { %110 = vmatpush.bf16.msra.mxu2 %v1215_v4  ;;  %137 = vmatpush.bf16.msra.mxu3 %v1215_v4  ;;  %v1179_v36 = vld [vmem:[%s1453_s0 + $0xf0] sm:$0xff]  ;;  %v1180_v37 = vld [vmem:[%s1453_s0 + $0xf8] sm:$0xff] }
   0xf   :  { %57 = vmatpush.bf16.msra.mxu0 %v1224_v5  ;;  %84 = vmatpush.bf16.msra.mxu1 %v1224_v5 }
  0x10   :  { %111 = vmatpush.bf16.msra.mxu2 %v1224_v5  ;;  %138 = vmatpush.bf16.msra.mxu3 %v1224_v5 }
  0x12   :  { %929 = vmatmul.msk.bf16.vlgmr.msra.gmra.mxu0 %vm42_vm1, %v1149_v6  ;;  %936 = vmatmul.msk.bf16.vlgmr.msra.gmra.mxu1 %vm42_vm1, %v1150_v7 }
  0x13   :  { %163 = vmatpush.bf16.msrb.mxu0 %v1210_v3  ;;  %943 = vmatmul.msk.bf16.vlgmr.msra.gmra.mxu2 %vm42_vm1, %v1151_v8 }
  0x14   :  { %217 = vmatpush.bf16.msrb.mxu2 %v1210_v3  ;;  %950 = vmatmul.msk.bf16.vlgmr.msra.gmra.mxu3 %vm42_vm1, %v1152_v9 }
  0x15   :  { %244 = vmatpush.bf16.msrb.mxu3 %v1210_v3  ;;  %190 = vmatpush.bf16.msrb.mxu1 %v1210_v3 }
  0x17   :  { %164 = vmatpush.bf16.msrb.mxu0 %v1215_v4 }
  0x18   :  { %218 = vmatpush.bf16.msrb.mxu2 %v1215_v4 }
  0x19   :  { %245 = vmatpush.bf16.msrb.mxu3 %v1215_v4  ;;  %191 = vmatpush.bf16.msrb.mxu1 %v1215_v4 }
  0x1b   :  { %165 = vmatpush.bf16.msrb.mxu0 %v1224_v5 }
  0x1c   :  { %219 = vmatpush.bf16.msrb.mxu2 %v1224_v5 }
  0x1d   :  { %192 = vmatpush.bf16.msrb.mxu1 %v1224_v5  ;;  %246 = vmatpush.bf16.msrb.mxu3 %v1224_v5 }
  0x1f   :  { %271 = vmatpush.bf16.msra.mxu0 %v1210_v3 }
  0x20   :  { %325 = vmatpush.bf16.msra.mxu2 %v1210_v3 }
  0x21   :  { %352 = vmatpush.bf16.msra.mxu3 %v1210_v3  ;;  %298 = vmatpush.bf16.msra.mxu1 %v1210_v3 }
  0x22   :  { %957 = vmatmul.msk.bf16.vlgmr.msrb.gmra.mxu0 %vm42_vm1, %v1153_v10  ;;  %964 = vmatmul.msk.bf16.vlgmr.msrb.gmra.mxu1 %vm42_vm1, %v1154_v11 }
  0x23   :  { %272 = vmatpush.bf16.msra.mxu0 %v1215_v4  ;;  %971 = vmatmul.msk.bf16.vlgmr.msrb.gmra.mxu2 %vm42_vm1, %v1155_v12 }
  0x24   :  { %326 = vmatpush.bf16.msra.mxu2 %v1215_v4  ;;  %978 = vmatmul.msk.bf16.vlgmr.msrb.gmra.mxu3 %vm42_vm1, %v1156_v13 }
  0x25   :  { %353 = vmatpush.bf16.msra.mxu3 %v1215_v4  ;;  %299 = vmatpush.bf16.msra.mxu1 %v1215_v4 }
  0x27   :  { %273 = vmatpush.bf16.msra.mxu0 %v1224_v5 }
  0x28   :  { %327 = vmatpush.bf16.msra.mxu2 %v1224_v5 }
  0x29   :  { %300 = vmatpush.bf16.msra.mxu1 %v1224_v5  ;;  %354 = vmatpush.bf16.msra.mxu3 %v1224_v5 }
  0x2b   :  { %379 = vmatpush.bf16.msrb.mxu0 %v1210_v3 }
  0x2c   :  { %433 = vmatpush.bf16.msrb.mxu2 %v1210_v3 }
  0x2d   :  { %460 = vmatpush.bf16.msrb.mxu3 %v1210_v3  ;;  %406 = vmatpush.bf16.msrb.mxu1 %v1210_v3 }
  0x2f   :  { %380 = vmatpush.bf16.msrb.mxu0 %v1215_v4 }
  0x30   :  { %434 = vmatpush.bf16.msrb.mxu2 %v1215_v4 }
  0x31   :  { %461 = vmatpush.bf16.msrb.mxu3 %v1215_v4  ;;  %407 = vmatpush.bf16.msrb.mxu1 %v1215_v4 }
  0x32   :  { %985 = vmatmul.msk.bf16.vlgmr.msra.gmra.mxu0 %vm42_vm1, %v1157_v14  ;;  %992 = vmatmul.msk.bf16.vlgmr.msra.gmra.mxu1 %vm42_vm1, %v1158_v15 }
  0x33   :  { %381 = vmatpush.bf16.msrb.mxu0 %v1224_v5  ;;  %999 = vmatmul.msk.bf16.vlgmr.msra.gmra.mxu2 %vm42_vm1, %v1159_v16 }
  0x34   :  { %435 = vmatpush.bf16.msrb.mxu2 %v1224_v5  ;;  %1006 = vmatmul.msk.bf16.vlgmr.msra.gmra.mxu3 %vm42_vm1, %v1160_v17 }
  0x35   :  { %408 = vmatpush.bf16.msrb.mxu1 %v1224_v5  ;;  %462 = vmatpush.bf16.msrb.mxu3 %v1224_v5 }
  0x37   :  { %487 = vmatpush.bf16.msra.mxu0 %v1210_v3 }
  0x38   :  { %541 = vmatpush.bf16.msra.mxu2 %v1210_v3 }
  0x39   :  { %568 = vmatpush.bf16.msra.mxu3 %v1210_v3  ;;  %514 = vmatpush.bf16.msra.mxu1 %v1210_v3 }
  0x3b   :  { %488 = vmatpush.bf16.msra.mxu0 %v1215_v4 }
  0x3c   :  { %542 = vmatpush.bf16.msra.mxu2 %v1215_v4 }
  0x3d   :  { %569 = vmatpush.bf16.msra.mxu3 %v1215_v4  ;;  %515 = vmatpush.bf16.msra.mxu1 %v1215_v4 }
  0x3f   :  { %489 = vmatpush.bf16.msra.mxu0 %v1224_v5 }
  0x40   :  { %543 = vmatpush.bf16.msra.mxu2 %v1224_v5 }
  0x41   :  { %516 = vmatpush.bf16.msra.mxu1 %v1224_v5  ;;  %570 = vmatpush.bf16.msra.mxu3 %v1224_v5 }
  0x42   :  { %1013 = vmatmul.msk.bf16.vlgmr.msrb.gmra.mxu0 %vm42_vm1, %v1161_v18  ;;  %1020 = vmatmul.msk.bf16.vlgmr.msrb.gmra.mxu1 %vm42_vm1, %v1162_v19 }
  0x43   :  { %1027 = vmatmul.msk.bf16.vlgmr.msrb.gmra.mxu2 %vm42_vm1, %v1163_v20  ;;  %595 = vmatpush.bf16.msrb.mxu0 %v1210_v3 }
  0x44   :  { %1034 = vmatmul.msk.bf16.vlgmr.msrb.gmra.mxu3 %vm42_vm1, %v1164_v21  ;;  %649 = vmatpush.bf16.msrb.mxu2 %v1210_v3 }
  0x45   :  { %676 = vmatpush.bf16.msrb.mxu3 %v1210_v3  ;;  %622 = vmatpush.bf16.msrb.mxu1 %v1210_v3 }
  0x47   :  { %596 = vmatpush.bf16.msrb.mxu0 %v1215_v4 }
  0x48   :  { %650 = vmatpush.bf16.msrb.mxu2 %v1215_v4 }
  0x49   :  { %677 = vmatpush.bf16.msrb.mxu3 %v1215_v4  ;;  %623 = vmatpush.bf16.msrb.mxu1 %v1215_v4 }
  0x4b   :  { %597 = vmatpush.bf16.msrb.mxu0 %v1224_v5 }
  0x4c   :  { %651 = vmatpush.bf16.msrb.mxu2 %v1224_v5 }
  0x4d   :  { %624 = vmatpush.bf16.msrb.mxu1 %v1224_v5  ;;  %678 = vmatpush.bf16.msrb.mxu3 %v1224_v5 }
  0x52   :  { %1041 = vmatmul.msk.bf16.vlgmr.msra.gmra.mxu0 %vm42_vm1, %v1165_v22  ;;  %1048 = vmatmul.msk.bf16.vlgmr.msra.gmra.mxu1 %vm42_vm1, %v1166_v23 }
  0x53   :  { %1055 = vmatmul.msk.bf16.vlgmr.msra.gmra.mxu2 %vm42_vm1, %v1167_v24  ;;  %703 = vmatpush.bf16.msra.mxu0 %v1210_v3 }
  0x54   :  { %1062 = vmatmul.msk.bf16.vlgmr.msra.gmra.mxu3 %vm42_vm1, %v1168_v25  ;;  %757 = vmatpush.bf16.msra.mxu2 %v1210_v3 }
  0x55   :  { %784 = vmatpush.bf16.msra.mxu3 %v1210_v3  ;;  %730 = vmatpush.bf16.msra.mxu1 %v1210_v3 }
  0x57   :  { %704 = vmatpush.bf16.msra.mxu0 %v1215_v4 }
  0x58   :  { %758 = vmatpush.bf16.msra.mxu2 %v1215_v4 }
  0x59   :  { %785 = vmatpush.bf16.msra.mxu3 %v1215_v4  ;;  %731 = vmatpush.bf16.msra.mxu1 %v1215_v4 }
  0x5b   :  { %705 = vmatpush.bf16.msra.mxu0 %v1224_v5 }
  0x5c   :  { %759 = vmatpush.bf16.msra.mxu2 %v1224_v5 }
  0x5d   :  { %732 = vmatpush.bf16.msra.mxu1 %v1224_v5  ;;  %786 = vmatpush.bf16.msra.mxu3 %v1224_v5 }
  0x62   :  { %1069 = vmatmul.msk.bf16.vlgmr.msrb.gmra.mxu0 %vm42_vm1, %v1169_v26  ;;  %1076 = vmatmul.msk.bf16.vlgmr.msrb.gmra.mxu1 %vm42_vm1, %v1170_v27 }
  0x63   :  { %1083 = vmatmul.msk.bf16.vlgmr.msrb.gmra.mxu2 %vm42_vm1, %v1171_v28  ;;  %811 = vmatpush.bf16.msrb.mxu0 %v1210_v3 }
  0x64   :  { %1090 = vmatmul.msk.bf16.vlgmr.msrb.gmra.mxu3 %vm42_vm1, %v1172_v29  ;;  %865 = vmatpush.bf16.msrb.mxu2 %v1210_v3 }
  0x65   :  { %892 = vmatpush.bf16.msrb.mxu3 %v1210_v3  ;;  %838 = vmatpush.bf16.msrb.mxu1 %v1210_v3 }
  0x67   :  { %812 = vmatpush.bf16.msrb.mxu0 %v1215_v4 }
  0x68   :  { %866 = vmatpush.bf16.msrb.mxu2 %v1215_v4 }
  0x69   :  { %893 = vmatpush.bf16.msrb.mxu3 %v1215_v4  ;;  %839 = vmatpush.bf16.msrb.mxu1 %v1215_v4 }
  0x6b   :  { %813 = vmatpush.bf16.msrb.mxu0 %v1224_v5 }
  0x6c   :  { %867 = vmatpush.bf16.msrb.mxu2 %v1224_v5 }
  0x6d   :  { %840 = vmatpush.bf16.msrb.mxu1 %v1224_v5  ;;  %894 = vmatpush.bf16.msrb.mxu3 %v1224_v5 }
  0x72   :  { %1097 = vmatmul.msk.bf16.vlgmr.msra.gmra.mxu0 %vm42_vm1, %v1173_v30  ;;  %1104 = vmatmul.msk.bf16.vlgmr.msra.gmra.mxu1 %vm42_vm1, %v1174_v31 }
  0x73   :  { %1111 = vmatmul.msk.bf16.vlgmr.msra.gmra.mxu2 %vm42_vm1, %v1175_v32 }
  0x74   :  { %1118 = vmatmul.msk.bf16.vlgmr.msra.gmra.mxu3 %vm42_vm1, %v1176_v33 }
  0x82   :  { %1125 = vmatmul.msk.bf16.vlgmr.msrb.gmra.mxu0 %vm42_vm1, %v1177_v34  ;;  %1132 = vmatmul.msk.bf16.vlgmr.msrb.gmra.mxu1 %vm42_vm1, %v1178_v35 }
  0x83   :  { %1139 = vmatmul.msk.bf16.vlgmr.msrb.gmra.mxu2 %vm42_vm1, %v1179_v36 }
  0x84   :  { %1146 = vmatmul.msk.bf16.vlgmr.msrb.gmra.mxu3 %vm42_vm1, %v1180_v37 }
  0x8f   :  { %v59_v38 = vpop.f32.mrf.mxu0  ;;  %v86_v39 = vpop.f32.mrf.mxu1 }
  0x90   :  { %v64_v40 = vmax.f32 %v59_v38, 0.0 }
  0x92   :  { %v91_v41 = vmax.f32 %v64_v40, %v86_v39 }
  0x96   :  { %v113_v42 = vpop.f32.mrf.mxu2 }
  0x97   :  { %v140_v43 = vpop.f32.mrf.mxu3  ;;  %v118_v44 = vmax.f32 %v91_v41, %v113_v42  ;;  %v61_v45 = vpop.f32.mrf.mxu0 }
  0x98   :  { %v88_v46 = vpop.f32.mrf.mxu1  ;;  %v65_v60 = vmax.f32 %v61_v45, 0.0 }
  0x99   :  { %v145_v47 = vmax.f32 %v118_v44, %v140_v43 }
  0x9a   :  { %v92_v1 = vmax.f32 %v65_v60, %v88_v46 }
  0x9e   :  { %v115_v48 = vpop.f32.mrf.mxu2 }
  0x9f   :  { %v142_v49 = vpop.f32.mrf.mxu3  ;;  %v167_v50 = vpop.f32.mrf.mxu0  ;;  %v119_v2 = vmax.f32 %v92_v1, %v115_v48 }
  0xa0   :  { %v194_v51 = vpop.f32.mrf.mxu1  ;;  %v172_v3 = vmax.f32 %v145_v47, %v167_v50 }
  0xa1   :  { %v146_v6 = vmax.f32 %v119_v2, %v142_v49 }
  0xa2   :  { %v199_v9 = vmax.f32 %v172_v3, %v194_v51 }
  0xa6   :  { %v221_v52 = vpop.f32.mrf.mxu2 }
  0xa7   :  { %v248_v53 = vpop.f32.mrf.mxu3  ;;  %v169_v54 = vpop.f32.mrf.mxu0  ;;  %v226_v11 = vmax.f32 %v199_v9, %v221_v52 }
  0xa8   :  { %v196_v55 = vpop.f32.mrf.mxu1  ;;  %v173_v10 = vmax.f32 %v146_v6, %v169_v54 }
  0xa9   :  { %v253_v15 = vmax.f32 %v226_v11, %v248_v53 }
  0xaa   :  { %v200_v12 = vmax.f32 %v173_v10, %v196_v55 }
  0xae   :  { %v223_v56 = vpop.f32.mrf.mxu2 }
  0xaf   :  { %v250_v57 = vpop.f32.mrf.mxu3  ;;  %v275_v58 = vpop.f32.mrf.mxu0  ;;  %v227_v16 = vmax.f32 %v200_v12, %v223_v56 }
  0xb0   :  { %v302_v59 = vpop.f32.mrf.mxu1  ;;  %v280_v19 = vmax.f32 %v253_v15, %v275_v58 }
  0xb1   :  { %v254_v20 = vmax.f32 %v227_v16, %v250_v57 }
  0xb2   :  { %v307_v21 = vmax.f32 %v280_v19, %v302_v59 }
  0xb6   :  { %v329_v61 = vpop.f32.mrf.mxu2 }
  0xb7   :  { %v356_v62 = vpop.f32.mrf.mxu3  ;;  %v277_v63 = vpop.f32.mrf.mxu0  ;;  %v334_v25 = vmax.f32 %v307_v21, %v329_v61 }
  0xb8   :  { %v304_v0 = vpop.f32.mrf.mxu1  ;;  %v281_v22 = vmax.f32 %v254_v20, %v277_v63 }
  0xb9   :  { %v361_v29 = vmax.f32 %v334_v25, %v356_v62 }
  0xba   :  { %v308_v28 = vmax.f32 %v281_v22, %v304_v0 }
  0xbe   :  { %v331_v4 = vpop.f32.mrf.mxu2 }
  0xbf   :  { %v358_v5 = vpop.f32.mrf.mxu3  ;;  %v383_v7 = vpop.f32.mrf.mxu0  ;;  %v335_v30 = vmax.f32 %v308_v28, %v331_v4 }
  0xc0   :  { %v410_v8 = vpop.f32.mrf.mxu1  ;;  %v388_v31 = vmax.f32 %v361_v29, %v383_v7 }
  0xc1   :  { %v362_v34 = vmax.f32 %v335_v30, %v358_v5 }
  0xc2   :  { %v415_v37 = vmax.f32 %v388_v31, %v410_v8 }
  0xc6   :  { %v437_v13 = vpop.f32.mrf.mxu2 }
  0xc7   :  { %v464_v14 = vpop.f32.mrf.mxu3  ;;  %v385_v17 = vpop.f32.mrf.mxu0  ;;  %v442_v39 = vmax.f32 %v415_v37, %v437_v13 }
  0xc8   :  { %v412_v18 = vpop.f32.mrf.mxu1  ;;  %v389_v38 = vmax.f32 %v362_v34, %v385_v17 }
  0xc9   :  { %v469_v43 = vmax.f32 %v442_v39, %v464_v14 }
  0xca   :  { %v416_v40 = vmax.f32 %v389_v38, %v412_v18 }
  0xce   :  { %v439_v23 = vpop.f32.mrf.mxu2 }
  0xcf   :  { %v466_v24 = vpop.f32.mrf.mxu3  ;;  %v491_v26 = vpop.f32.mrf.mxu0  ;;  %v443_v44 = vmax.f32 %v416_v40, %v439_v23 }
  0xd0   :  { %v518_v27 = vpop.f32.mrf.mxu1  ;;  %v496_v47 = vmax.f32 %v469_v43, %v491_v26 }
  0xd1   :  { %v470_v48 = vmax.f32 %v443_v44, %v466_v24 }
  0xd2   :  { %v523_v49 = vmax.f32 %v496_v47, %v518_v27 }
  0xd6   :  { %v545_v32 = vpop.f32.mrf.mxu2 }
  0xd7   :  { %v572_v33 = vpop.f32.mrf.mxu3  ;;  %v493_v35 = vpop.f32.mrf.mxu0  ;;  %v550_v53 = vmax.f32 %v523_v49, %v545_v32 }
  0xd8   :  { %v520_v36 = vpop.f32.mrf.mxu1  ;;  %v497_v50 = vmax.f32 %v470_v48, %v493_v35  ;;  %v1186_v35 = vld [vmem:[%s1454_s2] ss:$0 sm:$0xff] }
  0xd9   :  { %v577_v57 = vmax.f32 %v550_v53, %v572_v33 }
  0xda   :  { %v524_v56 = vmax.f32 %v497_v50, %v520_v36 }
  0xde   :  { %v547_v41 = vpop.f32.mrf.mxu2 }
  0xdf   :  { %v574_v42 = vpop.f32.mrf.mxu3  ;;  %v599_v45 = vpop.f32.mrf.mxu0  ;;  %v551_v58 = vmax.f32 %v524_v56, %v547_v41 }
  0xe0   :  { %v626_v46 = vpop.f32.mrf.mxu1  ;;  %v604_v59 = vmax.f32 %v577_v57, %v599_v45 }
  0xe1   :  { %v578_v62 = vmax.f32 %v551_v58, %v574_v42 }
  0xe2   :  { %v631_v1 = vmax.f32 %v604_v59, %v626_v46 }
  0xe6   :  { %v653_v51 = vpop.f32.mrf.mxu2 }
  0xe7   :  { %v680_v52 = vpop.f32.mrf.mxu3  ;;  %v601_v54 = vpop.f32.mrf.mxu0  ;;  %v658_v3 = vmax.f32 %v631_v1, %v653_v51 }
  0xe8   :  { %v628_v55 = vpop.f32.mrf.mxu1  ;;  %v605_v2 = vmax.f32 %v578_v62, %v601_v54 }
  0xe9   :  { %v685_v7 = vmax.f32 %v658_v3, %v680_v52 }
  0xea   :  { %v632_v4 = vmax.f32 %v605_v2, %v628_v55 }
  0xee   :  { %v655_v60 = vpop.f32.mrf.mxu2 }
  0xef   :  { %v682_v61 = vpop.f32.mrf.mxu3  ;;  %v707_v63 = vpop.f32.mrf.mxu0  ;;  %v659_v8 = vmax.f32 %v632_v4, %v655_v60 }
  0xf0   :  { %v734_v0 = vpop.f32.mrf.mxu1  ;;  %v712_v11 = vmax.f32 %v685_v7, %v707_v63 }
  0xf1   :  { %v686_v12 = vmax.f32 %v659_v8, %v682_v61 }
  0xf2   :  { %v739_v13 = vmax.f32 %v712_v11, %v734_v0 }
  0xf6   :  { %v761_v5 = vpop.f32.mrf.mxu2 }
  0xf7   :  { %v788_v6 = vpop.f32.mrf.mxu3  ;;  %v709_v9 = vpop.f32.mrf.mxu0  ;;  %v766_v17 = vmax.f32 %v739_v13, %v761_v5 }
  0xf8   :  { %v736_v10 = vpop.f32.mrf.mxu1  ;;  %v713_v14 = vmax.f32 %v686_v12, %v709_v9 }
  0xf9   :  { %v793_v21 = vmax.f32 %v766_v17, %v788_v6 }
  0xfa   :  { %v740_v19 = vmax.f32 %v713_v14, %v736_v10 }
  0xfe   :  { %v763_v15 = vpop.f32.mrf.mxu2 }
  0xff   :  { %v790_v16 = vpop.f32.mrf.mxu3  ;;  %v815_v18 = vpop.f32.mrf.mxu0  ;;  %v767_v22 = vmax.f32 %v740_v19, %v763_v15 }
 0x100   :  { %v842_v20 = vpop.f32.mrf.mxu1  ;;  %v820_v23 = vmax.f32 %v793_v21, %v815_v18 }
 0x101   :  { %v794_v26 = vmax.f32 %v767_v22, %v790_v16 }
 0x102   :  { %v847_v28 = vmax.f32 %v820_v23, %v842_v20 }
 0x106   :  { %v869_v24 = vpop.f32.mrf.mxu2 }
 0x107   :  { %v896_v25 = vpop.f32.mrf.mxu3  ;;  %v817_v27 = vpop.f32.mrf.mxu0  ;;  %v874_v30 = vmax.f32 %v847_v28, %v869_v24 }
 0x108   :  { %v821_v29 = vmax.f32 %v794_v26, %v817_v27  ;;  %v844_v31 = vpop.f32.mrf.mxu1 }
 0x109   :  { %v901_v34 = vmax.f32 %v874_v30, %v896_v25 }
 0x10a   :  { %v848_v32 = vmax.f32 %v821_v29, %v844_v31 }
 0x10b   :  { %v907_v39 = vadd.f32 %v1186_v35, %v901_v34 }
 0x10e   :  { %v871_v33 = vpop.f32.mrf.mxu2 }
 0x10f   :  { %v875_v36 = vmax.f32 %v848_v32, %v871_v33  ;;  %v898_v37 = vpop.f32.mrf.mxu3 }
 0x111   :  { %v902_v38 = vmax.f32 %v875_v36, %v898_v37 }
 0x113   :  { %v908_v40 = vadd.f32 %v1186_v35, %v902_v38 }
 0x115   :  { %v1184_v41 = vpack.c.bf16 %v908_v40, %v907_v39 }
 0x117   :  { %1185 = vst [vmem:[%s1455_s3] sm:$0xff] %v1184_v41  }

// kernel: forward.3
= control target key start
LH: loop header
LB: loop body
LE: loop exit
PB: predicated region body
PF: predicated region fallthrough
CT: control target
= control target key end

     0   :  { %vm57_vm0 = vcmask 1041408   ;;  %vm44_vm1 = vcmask 31744   ;;  %s4353_s1 = inlined_call_operand.vmem [shape: bf16[4,128], index: 1, kind: input, shape index: {}]   ;;  %s4354_s0 = inlined_call_operand.vmem [shape: bf16[32,64,4], index: 0, kind: input, shape index: {}]   ;;  %s4355_s2 = inlined_call_operand.vmem [shape: f32[1,128], index: 2, kind: input, shape index: {}]   ;;  %s4356_s3 = inlined_call_operand.vmem [shape: bf16[64,128], index: 3, kind: output, shape index: {}]  }
   0x1   :  { %v15_v0 = vld [vmem:[%s4353_s1] sm:$0x3]  ;;  %v3437_v6 = vld [vmem:[%s4354_s0 + $0x8] sm:$0xff]  ;;  %v3438_v10 = vld [vmem:[%s4354_s0 + $0x10] sm:$0xff] }
   0x2   :  { %v3611_v1 = vsel %vm57_vm0, %v15_v0, 0  ;;  %v3436_v2 = vld [vmem:[%s4354_s0] sm:$0xff]  ;;  %v3441_v7 = vld [vmem:[%s4354_s0 + $0x28] sm:$0xff]  ;;  %v3442_v11 = vld [vmem:[%s4354_s0 + $0x30] sm:$0xff] }
   0x3   :  { %v3440_v3 = vld [vmem:[%s4354_s0 + $0x20] sm:$0xff]  ;;  %68 = vmatpush.bf16.msra.mxu0 %v3611_v1  ;;  %146 = vmatpush.bf16.msra.mxu1 %v3611_v1  ;;  %v3445_v8 = vld [vmem:[%s4354_s0 + $0x48] sm:$0xff]  ;;  %v3446_v12 = vld [vmem:[%s4354_s0 + $0x50] sm:$0xff] }
   0x4   :  { %v3444_v4 = vld [vmem:[%s4354_s0 + $0x40] sm:$0xff]  ;;  %224 = vmatpush.bf16.msra.mxu2 %v3611_v1  ;;  %302 = vmatpush.bf16.msra.mxu3 %v3611_v1  ;;  %v3449_v9 = vld [vmem:[%s4354_s0 + $0x68] sm:$0xff]  ;;  %v3450_v13 = vld [vmem:[%s4354_s0 + $0x70] sm:$0xff] }
   0x5   :  { %v3448_v5 = vld [vmem:[%s4354_s0 + $0x60] sm:$0xff]  ;;  %v3439_v14 = vld [vmem:[%s4354_s0 + $0x18] sm:$0xff]  ;;  %v3453_v22 = vld [vmem:[%s4354_s0 + $0x88] sm:$0xff] }
   0x6   :  { %2564 = vmatmul.msk.bf16.vlgmr.msra.gmra.mxu0 %vm44_vm1, %v3436_v2  ;;  %2592 = vmatmul.msk.bf16.vlgmr.msra.gmra.mxu1 %vm44_vm1, %v3440_v3  ;;  %v3443_v15 = vld [vmem:[%s4354_s0 + $0x38] sm:$0xff]  ;;  %v3452_v18 = vld [vmem:[%s4354_s0 + $0x80] sm:$0xff]  ;;  %v3457_v23 = vld [vmem:[%s4354_s0 + $0xa8] sm:$0xff] }
   0x7   :  { %380 = vmatpush.bf16.msrb.mxu0 %v3611_v1  ;;  %2620 = vmatmul.msk.bf16.vlgmr.msra.gmra.mxu2 %vm44_vm1, %v3444_v4  ;;  %v3447_v16 = vld [vmem:[%s4354_s0 + $0x58] sm:$0xff]  ;;  %v3456_v19 = vld [vmem:[%s4354_s0 + $0xa0] sm:$0xff]  ;;  %v3461_v24 = vld [vmem:[%s4354_s0 + $0xc8] sm:$0xff] }
   0x8   :  { %536 = vmatpush.bf16.msrb.mxu2 %v3611_v1  ;;  %2648 = vmatmul.msk.bf16.vlgmr.msra.gmra.mxu3 %vm44_vm1, %v3448_v5  ;;  %v3451_v17 = vld [vmem:[%s4354_s0 + $0x78] sm:$0xff]  ;;  %v3460_v20 = vld [vmem:[%s4354_s0 + $0xc0] sm:$0xff]  ;;  %v3465_v25 = vld [vmem:[%s4354_s0 + $0xe8] sm:$0xff] }
   0x9   :  { %614 = vmatpush.bf16.msrb.mxu3 %v3611_v1  ;;  %458 = vmatpush.bf16.msrb.mxu1 %v3611_v1  ;;  %v3464_v21 = vld [vmem:[%s4354_s0 + $0xe0] sm:$0xff]  ;;  %v3454_v26 = vld [vmem:[%s4354_s0 + $0x90] sm:$0xff]  ;;  %v3455_v30 = vld [vmem:[%s4354_s0 + $0x98] sm:$0xff] }
   0xa   :  { %v3458_v27 = vld [vmem:[%s4354_s0 + $0xb0] sm:$0xff]  ;;  %v3459_v31 = vld [vmem:[%s4354_s0 + $0xb8] sm:$0xff]  ;;  %v3468_v34 = vld [vmem:[%s4354_s0 + $0x100] sm:$0xff] }
   0xb   :  { %692 = vmatpush.bf16.msra.mxu0 %v3611_v1  ;;  %v3462_v28 = vld [vmem:[%s4354_s0 + $0xd0] sm:$0xff]  ;;  %v3463_v32 = vld [vmem:[%s4354_s0 + $0xd8] sm:$0xff]  ;;  %v3472_v35 = vld [vmem:[%s4354_s0 + $0x120] sm:$0xff] }
   0xc   :  { %848 = vmatpush.bf16.msra.mxu2 %v3611_v1  ;;  %v3466_v29 = vld [vmem:[%s4354_s0 + $0xf0] sm:$0xff]  ;;  %v3467_v33 = vld [vmem:[%s4354_s0 + $0xf8] sm:$0xff]  ;;  %v3476_v38 = vld [vmem:[%s4354_s0 + $0x140] sm:$0xff] }
   0xd   :  { %926 = vmatpush.bf16.msra.mxu3 %v3611_v1  ;;  %770 = vmatpush.bf16.msra.mxu1 %v3611_v1  ;;  %v3480_v39 = vld [vmem:[%s4354_s0 + $0x160] sm:$0xff]  ;;  %v3469_v52 = vld [vmem:[%s4354_s0 + $0x108] sm:$0xff] }
   0xe   :  { %v3473_v53 = vld [vmem:[%s4354_s0 + $0x128] sm:$0xff] }
   0xf   :  { %v3477_v57 = vld [vmem:[%s4354_s0 + $0x148] sm:$0xff] }
  0x10   :  { %v3481_v58 = vld [vmem:[%s4354_s0 + $0x168] sm:$0xff] }
  0x16   :  { %2565 = vmatmul.msk.bf16.gmra.mxu0 %vm44_vm1, %v3437_v6  ;;  %2593 = vmatmul.msk.bf16.gmra.mxu1 %vm44_vm1, %v3441_v7 }
  0x17   :  { %2621 = vmatmul.msk.bf16.gmra.mxu2 %vm44_vm1, %v3445_v8 }
  0x18   :  { %2649 = vmatmul.msk.bf16.gmra.mxu3 %vm44_vm1, %v3449_v9  ;;  %v3470_v9 = vld [vmem:[%s4354_s0 + $0x110] sm:$0xff] }
  0x26   :  { %2566 = vmatmul.msk.bf16.gmra.mxu0 %vm44_vm1, %v3438_v10  ;;  %2594 = vmatmul.msk.bf16.gmra.mxu1 %vm44_vm1, %v3442_v11  ;;  %v3474_v10 = vld [vmem:[%s4354_s0 + $0x130] sm:$0xff] }
  0x27   :  { %2622 = vmatmul.msk.bf16.gmra.mxu2 %vm44_vm1, %v3446_v12 }
  0x28   :  { %2650 = vmatmul.msk.bf16.gmra.mxu3 %vm44_vm1, %v3450_v13 }
  0x36   :  { %2567 = vmatmul.msk.bf16.gmra.mxu0 %vm44_vm1, %v3439_v14  ;;  %2595 = vmatmul.msk.bf16.gmra.mxu1 %vm44_vm1, %v3443_v15  ;;  %v3478_v14 = vld [vmem:[%s4354_s0 + $0x150] sm:$0xff] }
  0x37   :  { %2623 = vmatmul.msk.bf16.gmra.mxu2 %vm44_vm1, %v3447_v16  ;;  %v3482_v15 = vld [vmem:[%s4354_s0 + $0x170] sm:$0xff] }
  0x38   :  { %2651 = vmatmul.msk.bf16.gmra.mxu3 %vm44_vm1, %v3451_v17 }
  0x46   :  { %2676 = vmatmul.msk.bf16.vlgmr.msrb.gmra.mxu0 %vm44_vm1, %v3452_v18  ;;  %2704 = vmatmul.msk.bf16.vlgmr.msrb.gmra.mxu1 %vm44_vm1, %v3456_v19 }
  0x47   :  { %2732 = vmatmul.msk.bf16.vlgmr.msrb.gmra.mxu2 %vm44_vm1, %v3460_v20  ;;  %1004 = vmatpush.bf16.msrb.mxu0 %v3611_v1 }
  0x48   :  { %2760 = vmatmul.msk.bf16.vlgmr.msrb.gmra.mxu3 %vm44_vm1, %v3464_v21  ;;  %1160 = vmatpush.bf16.msrb.mxu2 %v3611_v1 }
  0x49   :  { %1238 = vmatpush.bf16.msrb.mxu3 %v3611_v1  ;;  %1082 = vmatpush.bf16.msrb.mxu1 %v3611_v1 }
  0x56   :  { %2677 = vmatmul.msk.bf16.gmra.mxu0 %vm44_vm1, %v3453_v22  ;;  %2705 = vmatmul.msk.bf16.gmra.mxu1 %vm44_vm1, %v3457_v23 }
  0x57   :  { %2733 = vmatmul.msk.bf16.gmra.mxu2 %vm44_vm1, %v3461_v24 }
  0x58   :  { %2761 = vmatmul.msk.bf16.gmra.mxu3 %vm44_vm1, %v3465_v25 }
  0x66   :  { %2678 = vmatmul.msk.bf16.gmra.mxu0 %vm44_vm1, %v3454_v26  ;;  %2706 = vmatmul.msk.bf16.gmra.mxu1 %vm44_vm1, %v3458_v27 }
  0x67   :  { %2734 = vmatmul.msk.bf16.gmra.mxu2 %vm44_vm1, %v3462_v28 }
  0x68   :  { %2762 = vmatmul.msk.bf16.gmra.mxu3 %vm44_vm1, %v3466_v29  ;;  %v3471_v29 = vld [vmem:[%s4354_s0 + $0x118] sm:$0xff] }
  0x76   :  { %2679 = vmatmul.msk.bf16.gmra.mxu0 %vm44_vm1, %v3455_v30  ;;  %2707 = vmatmul.msk.bf16.gmra.mxu1 %vm44_vm1, %v3459_v31  ;;  %v3475_v30 = vld [vmem:[%s4354_s0 + $0x138] sm:$0xff] }
  0x77   :  { %2735 = vmatmul.msk.bf16.gmra.mxu2 %vm44_vm1, %v3463_v32 }
  0x78   :  { %2763 = vmatmul.msk.bf16.gmra.mxu3 %vm44_vm1, %v3467_v33 }
  0x83   :  { %v70_v36 = vpop.f32.mrf.mxu0  ;;  %v148_v37 = vpop.f32.mrf.mxu1 }
  0x84   :  { %v90_v40 = vmax.f32 %v70_v36, 0.0 }
  0x86   :  { %v168_v41 = vmax.f32 %v90_v40, %v148_v37  ;;  %2788 = vmatmul.msk.bf16.vlgmr.msra.gmra.mxu0 %vm44_vm1, %v3468_v34  ;;  %2816 = vmatmul.msk.bf16.vlgmr.msra.gmra.mxu1 %vm44_vm1, %v3472_v35  ;;  %v3479_v34 = vld [vmem:[%s4354_s0 + $0x158] sm:$0xff] }
  0x87   :  { %2844 = vmatmul.msk.bf16.vlgmr.msra.gmra.mxu2 %vm44_vm1, %v3476_v38  ;;  %1316 = vmatpush.bf16.msra.mxu0 %v3611_v1  ;;  %v3483_v35 = vld [vmem:[%s4354_s0 + $0x178] sm:$0xff] }
  0x88   :  { %2872 = vmatmul.msk.bf16.vlgmr.msra.gmra.mxu3 %vm44_vm1, %v3480_v39  ;;  %1472 = vmatpush.bf16.msra.mxu2 %v3611_v1 }
  0x89   :  { %1550 = vmatpush.bf16.msra.mxu3 %v3611_v1  ;;  %1394 = vmatpush.bf16.msra.mxu1 %v3611_v1 }
  0x8a   :  { %v226_v42 = vpop.f32.mrf.mxu2 }
  0x8b   :  { %v304_v43 = vpop.f32.mrf.mxu3  ;;  %v246_v44 = vmax.f32 %v168_v41, %v226_v42  ;;  %v72_v45 = vpop.f32.mrf.mxu0 }
  0x8c   :  { %v150_v46 = vpop.f32.mrf.mxu1  ;;  %v91_v47 = vmax.f32 %v72_v45, 0.0 }
  0x8d   :  { %v3777_v48 = vmax.f32 %v246_v44, %v304_v43 }
  0x8e   :  { %v169_v49 = vmax.f32 %v91_v47, %v150_v46 }
  0x92   :  { %v228_v50 = vpop.f32.mrf.mxu2 }
  0x93   :  { %v306_v51 = vpop.f32.mrf.mxu3  ;;  %v247_v54 = vmax.f32 %v169_v49, %v228_v50  ;;  %v75_v55 = vpop.f32.mrf.mxu0  ;;  %v3484_v50 = vld [vmem:[%s4354_s0 + $0x180] sm:$0xff] }
  0x94   :  { %v153_v56 = vpop.f32.mrf.mxu1  ;;  %v92_v59 = vmax.f32 %v75_v55, 0.0  ;;  %v3492_v55 = vld [vmem:[%s4354_s0 + $0x1c0] sm:$0xff] }
  0x95   :  { %v3791_v60 = vmax.f32 %v247_v54, %v306_v51  ;;  %v3488_v51 = vld [vmem:[%s4354_s0 + $0x1a0] sm:$0xff] }
  0x96   :  { %v170_v61 = vmax.f32 %v92_v59, %v153_v56  ;;  %2789 = vmatmul.msk.bf16.gmra.mxu0 %vm44_vm1, %v3469_v52  ;;  %2817 = vmatmul.msk.bf16.gmra.mxu1 %vm44_vm1, %v3473_v53  ;;  %v3496_v56 = vld [vmem:[%s4354_s0 + $0x1e0] sm:$0xff] }
  0x97   :  { %2845 = vmatmul.msk.bf16.gmra.mxu2 %vm44_vm1, %v3477_v57 }
  0x98   :  { %2873 = vmatmul.msk.bf16.gmra.mxu3 %vm44_vm1, %v3481_v58 }
  0x9a   :  { %v231_v62 = vpop.f32.mrf.mxu2 }
  0x9b   :  { %v309_v63 = vpop.f32.mrf.mxu3  ;;  %v248_v0 = vmax.f32 %v170_v61, %v231_v62  ;;  %v77_v2 = vpop.f32.mrf.mxu0 }
  0x9c   :  { %v155_v3 = vpop.f32.mrf.mxu1  ;;  %v93_v4 = vmax.f32 %v77_v2, 0.0 }
  0x9d   :  { %v3797_v5 = vmax.f32 %v248_v0, %v309_v63 }
  0x9e   :  { %v171_v6 = vmax.f32 %v93_v4, %v155_v3 }
  0xa2   :  { %v233_v7 = vpop.f32.mrf.mxu2 }
  0xa3   :  { %v311_v8 = vpop.f32.mrf.mxu3  ;;  %v249_v11 = vmax.f32 %v171_v6, %v233_v7  ;;  %v80_v12 = vpop.f32.mrf.mxu0 }
  0xa4   :  { %v158_v13 = vpop.f32.mrf.mxu1  ;;  %v94_v16 = vmax.f32 %v80_v12, 0.0 }
  0xa5   :  { %v3811_v17 = vmax.f32 %v249_v11, %v311_v8  ;;  %v3485_v8 = vld [vmem:[%s4354_s0 + $0x188] sm:$0xff] }
  0xa6   :  { %v172_v18 = vmax.f32 %v94_v16, %v158_v13  ;;  %2790 = vmatmul.msk.bf16.gmra.mxu0 %vm44_vm1, %v3470_v9  ;;  %2818 = vmatmul.msk.bf16.gmra.mxu1 %vm44_vm1, %v3474_v10  ;;  %v3489_v9 = vld [vmem:[%s4354_s0 + $0x1a8] sm:$0xff] }
  0xa7   :  { %2846 = vmatmul.msk.bf16.gmra.mxu2 %vm44_vm1, %v3478_v14  ;;  %v3497_v13 = vld [vmem:[%s4354_s0 + $0x1e8] sm:$0xff] }
  0xa8   :  { %2874 = vmatmul.msk.bf16.gmra.mxu3 %vm44_vm1, %v3482_v15 }
  0xaa   :  { %v236_v19 = vpop.f32.mrf.mxu2 }
  0xab   :  { %v314_v20 = vpop.f32.mrf.mxu3  ;;  %v250_v21 = vmax.f32 %v172_v18, %v236_v19  ;;  %v82_v22 = vpop.f32.mrf.mxu0 }
  0xac   :  { %v160_v23 = vpop.f32.mrf.mxu1  ;;  %v95_v24 = vmax.f32 %v82_v22, 0.0 }
  0xad   :  { %v3817_v25 = vmax.f32 %v250_v21, %v314_v20 }
  0xae   :  { %v173_v26 = vmax.f32 %v95_v24, %v160_v23 }
  0xb2   :  { %v238_v27 = vpop.f32.mrf.mxu2 }
  0xb3   :  { %v316_v28 = vpop.f32.mrf.mxu3  ;;  %v251_v31 = vmax.f32 %v173_v26, %v238_v27  ;;  %v85_v32 = vpop.f32.mrf.mxu0 }
  0xb4   :  { %v163_v33 = vpop.f32.mrf.mxu1  ;;  %v96_v36 = vmax.f32 %v85_v32, 0.0 }
  0xb5   :  { %v3831_v37 = vmax.f32 %v251_v31, %v316_v28  ;;  %v3486_v28 = vld [vmem:[%s4354_s0 + $0x190] sm:$0xff] }
  0xb6   :  { %v174_v38 = vmax.f32 %v96_v36, %v163_v33  ;;  %2791 = vmatmul.msk.bf16.gmra.mxu0 %vm44_vm1, %v3471_v29  ;;  %2819 = vmatmul.msk.bf16.gmra.mxu1 %vm44_vm1, %v3475_v30  ;;  %v3490_v29 = vld [vmem:[%s4354_s0 + $0x1b0] sm:$0xff] }
  0xb7   :  { %2847 = vmatmul.msk.bf16.gmra.mxu2 %vm44_vm1, %v3479_v34  ;;  %v3498_v33 = vld [vmem:[%s4354_s0 + $0x1f0] sm:$0xff] }
  0xb8   :  { %2875 = vmatmul.msk.bf16.gmra.mxu3 %vm44_vm1, %v3483_v35 }
  0xba   :  { %v241_v39 = vpop.f32.mrf.mxu2 }
  0xbb   :  { %v319_v40 = vpop.f32.mrf.mxu3  ;;  %v252_v41 = vmax.f32 %v174_v38, %v241_v39  ;;  %v87_v42 = vpop.f32.mrf.mxu0 }
  0xbc   :  { %v165_v43 = vpop.f32.mrf.mxu1  ;;  %v97_v44 = vmax.f32 %v87_v42, 0.0 }
  0xbd   :  { %v3837_v45 = vmax.f32 %v252_v41, %v319_v40 }
  0xbe   :  { %v175_v46 = vmax.f32 %v97_v44, %v165_v43 }
  0xc2   :  { %v243_v47 = vpop.f32.mrf.mxu2 }
  0xc3   :  { %v321_v49 = vpop.f32.mrf.mxu3  ;;  %v253_v52 = vmax.f32 %v175_v46, %v243_v47  ;;  %v382_v53 = vpop.f32.mrf.mxu0 }
  0xc4   :  { %v460_v54 = vpop.f32.mrf.mxu1  ;;  %v402_v57 = vmax.f32 %v3777_v48, %v382_v53 }
  0xc5   :  { %v3852_v58 = vmax.f32 %v253_v52, %v321_v49  ;;  %v3487_v49 = vld [vmem:[%s4354_s0 + $0x198] sm:$0xff] }
  0xc6   :  { %v480_v59 = vmax.f32 %v402_v57, %v460_v54  ;;  %2900 = vmatmul.msk.bf16.vlgmr.msrb.gmra.mxu0 %vm44_vm1, %v3484_v50  ;;  %2928 = vmatmul.msk.bf16.vlgmr.msrb.gmra.mxu1 %vm44_vm1, %v3488_v51  ;;  %v3491_v50 = vld [vmem:[%s4354_s0 + $0x1b8] sm:$0xff] }
  0xc7   :  { %2956 = vmatmul.msk.bf16.vlgmr.msrb.gmra.mxu2 %vm44_vm1, %v3492_v55  ;;  %1628 = vmatpush.bf16.msrb.mxu0 %v3611_v1  ;;  %v3499_v54 = vld [vmem:[%s4354_s0 + $0x1f8] sm:$0xff] }
  0xc8   :  { %2984 = vmatmul.msk.bf16.vlgmr.msrb.gmra.mxu3 %vm44_vm1, %v3496_v56  ;;  %1784 = vmatpush.bf16.msrb.mxu2 %v3611_v1 }
  0xc9   :  { %1862 = vmatpush.bf16.msrb.mxu3 %v3611_v1  ;;  %1706 = vmatpush.bf16.msrb.mxu1 %v3611_v1 }
  0xca   :  { %v538_v48 = vpop.f32.mrf.mxu2 }
  0xcb   :  { %v616_v61 = vpop.f32.mrf.mxu3  ;;  %v558_v62 = vmax.f32 %v480_v59, %v538_v48  ;;  %v384_v63 = vpop.f32.mrf.mxu0 }
  0xcc   :  { %v462_v0 = vpop.f32.mrf.mxu1  ;;  %v403_v2 = vmax.f32 %v3791_v60, %v384_v63  ;;  %v3493_v60 = vld [vmem:[%s4354_s0 + $0x1c8] sm:$0xff] }
  0xcd   :  { %v3863_v3 = vmax.f32 %v558_v62, %v616_v61 }
  0xce   :  { %v481_v4 = vmax.f32 %v403_v2, %v462_v0 }
  0xd2   :  { %v540_v6 = vpop.f32.mrf.mxu2 }
  0xd3   :  { %v618_v7 = vpop.f32.mrf.mxu3  ;;  %v559_v10 = vmax.f32 %v481_v4, %v540_v6  ;;  %v387_v11 = vpop.f32.mrf.mxu0 }
  0xd4   :  { %v465_v12 = vpop.f32.mrf.mxu1  ;;  %v404_v14 = vmax.f32 %v3797_v5, %v387_v11 }
  0xd5   :  { %v3878_v15 = vmax.f32 %v559_v10, %v618_v7  ;;  %v3500_v7 = vld [vmem:[%s4354_s0 + $0x200] sm:$0xff] }
  0xd6   :  { %v482_v16 = vmax.f32 %v404_v14, %v465_v12  ;;  %2901 = vmatmul.msk.bf16.gmra.mxu0 %vm44_vm1, %v3485_v8  ;;  %2929 = vmatmul.msk.bf16.gmra.mxu1 %vm44_vm1, %v3489_v9  ;;  %v3504_v8 = vld [vmem:[%s4354_s0 + $0x220] sm:$0xff] }
  0xd7   :  { %2957 = vmatmul.msk.bf16.gmra.mxu2 %vm44_vm1, %v3493_v60  ;;  %v3512_v12 = vld [vmem:[%s4354_s0 + $0x260] sm:$0xff] }
  0xd8   :  { %2985 = vmatmul.msk.bf16.gmra.mxu3 %vm44_vm1, %v3497_v13 }
  0xda   :  { %v543_v18 = vpop.f32.mrf.mxu2 }
  0xdb   :  { %v621_v19 = vpop.f32.mrf.mxu3  ;;  %v560_v20 = vmax.f32 %v482_v16, %v543_v18  ;;  %v389_v21 = vpop.f32.mrf.mxu0 }
  0xdc   :  { %v467_v22 = vpop.f32.mrf.mxu1  ;;  %v405_v23 = vmax.f32 %v3811_v17, %v389_v21  ;;  %v3494_v17 = vld [vmem:[%s4354_s0 + $0x1d0] sm:$0xff] }
  0xdd   :  { %v3885_v24 = vmax.f32 %v560_v20, %v621_v19 }
  0xde   :  { %v483_v5 = vmax.f32 %v405_v23, %v467_v22 }
  0xe2   :  { %v545_v26 = vpop.f32.mrf.mxu2 }
  0xe3   :  { %v623_v27 = vpop.f32.mrf.mxu3  ;;  %v561_v30 = vmax.f32 %v483_v5, %v545_v26  ;;  %v392_v31 = vpop.f32.mrf.mxu0 }
  0xe4   :  { %v470_v32 = vpop.f32.mrf.mxu1  ;;  %v406_v34 = vmax.f32 %v3817_v25, %v392_v31 }
  0xe5   :  { %v3900_v35 = vmax.f32 %v561_v30, %v623_v27  ;;  %v3501_v27 = vld [vmem:[%s4354_s0 + $0x208] sm:$0xff] }
  0xe6   :  { %v484_v36 = vmax.f32 %v406_v34, %v470_v32  ;;  %2902 = vmatmul.msk.bf16.gmra.mxu0 %vm44_vm1, %v3486_v28  ;;  %2930 = vmatmul.msk.bf16.gmra.mxu1 %vm44_vm1, %v3490_v29  ;;  %v3505_v28 = vld [vmem:[%s4354_s0 + $0x228] sm:$0xff] }
  0xe7   :  { %2958 = vmatmul.msk.bf16.gmra.mxu2 %vm44_vm1, %v3494_v17  ;;  %v3513_v32 = vld [vmem:[%s4354_s0 + $0x268] sm:$0xff] }
  0xe8   :  { %2986 = vmatmul.msk.bf16.gmra.mxu3 %vm44_vm1, %v3498_v33 }
  0xea   :  { %v548_v38 = vpop.f32.mrf.mxu2 }
  0xeb   :  { %v626_v39 = vpop.f32.mrf.mxu3  ;;  %v562_v40 = vmax.f32 %v484_v36, %v548_v38  ;;  %v394_v41 = vpop.f32.mrf.mxu0 }
  0xec   :  { %v472_v42 = vpop.f32.mrf.mxu1  ;;  %v407_v43 = vmax.f32 %v3831_v37, %v394_v41  ;;  %v3495_v37 = vld [vmem:[%s4354_s0 + $0x1d8] sm:$0xff] }
  0xed   :  { %v3907_v44 = vmax.f32 %v562_v40, %v626_v39 }
  0xee   :  { %v485_v25 = vmax.f32 %v407_v43, %v472_v42 }
  0xf2   :  { %v550_v46 = vpop.f32.mrf.mxu2 }
  0xf3   :  { %v628_v47 = vpop.f32.mrf.mxu3  ;;  %v563_v51 = vmax.f32 %v485_v25, %v550_v46  ;;  %v397_v52 = vpop.f32.mrf.mxu0 }
  0xf4   :  { %v475_v53 = vpop.f32.mrf.mxu1  ;;  %v408_v55 = vmax.f32 %v3837_v45, %v397_v52 }
  0xf5   :  { %v3922_v56 = vmax.f32 %v563_v51, %v628_v47  ;;  %v3502_v47 = vld [vmem:[%s4354_s0 + $0x210] sm:$0xff] }
  0xf6   :  { %v486_v57 = vmax.f32 %v408_v55, %v475_v53  ;;  %2903 = vmatmul.msk.bf16.gmra.mxu0 %vm44_vm1, %v3487_v49  ;;  %2931 = vmatmul.msk.bf16.gmra.mxu1 %vm44_vm1, %v3491_v50  ;;  %v3506_v49 = vld [vmem:[%s4354_s0 + $0x230] sm:$0xff] }
  0xf7   :  { %2959 = vmatmul.msk.bf16.gmra.mxu2 %vm44_vm1, %v3495_v37  ;;  %v3514_v53 = vld [vmem:[%s4354_s0 + $0x270] sm:$0xff] }
  0xf8   :  { %2987 = vmatmul.msk.bf16.gmra.mxu3 %vm44_vm1, %v3499_v54 }
  0xfa   :  { %v553_v59 = vpop.f32.mrf.mxu2 }
  0xfb   :  { %v631_v48 = vpop.f32.mrf.mxu3  ;;  %v564_v61 = vmax.f32 %v486_v57, %v553_v59  ;;  %v399_v62 = vpop.f32.mrf.mxu0 }
  0xfc   :  { %v477_v63 = vpop.f32.mrf.mxu1  ;;  %v409_v0 = vmax.f32 %v3852_v58, %v399_v62  ;;  %v3508_v58 = vld [vmem:[%s4354_s0 + $0x240] sm:$0xff] }
  0xfd   :  { %v3929_v2 = vmax.f32 %v564_v61, %v631_v48 }
  0xfe   :  { %v487_v45 = vmax.f32 %v409_v0, %v477_v63 }
 0x102   :  { %v555_v4 = vpop.f32.mrf.mxu2 }
 0x103   :  { %v633_v6 = vpop.f32.mrf.mxu3  ;;  %v565_v9 = vmax.f32 %v487_v45, %v555_v4  ;;  %v694_v10 = vpop.f32.mrf.mxu0 }
 0x104   :  { %v772_v11 = vpop.f32.mrf.mxu1  ;;  %v714_v60 = vmax.f32 %v3863_v3, %v694_v10 }
 0x105   :  { %v3944_v13 = vmax.f32 %v565_v9, %v633_v6  ;;  %v3503_v6 = vld [vmem:[%s4354_s0 + $0x218] sm:$0xff] }
 0x106   :  { %v792_v14 = vmax.f32 %v714_v60, %v772_v11  ;;  %3012 = vmatmul.msk.bf16.vlgmr.msra.gmra.mxu0 %vm44_vm1, %v3500_v7  ;;  %3040 = vmatmul.msk.bf16.vlgmr.msra.gmra.mxu1 %vm44_vm1, %v3504_v8  ;;  %v3507_v7 = vld [vmem:[%s4354_s0 + $0x238] sm:$0xff] }
 0x107   :  { %3068 = vmatmul.msk.bf16.vlgmr.msra.gmra.mxu2 %vm44_vm1, %v3508_v58  ;;  %1940 = vmatpush.bf16.msra.mxu0 %v3611_v1  ;;  %v3515_v11 = vld [vmem:[%s4354_s0 + $0x278] sm:$0xff] }
 0x108   :  { %3096 = vmatmul.msk.bf16.vlgmr.msra.gmra.mxu3 %vm44_vm1, %v3512_v12  ;;  %2096 = vmatpush.bf16.msra.mxu2 %v3611_v1 }
 0x109   :  { %2174 = vmatpush.bf16.msra.mxu3 %v3611_v1  ;;  %2018 = vmatpush.bf16.msra.mxu1 %v3611_v1 }
 0x10a   :  { %v850_v3 = vpop.f32.mrf.mxu2 }
 0x10b   :  { %v928_v16 = vpop.f32.mrf.mxu3  ;;  %v870_v18 = vmax.f32 %v792_v14, %v850_v3  ;;  %v696_v19 = vpop.f32.mrf.mxu0 }
 0x10c   :  { %v774_v20 = vpop.f32.mrf.mxu1  ;;  %v715_v21 = vmax.f32 %v3878_v15, %v696_v19  ;;  %v3509_v15 = vld [vmem:[%s4354_s0 + $0x248] sm:$0xff] }
 0x10d   :  { %v3955_v22 = vmax.f32 %v870_v18, %v928_v16 }
 0x10e   :  { %v793_v23 = vmax.f32 %v715_v21, %v774_v20 }
 0x112   :  { %v852_v5 = vpop.f32.mrf.mxu2 }
 0x113   :  { %v930_v26 = vpop.f32.mrf.mxu3  ;;  %v871_v29 = vmax.f32 %v793_v23, %v852_v5  ;;  %v699_v30 = vpop.f32.mrf.mxu0 }
 0x114   :  { %v777_v31 = vpop.f32.mrf.mxu1  ;;  %v716_v17 = vmax.f32 %v3885_v24, %v699_v30 }
 0x115   :  { %v3970_v33 = vmax.f32 %v871_v29, %v930_v26  ;;  %v3516_v26 = vld [vmem:[%s4354_s0 + $0x280] sm:$0xff] }
 0x116   :  { %v794_v34 = vmax.f32 %v716_v17, %v777_v31  ;;  %3013 = vmatmul.msk.bf16.gmra.mxu0 %vm44_vm1, %v3501_v27  ;;  %3041 = vmatmul.msk.bf16.gmra.mxu1 %vm44_vm1, %v3505_v28  ;;  %v3520_v27 = vld [vmem:[%s4354_s0 + $0x2a0] sm:$0xff] }
 0x117   :  { %3069 = vmatmul.msk.bf16.gmra.mxu2 %vm44_vm1, %v3509_v15  ;;  %v3528_v31 = vld [vmem:[%s4354_s0 + $0x2e0] sm:$0xff] }
 0x118   :  { %3097 = vmatmul.msk.bf16.gmra.mxu3 %vm44_vm1, %v3513_v32 }
 0x11a   :  { %v855_v36 = vpop.f32.mrf.mxu2 }
 0x11b   :  { %v933_v38 = vpop.f32.mrf.mxu3  ;;  %v872_v39 = vmax.f32 %v794_v34, %v855_v36  ;;  %v701_v40 = vpop.f32.mrf.mxu0 }
 0x11c   :  { %v779_v41 = vpop.f32.mrf.mxu1  ;;  %v717_v42 = vmax.f32 %v3900_v35, %v701_v40  ;;  %v3510_v35 = vld [vmem:[%s4354_s0 + $0x250] sm:$0xff] }
 0x11d   :  { %v3977_v43 = vmax.f32 %v872_v39, %v933_v38 }
 0x11e   :  { %v795_v24 = vmax.f32 %v717_v42, %v779_v41 }
 0x122   :  { %v857_v25 = vpop.f32.mrf.mxu2 }
 0x123   :  { %v935_v46 = vpop.f32.mrf.mxu3  ;;  %v873_v50 = vmax.f32 %v795_v24, %v857_v25  ;;  %v704_v51 = vpop.f32.mrf.mxu0 }
 0x124   :  { %v782_v52 = vpop.f32.mrf.mxu1  ;;  %v718_v37 = vmax.f32 %v3907_v44, %v704_v51  ;;  %v3529_v51 = vld [vmem:[%s4354_s0 + $0x2e8] sm:$0xff] }
 0x125   :  { %v3992_v54 = vmax.f32 %v873_v50, %v935_v46  ;;  %v3517_v46 = vld [vmem:[%s4354_s0 + $0x288] sm:$0xff] }
 0x126   :  { %v796_v55 = vmax.f32 %v718_v37, %v782_v52  ;;  %3014 = vmatmul.msk.bf16.gmra.mxu0 %vm44_vm1, %v3502_v47  ;;  %3042 = vmatmul.msk.bf16.gmra.mxu1 %vm44_vm1, %v3506_v49 }
 0x127   :  { %3070 = vmatmul.msk.bf16.gmra.mxu2 %vm44_vm1, %v3510_v35 }
 0x128   :  { %3098 = vmatmul.msk.bf16.gmra.mxu3 %vm44_vm1, %v3514_v53 }
 0x12a   :  { %v860_v57 = vpop.f32.mrf.mxu2 }
 0x12b   :  { %v938_v59 = vpop.f32.mrf.mxu3  ;;  %v874_v48 = vmax.f32 %v796_v55, %v860_v57  ;;  %v706_v61 = vpop.f32.mrf.mxu0 }
 0x12c   :  { %v784_v62 = vpop.f32.mrf.mxu1  ;;  %v719_v63 = vmax.f32 %v3922_v56, %v706_v61  ;;  %v3511_v56 = vld [vmem:[%s4354_s0 + $0x258] sm:$0xff] }
 0x12d   :  { %v3999_v0 = vmax.f32 %v874_v48, %v938_v59 }
 0x12e   :  { %v797_v44 = vmax.f32 %v719_v63, %v784_v62 }
 0x132   :  { %v862_v45 = vpop.f32.mrf.mxu2 }
 0x133   :  { %v940_v4 = vpop.f32.mrf.mxu3  ;;  %v875_v8 = vmax.f32 %v797_v44, %v862_v45  ;;  %v709_v9 = vpop.f32.mrf.mxu0  ;;  %v3518_v45 = vld [vmem:[%s4354_s0 + $0x290] sm:$0xff] }
 0x134   :  { %v787_v10 = vpop.f32.mrf.mxu1  ;;  %v720_v58 = vmax.f32 %v3929_v2, %v709_v9  ;;  %v3530_v9 = vld [vmem:[%s4354_s0 + $0x2f0] sm:$0xff] }
 0x135   :  { %v4014_v12 = vmax.f32 %v875_v8, %v940_v4  ;;  %v3522_v4 = vld [vmem:[%s4354_s0 + $0x2b0] sm:$0xff] }
 0x136   :  { %v798_v60 = vmax.f32 %v720_v58, %v787_v10  ;;  %3015 = vmatmul.msk.bf16.gmra.mxu0 %vm44_vm1, %v3503_v6  ;;  %3043 = vmatmul.msk.bf16.gmra.mxu1 %vm44_vm1, %v3507_v7 }
 0x137   :  { %3071 = vmatmul.msk.bf16.gmra.mxu2 %vm44_vm1, %v3511_v56 }
 0x138   :  { %3099 = vmatmul.msk.bf16.gmra.mxu3 %vm44_vm1, %v3515_v11 }
 0x13a   :  { %v865_v14 = vpop.f32.mrf.mxu2 }
 0x13b   :  { %v943_v3 = vpop.f32.mrf.mxu3  ;;  %v876_v16 = vmax.f32 %v798_v60, %v865_v14  ;;  %v711_v18 = vpop.f32.mrf.mxu0 }
 0x13c   :  { %v789_v19 = vpop.f32.mrf.mxu1  ;;  %v721_v20 = vmax.f32 %v3944_v13, %v711_v18  ;;  %v3524_v13 = vld [vmem:[%s4354_s0 + $0x2c0] sm:$0xff] }
 0x13d   :  { %v4021_v21 = vmax.f32 %v876_v16, %v943_v3 }
 0x13e   :  { %v799_v2 = vmax.f32 %v721_v20, %v789_v19 }
 0x142   :  { %v867_v23 = vpop.f32.mrf.mxu2 }
 0x143   :  { %v945_v5 = vpop.f32.mrf.mxu3  ;;  %v877_v28 = vmax.f32 %v799_v2, %v867_v23  ;;  %v1006_v29 = vpop.f32.mrf.mxu0  ;;  %v3519_v23 = vld [vmem:[%s4354_s0 + $0x298] sm:$0xff] }
 0x144   :  { %v1084_v30 = vpop.f32.mrf.mxu1  ;;  %v1026_v15 = vmax.f32 %v3955_v22, %v1006_v29  ;;  %v3531_v29 = vld [vmem:[%s4354_s0 + $0x2f8] sm:$0xff] }
 0x145   :  { %v4036_v32 = vmax.f32 %v877_v28, %v945_v5  ;;  %v3523_v5 = vld [vmem:[%s4354_s0 + $0x2b8] sm:$0xff] }
 0x146   :  { %v1104_v17 = vmax.f32 %v1026_v15, %v1084_v30  ;;  %3124 = vmatmul.msk.bf16.vlgmr.msrb.gmra.mxu0 %vm44_vm1, %v3516_v26  ;;  %3152 = vmatmul.msk.bf16.vlgmr.msrb.gmra.mxu1 %vm44_vm1, %v3520_v27 }
 0x147   :  { %3180 = vmatmul.msk.bf16.vlgmr.msrb.gmra.mxu2 %vm44_vm1, %v3524_v13  ;;  %2252 = vmatpush.bf16.msrb.mxu0 %v3611_v1 }
 0x148   :  { %3208 = vmatmul.msk.bf16.vlgmr.msrb.gmra.mxu3 %vm44_vm1, %v3528_v31  ;;  %2408 = vmatpush.bf16.msrb.mxu2 %v3611_v1 }
 0x149   :  { %2486 = vmatpush.bf16.msrb.mxu3 %v3611_v1  ;;  %2330 = vmatpush.bf16.msrb.mxu1 %v3611_v1  ;;  %v3521_v1 = vld [vmem:[%s4354_s0 + $0x2a8] sm:$0xff] }
 0x14a   :  { %v1162_v22 = vpop.f32.mrf.mxu2 }
 0x14b   :  { %v1240_v34 = vpop.f32.mrf.mxu3  ;;  %v1182_v36 = vmax.f32 %v1104_v17, %v1162_v22  ;;  %v1008_v38 = vpop.f32.mrf.mxu0 }
 0x14c   :  { %v1086_v39 = vpop.f32.mrf.mxu1  ;;  %v1027_v40 = vmax.f32 %v3970_v33, %v1008_v38  ;;  %v3525_v33 = vld [vmem:[%s4354_s0 + $0x2c8] sm:$0xff] }
 0x14d   :  { %v4047_v41 = vmax.f32 %v1182_v36, %v1240_v34 }
 0x14e   :  { %v1105_v42 = vmax.f32 %v1027_v40, %v1086_v39 }
 0x152   :  { %v1164_v24 = vpop.f32.mrf.mxu2 }
 0x153   :  { %v1242_v25 = vpop.f32.mrf.mxu3  ;;  %v1183_v47 = vmax.f32 %v1105_v42, %v1164_v24  ;;  %v1011_v49 = vpop.f32.mrf.mxu0  ;;  %v3532_v24 = vld [vmem:[%s4354_s0 + $0x300] sm:$0xff] }
 0x154   :  { %v1089_v50 = vpop.f32.mrf.mxu1  ;;  %v1028_v52 = vmax.f32 %v3977_v43, %v1011_v49  ;;  %v3544_v49 = vld [vmem:[%s4354_s0 + $0x360] sm:$0xff] }
 0x155   :  { %v4062_v35 = vmax.f32 %v1183_v47, %v1242_v25  ;;  %v3536_v25 = vld [vmem:[%s4354_s0 + $0x320] sm:$0xff] }
 0x156   :  { %v1106_v53 = vmax.f32 %v1028_v52, %v1089_v50  ;;  %3125 = vmatmul.msk.bf16.gmra.mxu0 %vm44_vm1, %v3517_v46  ;;  %3153 = vmatmul.msk.bf16.gmra.mxu1 %vm44_vm1, %v3521_v1 }
 0x157   :  { %3181 = vmatmul.msk.bf16.gmra.mxu2 %vm44_vm1, %v3525_v33 }
 0x158   :  { %3209 = vmatmul.msk.bf16.gmra.mxu3 %vm44_vm1, %v3529_v51 }
 0x15a   :  { %v1167_v37 = vpop.f32.mrf.mxu2 }
 0x15b   :  { %v1245_v55 = vpop.f32.mrf.mxu3  ;;  %v1184_v57 = vmax.f32 %v1106_v53, %v1167_v37  ;;  %v1013_v59 = vpop.f32.mrf.mxu0 }
 0x15c   :  { %v1091_v48 = vpop.f32.mrf.mxu1  ;;  %v1029_v61 = vmax.f32 %v3992_v54, %v1013_v59  ;;  %v3526_v54 = vld [vmem:[%s4354_s0 + $0x2d0] sm:$0xff] }
 0x15d   :  { %v4069_v62 = vmax.f32 %v1184_v57, %v1245_v55 }
 0x15e   :  { %v1107_v43 = vmax.f32 %v1029_v61, %v1091_v48 }
 0x162   :  { %v1169_v63 = vpop.f32.mrf.mxu2 }
 0x163   :  { %v1247_v44 = vpop.f32.mrf.mxu3  ;;  %v1185_v6 = vmax.f32 %v1107_v43, %v1169_v63  ;;  %v1016_v7 = vpop.f32.mrf.mxu0  ;;  %v3533_v63 = vld [vmem:[%s4354_s0 + $0x308] sm:$0xff] }
 0x164   :  { %v1094_v8 = vpop.f32.mrf.mxu1  ;;  %v1030_v10 = vmax.f32 %v3999_v0, %v1016_v7  ;;  %v3545_v7 = vld [vmem:[%s4354_s0 + $0x368] sm:$0xff] }
 0x165   :  { %v4084_v56 = vmax.f32 %v1185_v6, %v1247_v44  ;;  %v3537_v44 = vld [vmem:[%s4354_s0 + $0x328] sm:$0xff] }
 0x166   :  { %v1108_v11 = vmax.f32 %v1030_v10, %v1094_v8  ;;  %3126 = vmatmul.msk.bf16.gmra.mxu0 %vm44_vm1, %v3518_v45  ;;  %3154 = vmatmul.msk.bf16.gmra.mxu1 %vm44_vm1, %v3522_v4 }
 0x167   :  { %3182 = vmatmul.msk.bf16.gmra.mxu2 %vm44_vm1, %v3526_v54 }
 0x168   :  { %3210 = vmatmul.msk.bf16.gmra.mxu3 %vm44_vm1, %v3530_v9 }
 0x16a   :  { %v1172_v58 = vpop.f32.mrf.mxu2 }
 0x16b   :  { %v1250_v60 = vpop.f32.mrf.mxu3  ;;  %v1186_v14 = vmax.f32 %v1108_v11, %v1172_v58  ;;  %v1018_v3 = vpop.f32.mrf.mxu0 }
 0x16c   :  { %v1096_v16 = vpop.f32.mrf.mxu1  ;;  %v1031_v18 = vmax.f32 %v4014_v12, %v1018_v3  ;;  %v3527_v12 = vld [vmem:[%s4354_s0 + $0x2d8] sm:$0xff] }
 0x16d   :  { %v4091_v19 = vmax.f32 %v1186_v14, %v1250_v60 }
 0x16e   :  { %v1109_v0 = vmax.f32 %v1031_v18, %v1096_v16 }
 0x172   :  { %v1174_v20 = vpop.f32.mrf.mxu2 }
 0x173   :  { %v1252_v2 = vpop.f32.mrf.mxu3  ;;  %v1187_v26 = vmax.f32 %v1109_v0, %v1174_v20  ;;  %v1021_v27 = vpop.f32.mrf.mxu0  ;;  %v3534_v20 = vld [vmem:[%s4354_s0 + $0x310] sm:$0xff] }
 0x174   :  { %v1099_v28 = vpop.f32.mrf.mxu1  ;;  %v1032_v30 = vmax.f32 %v4021_v21, %v1021_v27  ;;  %v3546_v27 = vld [vmem:[%s4354_s0 + $0x370] sm:$0xff] }
 0x175   :  { %v4106_v13 = vmax.f32 %v1187_v26, %v1252_v2  ;;  %v3538_v2 = vld [vmem:[%s4354_s0 + $0x330] sm:$0xff] }
 0x176   :  { %v1110_v31 = vmax.f32 %v1032_v30, %v1099_v28  ;;  %3127 = vmatmul.msk.bf16.gmra.mxu0 %vm44_vm1, %v3519_v23  ;;  %3155 = vmatmul.msk.bf16.gmra.mxu1 %vm44_vm1, %v3523_v5 }
 0x177   :  { %3183 = vmatmul.msk.bf16.gmra.mxu2 %vm44_vm1, %v3527_v12 }
 0x178   :  { %3211 = vmatmul.msk.bf16.gmra.mxu3 %vm44_vm1, %v3531_v29 }
 0x17a   :  { %v1177_v15 = vpop.f32.mrf.mxu2 }
 0x17b   :  { %v1255_v17 = vpop.f32.mrf.mxu3  ;;  %v1188_v22 = vmax.f32 %v1110_v31, %v1177_v15  ;;  %v1023_v34 = vpop.f32.mrf.mxu0 }
 0x17c   :  { %v1101_v36 = vpop.f32.mrf.mxu1  ;;  %v1033_v38 = vmax.f32 %v4036_v32, %v1023_v34  ;;  %v3540_v32 = vld [vmem:[%s4354_s0 + $0x340] sm:$0xff] }
 0x17d   :  { %v4113_v39 = vmax.f32 %v1188_v22, %v1255_v17 }
 0x17e   :  { %v1111_v21 = vmax.f32 %v1033_v38, %v1101_v36 }
 0x182   :  { %v1179_v40 = vpop.f32.mrf.mxu2 }
 0x183   :  { %v1257_v42 = vpop.f32.mrf.mxu3  ;;  %v1189_v46 = vmax.f32 %v1111_v21, %v1179_v40  ;;  %v1318_v1 = vpop.f32.mrf.mxu0  ;;  %v3535_v40 = vld [vmem:[%s4354_s0 + $0x318] sm:$0xff] }
 0x184   :  { %v1396_v47 = vpop.f32.mrf.mxu1  ;;  %v1338_v50 = vmax.f32 %v4047_v41, %v1318_v1  ;;  %v3547_v1 = vld [vmem:[%s4354_s0 + $0x378] sm:$0xff] }
 0x185   :  { %v4128_v33 = vmax.f32 %v1189_v46, %v1257_v42  ;;  %v3539_v42 = vld [vmem:[%s4354_s0 + $0x338] sm:$0xff] }
 0x186   :  { %v1416_v51 = vmax.f32 %v1338_v50, %v1396_v47  ;;  %3236 = vmatmul.msk.bf16.vlgmr.msra.gmra.mxu0 %vm44_vm1, %v3532_v24  ;;  %3264 = vmatmul.msk.bf16.vlgmr.msra.gmra.mxu1 %vm44_vm1, %v3536_v25 }
 0x187   :  { %3292 = vmatmul.msk.bf16.vlgmr.msra.gmra.mxu2 %vm44_vm1, %v3540_v32 }
 0x188   :  { %3320 = vmatmul.msk.bf16.vlgmr.msra.gmra.mxu3 %vm44_vm1, %v3544_v49 }
 0x18a   :  { %v1474_v52 = vpop.f32.mrf.mxu2 }
 0x18b   :  { %v1552_v53 = vpop.f32.mrf.mxu3  ;;  %v1494_v37 = vmax.f32 %v1416_v51, %v1474_v52  ;;  %v1320_v55 = vpop.f32.mrf.mxu0 }
 0x18c   :  { %v1398_v57 = vpop.f32.mrf.mxu1  ;;  %v1339_v59 = vmax.f32 %v4062_v35, %v1320_v55  ;;  %v3541_v35 = vld [vmem:[%s4354_s0 + $0x348] sm:$0xff] }
 0x18d   :  { %v4135_v48 = vmax.f32 %v1494_v37, %v1552_v53 }
 0x18e   :  { %v1417_v41 = vmax.f32 %v1339_v59, %v1398_v57 }
 0x192   :  { %v1476_v61 = vpop.f32.mrf.mxu2 }
 0x193   :  { %v1554_v43 = vpop.f32.mrf.mxu3  ;;  %v1495_v45 = vmax.f32 %v1417_v41, %v1476_v61  ;;  %v1323_v4 = vpop.f32.mrf.mxu0  ;;  %v3548_v61 = vld [vmem:[%s4354_s0 + $0x380] sm:$0xff] }
 0x194   :  { %v1401_v6 = vpop.f32.mrf.mxu1  ;;  %v1340_v8 = vmax.f32 %v4069_v62, %v1323_v4  ;;  %v3560_v4 = vld [vmem:[%s4354_s0 + $0x3e0] sm:$0xff] }
 0x195   :  { %v4150_v54 = vmax.f32 %v1495_v45, %v1554_v43  ;;  %v3552_v43 = vld [vmem:[%s4354_s0 + $0x3a0] sm:$0xff] }
 0x196   :  { %v1418_v9 = vmax.f32 %v1340_v8, %v1401_v6  ;;  %3237 = vmatmul.msk.bf16.gmra.mxu0 %vm44_vm1, %v3533_v63  ;;  %3265 = vmatmul.msk.bf16.gmra.mxu1 %vm44_vm1, %v3537_v44 }
 0x197   :  { %3293 = vmatmul.msk.bf16.gmra.mxu2 %vm44_vm1, %v3541_v35 }
 0x198   :  { %3321 = vmatmul.msk.bf16.gmra.mxu3 %vm44_vm1, %v3545_v7 }
 0x19a   :  { %v1479_v10 = vpop.f32.mrf.mxu2 }
 0x19b   :  { %v1557_v11 = vpop.f32.mrf.mxu3  ;;  %v1496_v58 = vmax.f32 %v1418_v9, %v1479_v10  ;;  %v1325_v60 = vpop.f32.mrf.mxu0 }
 0x19c   :  { %v1403_v14 = vpop.f32.mrf.mxu1  ;;  %v1341_v3 = vmax.f32 %v4084_v56, %v1325_v60  ;;  %v3542_v56 = vld [vmem:[%s4354_s0 + $0x350] sm:$0xff] }
 0x19d   :  { %v4157_v16 = vmax.f32 %v1496_v58, %v1557_v11 }
 0x19e   :  { %v1419_v62 = vmax.f32 %v1341_v3, %v1403_v14 }
 0x1a2   :  { %v1481_v18 = vpop.f32.mrf.mxu2 }
 0x1a3   :  { %v1559_v0 = vpop.f32.mrf.mxu3  ;;  %v1497_v23 = vmax.f32 %v1419_v62, %v1481_v18  ;;  %v1328_v5 = vpop.f32.mrf.mxu0  ;;  %v3549_v18 = vld [vmem:[%s4354_s0 + $0x388] sm:$0xff] }
 0x1a4   :  { %v1406_v26 = vpop.f32.mrf.mxu1  ;;  %v1342_v28 = vmax.f32 %v4091_v19, %v1328_v5  ;;  %v3561_v5 = vld [vmem:[%s4354_s0 + $0x3e8] sm:$0xff] }
 0x1a5   :  { %v4172_v12 = vmax.f32 %v1497_v23, %v1559_v0  ;;  %v3553_v0 = vld [vmem:[%s4354_s0 + $0x3a8] sm:$0xff] }
 0x1a6   :  { %v1420_v29 = vmax.f32 %v1342_v28, %v1406_v26  ;;  %3238 = vmatmul.msk.bf16.gmra.mxu0 %vm44_vm1, %v3534_v20  ;;  %3266 = vmatmul.msk.bf16.gmra.mxu1 %vm44_vm1, %v3538_v2 }
 0x1a7   :  { %3294 = vmatmul.msk.bf16.gmra.mxu2 %vm44_vm1, %v3542_v56 }
 0x1a8   :  { %3322 = vmatmul.msk.bf16.gmra.mxu3 %vm44_vm1, %v3546_v27 }
 0x1aa   :  { %v1484_v30 = vpop.f32.mrf.mxu2 }
 0x1ab   :  { %v1562_v31 = vpop.f32.mrf.mxu3  ;;  %v1498_v15 = vmax.f32 %v1420_v29, %v1484_v30  ;;  %v1330_v17 = vpop.f32.mrf.mxu0 }
 0x1ac   :  { %v1408_v22 = vpop.f32.mrf.mxu1  ;;  %v1343_v34 = vmax.f32 %v4106_v13, %v1330_v17  ;;  %v3543_v13 = vld [vmem:[%s4354_s0 + $0x358] sm:$0xff] }
 0x1ad   :  { %v4179_v36 = vmax.f32 %v1498_v15, %v1562_v31 }
 0x1ae   :  { %v1421_v19 = vmax.f32 %v1343_v34, %v1408_v22 }
 0x1b2   :  { %v1486_v38 = vpop.f32.mrf.mxu2 }
 0x1b3   :  { %v1564_v21 = vpop.f32.mrf.mxu3  ;;  %v1499_v24 = vmax.f32 %v1421_v19, %v1486_v38  ;;  %v1333_v25 = vpop.f32.mrf.mxu0  ;;  %v3550_v38 = vld [vmem:[%s4354_s0 + $0x390] sm:$0xff] }
 0x1b4   :  { %v1411_v46 = vpop.f32.mrf.mxu1  ;;  %v1344_v47 = vmax.f32 %v4113_v39, %v1333_v25  ;;  %v3562_v25 = vld [vmem:[%s4354_s0 + $0x3f0] sm:$0xff] }
 0x1b5   :  { %v4194_v32 = vmax.f32 %v1499_v24, %v1564_v21  ;;  %v3554_v21 = vld [vmem:[%s4354_s0 + $0x3b0] sm:$0xff] }
 0x1b6   :  { %v1422_v49 = vmax.f32 %v1344_v47, %v1411_v46  ;;  %3239 = vmatmul.msk.bf16.gmra.mxu0 %vm44_vm1, %v3535_v40  ;;  %3267 = vmatmul.msk.bf16.gmra.mxu1 %vm44_vm1, %v3539_v42 }
 0x1b7   :  { %3295 = vmatmul.msk.bf16.gmra.mxu2 %vm44_vm1, %v3543_v13 }
 0x1b8   :  { %3323 = vmatmul.msk.bf16.gmra.mxu3 %vm44_vm1, %v3547_v1 }
 0x1ba   :  { %v1489_v50 = vpop.f32.mrf.mxu2 }
 0x1bb   :  { %v1567_v51 = vpop.f32.mrf.mxu3  ;;  %v1500_v52 = vmax.f32 %v1422_v49, %v1489_v50  ;;  %v1335_v53 = vpop.f32.mrf.mxu0 }
 0x1bc   :  { %v1413_v37 = vpop.f32.mrf.mxu1  ;;  %v1345_v55 = vmax.f32 %v4128_v33, %v1335_v53  ;;  %v3556_v33 = vld [vmem:[%s4354_s0 + $0x3c0] sm:$0xff] }
 0x1bd   :  { %v4201_v57 = vmax.f32 %v1500_v52, %v1567_v51 }
 0x1be   :  { %v1423_v39 = vmax.f32 %v1345_v55, %v1413_v37 }
 0x1c2   :  { %v1491_v59 = vpop.f32.mrf.mxu2 }
 0x1c3   :  { %v1569_v41 = vpop.f32.mrf.mxu3  ;;  %v1501_v63 = vmax.f32 %v1423_v39, %v1491_v59  ;;  %v1630_v44 = vpop.f32.mrf.mxu0  ;;  %v3551_v59 = vld [vmem:[%s4354_s0 + $0x398] sm:$0xff] }
 0x1c4   :  { %v1708_v45 = vpop.f32.mrf.mxu1  ;;  %v1650_v6 = vmax.f32 %v4135_v48, %v1630_v44  ;;  %v3559_v44 = vld [vmem:[%s4354_s0 + $0x3d8] sm:$0xff] }
 0x1c5   :  { %v4216_v35 = vmax.f32 %v1501_v63, %v1569_v41  ;;  %v3555_v41 = vld [vmem:[%s4354_s0 + $0x3b8] sm:$0xff] }
 0x1c6   :  { %v1728_v7 = vmax.f32 %v1650_v6, %v1708_v45  ;;  %3348 = vmatmul.msk.bf16.vlgmr.msrb.gmra.mxu0 %vm44_vm1, %v3548_v61  ;;  %3376 = vmatmul.msk.bf16.vlgmr.msrb.gmra.mxu1 %vm44_vm1, %v3552_v43 }
 0x1c7   :  { %3404 = vmatmul.msk.bf16.vlgmr.msrb.gmra.mxu2 %vm44_vm1, %v3556_v33 }
 0x1c8   :  { %3432 = vmatmul.msk.bf16.vlgmr.msrb.gmra.mxu3 %vm44_vm1, %v3560_v4 }
 0x1ca   :  { %v1786_v8 = vpop.f32.mrf.mxu2 }
 0x1cb   :  { %v1864_v9 = vpop.f32.mrf.mxu3  ;;  %v1806_v10 = vmax.f32 %v1728_v7, %v1786_v8  ;;  %v1632_v11 = vpop.f32.mrf.mxu0 }
 0x1cc   :  { %v1710_v58 = vpop.f32.mrf.mxu1  ;;  %v1651_v60 = vmax.f32 %v4150_v54, %v1632_v11  ;;  %v3557_v54 = vld [vmem:[%s4354_s0 + $0x3c8] sm:$0xff] }
 0x1cd   :  { %v4223_v14 = vmax.f32 %v1806_v10, %v1864_v9 }
 0x1ce   :  { %v1729_v48 = vmax.f32 %v1651_v60, %v1710_v58 }
 0x1d2   :  { %v1788_v3 = vpop.f32.mrf.mxu2 }
 0x1d3   :  { %v1866_v62 = vpop.f32.mrf.mxu3  ;;  %v1807_v20 = vmax.f32 %v1729_v48, %v1788_v3  ;;  %v1635_v2 = vpop.f32.mrf.mxu0 }
 0x1d4   :  { %v1713_v23 = vpop.f32.mrf.mxu1  ;;  %v1652_v26 = vmax.f32 %v4157_v16, %v1635_v2 }
 0x1d5   :  { %v4238_v56 = vmax.f32 %v1807_v20, %v1866_v62 }
 0x1d6   :  { %v1730_v27 = vmax.f32 %v1652_v26, %v1713_v23  ;;  %3349 = vmatmul.msk.bf16.gmra.mxu0 %vm44_vm1, %v3549_v18  ;;  %3377 = vmatmul.msk.bf16.gmra.mxu1 %vm44_vm1, %v3553_v0 }
 0x1d7   :  { %3405 = vmatmul.msk.bf16.gmra.mxu2 %vm44_vm1, %v3557_v54 }
 0x1d8   :  { %3433 = vmatmul.msk.bf16.gmra.mxu3 %vm44_vm1, %v3561_v5 }
 0x1da   :  { %v1791_v28 = vpop.f32.mrf.mxu2 }
 0x1db   :  { %v1869_v29 = vpop.f32.mrf.mxu3  ;;  %v1808_v30 = vmax.f32 %v1730_v27, %v1791_v28  ;;  %v1637_v31 = vpop.f32.mrf.mxu0 }
 0x1dc   :  { %v1715_v15 = vpop.f32.mrf.mxu1  ;;  %v1653_v17 = vmax.f32 %v4172_v12, %v1637_v31  ;;  %v3558_v12 = vld [vmem:[%s4354_s0 + $0x3d0] sm:$0xff] }
 0x1dd   :  { %v4245_v22 = vmax.f32 %v1808_v30, %v1869_v29 }
 0x1de   :  { %v1731_v16 = vmax.f32 %v1653_v17, %v1715_v15 }
 0x1e2   :  { %v1793_v34 = vpop.f32.mrf.mxu2 }
 0x1e3   :  { %v1871_v19 = vpop.f32.mrf.mxu3  ;;  %v1809_v40 = vmax.f32 %v1731_v16, %v1793_v34  ;;  %v1640_v42 = vpop.f32.mrf.mxu0 }
 0x1e4   :  { %v1718_v24 = vpop.f32.mrf.mxu1  ;;  %v1654_v46 = vmax.f32 %v4179_v36, %v1640_v42 }
 0x1e5   :  { %v4260_v13 = vmax.f32 %v1809_v40, %v1871_v19 }
 0x1e6   :  { %v1732_v1 = vmax.f32 %v1654_v46, %v1718_v24  ;;  %3350 = vmatmul.msk.bf16.gmra.mxu0 %vm44_vm1, %v3550_v38  ;;  %3378 = vmatmul.msk.bf16.gmra.mxu1 %vm44_vm1, %v3554_v21 }
 0x1e7   :  { %3406 = vmatmul.msk.bf16.gmra.mxu2 %vm44_vm1, %v3558_v12 }
 0x1e8   :  { %3434 = vmatmul.msk.bf16.gmra.mxu3 %vm44_vm1, %v3562_v25 }
 0x1ea   :  { %v1796_v47 = vpop.f32.mrf.mxu2 }
 0x1eb   :  { %v1874_v49 = vpop.f32.mrf.mxu3  ;;  %v1810_v50 = vmax.f32 %v1732_v1, %v1796_v47  ;;  %v1642_v51 = vpop.f32.mrf.mxu0 }
 0x1ec   :  { %v1720_v52 = vpop.f32.mrf.mxu1  ;;  %v1655_v53 = vmax.f32 %v4194_v32, %v1642_v51  ;;  %v3563_v32 = vld [vmem:[%s4354_s0 + $0x3f8] sm:$0xff] }
 0x1ed   :  { %v1888_v37 = vmax.f32 %v1810_v50, %v1874_v49 }
 0x1ee   :  { %v1733_v36 = vmax.f32 %v1655_v53, %v1720_v52 }
 0x1f2   :  { %v1798_v55 = vpop.f32.mrf.mxu2 }
 0x1f3   :  { %v1876_v39 = vpop.f32.mrf.mxu3  ;;  %v1811_v61 = vmax.f32 %v1733_v36, %v1798_v55  ;;  %v1645_v43 = vpop.f32.mrf.mxu0 }
 0x1f4   :  { %v1723_v63 = vpop.f32.mrf.mxu1  ;;  %v1656_v45 = vmax.f32 %v4201_v57, %v1645_v43 }
 0x1f5   :  { %v4280_v33 = vmax.f32 %v1811_v61, %v1876_v39 }
 0x1f6   :  { %v1734_v4 = vmax.f32 %v1656_v45, %v1723_v63  ;;  %3351 = vmatmul.msk.bf16.gmra.mxu0 %vm44_vm1, %v3551_v59  ;;  %3379 = vmatmul.msk.bf16.gmra.mxu1 %vm44_vm1, %v3555_v41 }
 0x1f7   :  { %3407 = vmatmul.msk.bf16.gmra.mxu2 %vm44_vm1, %v3559_v44 }
 0x1f8   :  { %3435 = vmatmul.msk.bf16.gmra.mxu3 %vm44_vm1, %v3563_v32 }
 0x1fa   :  { %v1801_v6 = vpop.f32.mrf.mxu2 }
 0x1fb   :  { %v1879_v7 = vpop.f32.mrf.mxu3  ;;  %v1812_v8 = vmax.f32 %v1734_v4, %v1801_v6  ;;  %v1647_v9 = vpop.f32.mrf.mxu0 }
 0x1fc   :  { %v1725_v10 = vpop.f32.mrf.mxu1  ;;  %v1657_v11 = vmax.f32 %v4216_v35, %v1647_v9 }
 0x1fd   :  { %v1890_v58 = vmax.f32 %v1812_v8, %v1879_v7 }
 0x1fe   :  { %v1735_v57 = vmax.f32 %v1657_v11, %v1725_v10 }
 0x202   :  { %v1803_v60 = vpop.f32.mrf.mxu2 }
 0x203   :  { %v1881_v48 = vpop.f32.mrf.mxu3  ;;  %v1813_v3 = vmax.f32 %v1735_v57, %v1803_v60  ;;  %v1942_v62 = vpop.f32.mrf.mxu0 }
 0x204   :  { %v2020_v18 = vpop.f32.mrf.mxu1  ;;  %v1962_v0 = vmax.f32 %v4223_v14, %v1942_v62 }
 0x205   :  { %v4288_v20 = vmax.f32 %v1813_v3, %v1881_v48 }
 0x206   :  { %v2040_v2 = vmax.f32 %v1962_v0, %v2020_v18 }
 0x20a   :  { %v2098_v23 = vpop.f32.mrf.mxu2 }
 0x20b   :  { %v2176_v54 = vpop.f32.mrf.mxu3  ;;  %v2118_v5 = vmax.f32 %v2040_v2, %v2098_v23  ;;  %v1944_v26 = vpop.f32.mrf.mxu0 }
 0x20c   :  { %v2022_v27 = vpop.f32.mrf.mxu1  ;;  %v1963_v32 = vmax.f32 %v4238_v56, %v1944_v26 }
 0x20d   :  { %v2196_v28 = vmax.f32 %v2118_v5, %v2176_v54  ;;  %v4318_v5 = vld [vmem:[%s4355_s2] ss:$0 sm:$0xff] }
 0x20e   :  { %v2041_v8 = vmax.f32 %v1963_v32, %v2022_v27 }
 0x212   :  { %v2100_v29 = vpop.f32.mrf.mxu2 }
 0x213   :  { %v2178_v35 = vpop.f32.mrf.mxu3  ;;  %v1947_v30 = vpop.f32.mrf.mxu0  ;;  %v2119_v9 = vmax.f32 %v2041_v8, %v2100_v29 }
 0x214   :  { %v2025_v31 = vpop.f32.mrf.mxu1  ;;  %v1964_v15 = vmax.f32 %v4245_v22, %v1947_v30 }
 0x215   :  { %v2197_v57 = vmax.f32 %v2119_v9, %v2178_v35 }
 0x216   :  { %v2042_v17 = vmax.f32 %v1964_v15, %v2025_v31 }
 0x21a   :  { %v2103_v16 = vpop.f32.mrf.mxu2 }
 0x21b   :  { %v2181_v34 = vpop.f32.mrf.mxu3  ;;  %v2120_v19 = vmax.f32 %v2042_v17, %v2103_v16  ;;  %v1949_v14 = vpop.f32.mrf.mxu0 }
 0x21c   :  { %v2027_v38 = vpop.f32.mrf.mxu1  ;;  %v1965_v0 = vmax.f32 %v4260_v13, %v1949_v14 }
 0x21d   :  { %v4291_v21 = vmax.f32 %v2120_v19, %v2181_v34 }
 0x21e   :  { %v2043_v29 = vmax.f32 %v1965_v0, %v2027_v38 }
 0x222   :  { %v2105_v40 = vpop.f32.mrf.mxu2 }
 0x223   :  { %v2183_v42 = vpop.f32.mrf.mxu3  ;;  %v1952_v24 = vpop.f32.mrf.mxu0  ;;  %v2121_v30 = vmax.f32 %v2043_v29, %v2105_v40 }
 0x224   :  { %v2030_v12 = vpop.f32.mrf.mxu1  ;;  %v1966_v25 = vmax.f32 %v1888_v37, %v1952_v24 }
 0x225   :  { %v2199_v19 = vmax.f32 %v2121_v30, %v2183_v42 }
 0x226   :  { %v2044_v46 = vmax.f32 %v1966_v25, %v2030_v12 }
 0x22a   :  { %v2108_v1 = vpop.f32.mrf.mxu2 }
 0x22b   :  { %v2186_v47 = vpop.f32.mrf.mxu3  ;;  %v2122_v49 = vmax.f32 %v2044_v46, %v2108_v1  ;;  %v4293_v50 = vpop.f32.mrf.mxu0 }
 0x22c   :  { %v4295_v22 = vpop.f32.mrf.mxu1  ;;  %v1967_v40 = vmax.f32 %v4280_v33, %v4293_v50 }
 0x22d   :  { %v4297_v51 = vmax.f32 %v2122_v49, %v2186_v47 }
 0x22e   :  { %v2045_v42 = vmax.f32 %v1967_v40, %v4295_v22 }
 0x232   :  { %v4299_v52 = vpop.f32.mrf.mxu2 }
 0x233   :  { %v4301_v53 = vpop.f32.mrf.mxu3  ;;  %v1957_v36 = vpop.f32.mrf.mxu0 }
 0x234   :  { %v2035_v55 = vpop.f32.mrf.mxu1  ;;  %v1968_v39 = vmax.f32 %v1890_v58, %v1957_v36 }
 0x236   :  { %v2046_v59 = vmax.f32 %v1968_v39, %v2035_v55 }
 0x23a   :  { %v2113_v41 = vpop.f32.mrf.mxu2 }
 0x23b   :  { %v2191_v37 = vpop.f32.mrf.mxu3  ;;  %v2124_v61 = vmax.f32 %v2046_v59, %v2113_v41  ;;  %v4303_v43 = vpop.f32.mrf.mxu0  ;;  %v2123_v59 = vmax.f32 %v2045_v42, %v4299_v52 }
 0x23c   :  { %v4305_v63 = vpop.f32.mrf.mxu1 }
 0x23d   :  { %v4307_v44 = vmax.f32 %v2124_v61, %v2191_v37 }
 0x242   :  { %v4310_v45 = vpop.f32.mrf.mxu2 }
 0x243   :  { %v4312_v4 = vpop.f32.mrf.mxu3  ;;  %v2254_v6 = vpop.f32.mrf.mxu0 }
 0x244   :  { %v2332_v7 = vpop.f32.mrf.mxu1  ;;  %v2274_v10 = vmax.f32 %v2196_v28, %v2254_v6  ;;  %v2201_v6 = vmax.f32 %v2123_v59, %v4301_v53 }
 0x246   :  { %v2352_v3 = vmax.f32 %v2274_v10, %v2332_v7  ;;  %v1969_v10 = vmax.f32 %v4288_v20, %v4303_v43 }
 0x248   :  { %v2047_v53 = vmax.f32 %v1969_v10, %v4305_v63 }
 0x24a   :  { %v2410_v11 = vpop.f32.mrf.mxu2 }
 0x24b   :  { %v2488_v58 = vpop.f32.mrf.mxu3  ;;  %v2256_v60 = vpop.f32.mrf.mxu0  ;;  %v2430_v18 = vmax.f32 %v2352_v3, %v2410_v11 }
 0x24c   :  { %v2334_v48 = vpop.f32.mrf.mxu1  ;;  %v2275_v62 = vmax.f32 %v2197_v57, %v2256_v60 }
 0x24d   :  { %v2508_v54 = vmax.f32 %v2430_v18, %v2488_v58  ;;  %v2125_v18 = vmax.f32 %v2047_v53, %v4310_v45 }
 0x24e   :  { %v2353_v56 = vmax.f32 %v2275_v62, %v2334_v48 }
 0x24f   :  { %v2520_v31 = vadd.f32 %v4318_v5, %v2508_v54  ;;  %v2203_v54 = vmax.f32 %v2125_v18, %v4312_v4 }
 0x252   :  { %v2412_v2 = vpop.f32.mrf.mxu2 }
 0x253   :  { %v2490_v23 = vpop.f32.mrf.mxu3  ;;  %v2431_v26 = vmax.f32 %v2353_v56, %v2412_v2  ;;  %v2259_v27 = vpop.f32.mrf.mxu0 }
 0x254   :  { %v2337_v28 = vpop.f32.mrf.mxu1  ;;  %v2276_v17 = vmax.f32 %v4291_v21, %v2259_v27 }
 0x255   :  { %v2509_v35 = vmax.f32 %v2431_v26, %v2490_v23 }
 0x256   :  { %v2354_v12 = vmax.f32 %v2276_v17, %v2337_v28 }
 0x257   :  { %v2521_v15 = vadd.f32 %v4318_v5, %v2509_v35 }
 0x259   :  { %v3567_v13 = vpack.c.bf16 %v2521_v15, %v2520_v31 }
 0x25a   :  { %v2415_v16 = vpop.f32.mrf.mxu2 }
 0x25b   :  { %v2493_v34 = vpop.f32.mrf.mxu3  ;;  %3568 = vst [vmem:[%s4356_s3] sm:$0xff] %v3567_v13   ;;  %v2261_v14 = vpop.f32.mrf.mxu0  ;;  %v2432_v25 = vmax.f32 %v2354_v12, %v2415_v16 }
 0x25c   :  { %v2339_v24 = vpop.f32.mrf.mxu1  ;;  %v2277_v38 = vmax.f32 %v2199_v19, %v2261_v14 }
 0x25d   :  { %v2510_v49 = vmax.f32 %v2432_v25, %v2493_v34 }
 0x25e   :  { %v2355_v46 = vmax.f32 %v2277_v38, %v2339_v24 }
 0x25f   :  { %v2522_v41 = vadd.f32 %v4318_v5, %v2510_v49 }
 0x262   :  { %v2417_v1 = vpop.f32.mrf.mxu2 }
 0x263   :  { %v2495_v47 = vpop.f32.mrf.mxu3  ;;  %v2433_v21 = vmax.f32 %v2355_v46, %v2417_v1  ;;  %v2264_v36 = vpop.f32.mrf.mxu0 }
 0x264   :  { %v2342_v55 = vpop.f32.mrf.mxu1  ;;  %v2278_v32 = vmax.f32 %v4297_v51, %v2264_v36 }
 0x265   :  { %v2511_v39 = vmax.f32 %v2433_v21, %v2495_v47 }
 0x266   :  { %v2356_v8 = vmax.f32 %v2278_v32, %v2342_v55 }
 0x267   :  { %v2523_v37 = vadd.f32 %v4318_v5, %v2511_v39 }
 0x269   :  { %v3572_v61 = vpack.c.bf16 %v2523_v37, %v2522_v41 }
 0x26a   :  { %v2420_v33 = vpop.f32.mrf.mxu2 }
 0x26b   :  { %v2498_v50 = vpop.f32.mrf.mxu3  ;;  %3584 = vst [vmem:[%s4356_s3 + $0x8] sm:$0xff] %v3572_v61   ;;  %v2266_v7 = vpop.f32.mrf.mxu0  ;;  %v2434_v52 = vmax.f32 %v2356_v8, %v2420_v33 }
 0x26c   :  { %v2344_v22 = vpop.f32.mrf.mxu1  ;;  %v2279_v9 = vmax.f32 %v2201_v6, %v2266_v7 }
 0x26d   :  { %v2512_v51 = vmax.f32 %v2434_v52, %v2498_v50 }
 0x26e   :  { %v2357_v11 = vmax.f32 %v2279_v9, %v2344_v22 }
 0x26f   :  { %v2524_v0 = vadd.f32 %v4318_v5, %v2512_v51 }
 0x272   :  { %v2422_v58 = vpop.f32.mrf.mxu2 }
 0x273   :  { %v2500_v57 = vpop.f32.mrf.mxu3  ;;  %v2435_v60 = vmax.f32 %v2357_v11, %v2422_v58  ;;  %v2269_v48 = vpop.f32.mrf.mxu0 }
 0x274   :  { %v2347_v62 = vpop.f32.mrf.mxu1  ;;  %v2280_v23 = vmax.f32 %v4307_v44, %v2269_v48 }
 0x275   :  { %v2513_v3 = vmax.f32 %v2435_v60, %v2500_v57 }
 0x276   :  { %v2358_v26 = vmax.f32 %v2280_v23, %v2347_v62 }
 0x277   :  { %v2525_v56 = vadd.f32 %v4318_v5, %v2513_v3 }
 0x279   :  { %v3577_v2 = vpack.c.bf16 %v2525_v56, %v2524_v0 }
 0x27a   :  { %v2425_v20 = vpop.f32.mrf.mxu2 }
 0x27b   :  { %v2503_v43 = vpop.f32.mrf.mxu3  ;;  %3585 = vst [vmem:[%s4356_s3 + $0x10] sm:$0xff] %v3577_v2   ;;  %v2271_v63 = vpop.f32.mrf.mxu0  ;;  %v2436_v28 = vmax.f32 %v2358_v26, %v2425_v20 }
 0x27c   :  { %v2281_v27 = vmax.f32 %v2203_v54, %v2271_v63  ;;  %v2349_v45 = vpop.f32.mrf.mxu1 }
 0x27d   :  { %v2514_v30 = vmax.f32 %v2436_v28, %v2503_v43 }
 0x27e   :  { %v2359_v29 = vmax.f32 %v2281_v27, %v2349_v45 }
 0x27f   :  { %v2526_v44 = vadd.f32 %v4318_v5, %v2514_v30 }
 0x282   :  { %v2427_v35 = vpop.f32.mrf.mxu2 }
 0x283   :  { %v2437_v31 = vmax.f32 %v2359_v29, %v2427_v35  ;;  %v2505_v15 = vpop.f32.mrf.mxu3 }
 0x285   :  { %v2515_v13 = vmax.f32 %v2437_v31, %v2505_v15 }
 0x287   :  { %v2527_v17 = vadd.f32 %v4318_v5, %v2515_v13 }
 0x289   :  { %v3582_v4 = vpack.c.bf16 %v2527_v17, %v2526_v44 }
 0x28b   :  { %3586 = vst [vmem:[%s4356_s3 + $0x18] sm:$0xff] %v3582_v4  }

</bundles_post_ra>
